<compile_context>
chip_gen: v5e
topology: v5e:2x2
jax: 0.10.0
libtpu: 0.0.40
codegen_flags: <defaults>
</compile_context>

<pallas_src>
import functools

import jax
import jax.numpy as jnp
from jax import lax
from jax.experimental import pallas as pl
from jax.experimental.pallas import tpu as pltpu


def _round_up(x, m):
    return ((x + m - 1) // m) * m


def _lstm_recurrence_kernel(gx_ref, whh_hbm_ref, out_ref,
                            whh_ref, whh_sem, hist_ref, h_ref, c_ref):
    """One grid step = one (batch block, time block) of the LSTM recurrence.

    gx_ref     : (t_blk, b_blk, 4*Hp)  precomputed x_t @ W_ih^T + (b_ih+b_hh)
    whh_hbm_ref: (Hp, 4*Hp) bf16       recurrent weight W_hh^T, left in HBM
    out_ref    : (b_blk, t_blk, Hp)    per-timestep hidden states (B,T,H slab)
    whh_ref    : (Hp, 4*Hp) bf16 VMEM  single-buffered resident weight
    whh_sem    : DMA semaphore for the one-time weight copy
    hist_ref   : (t_blk, b_blk, Hp) f32 VMEM  per-block h history
    h_ref,c_ref: (b_blk, Hp) f32 VMEM  recurrent state (persist across time)
    """
    t_idx = pl.program_id(1)

    @pl.when(t_idx == 0)
    def _():
        # Load the resident recurrent weight once per batch block (single
        # buffered) and reset the state (PyTorch default initial state: 0).
        cp = pltpu.make_async_copy(whh_hbm_ref, whh_ref, whh_sem)
        cp.start()
        h_ref[...] = jnp.zeros_like(h_ref)
        c_ref[...] = jnp.zeros_like(c_ref)
        cp.wait()

    hp = h_ref.shape[-1]
    t_blk = gx_ref.shape[0]

    def _sigmoid(x):
        # sigmoid(x) = 0.5*tanh(0.5*x) + 0.5 : one EUP transcendental instead
        # of exp + reciprocal on the serial critical path.
        return 0.5 * jnp.tanh(0.5 * x) + 0.5

    def step(s, carry):
        h_prev = h_ref[...]                               # (b_blk, Hp) f32
        c_prev = c_ref[...]                               # (b_blk, Hp) f32

        # Only the recurrent matmul remains serial: bf16 operands on the MXU,
        # f32 accumulation.
        gates = gx_ref[s].astype(jnp.float32) + jnp.dot(
            h_prev.astype(whh_ref.dtype), whh_ref[...],
            preferred_element_type=jnp.float32)           # (b_blk, 4*Hp) f32

        # PyTorch gate order [i, f, g, o]; each gate is a whole lane block.
        i_g = _sigmoid(gates[:, 0 * hp:1 * hp])
        f_g = _sigmoid(gates[:, 1 * hp:2 * hp])
        g_g = jnp.tanh(gates[:, 2 * hp:3 * hp])
        o_g = _sigmoid(gates[:, 3 * hp:4 * hp])

        c_new = f_g * c_prev + i_g * g_g
        h_new = o_g * jnp.tanh(c_new)

        c_ref[...] = c_new
        h_ref[...] = h_new
        hist_ref[s] = h_new          # dynamic index only on the leading axis
        return carry

    # Partial unroll: LLO scheduling visibility without vreg spills when
    # t_blk is raised to 64-128.
    lax.fori_loop(0, t_blk, step, 0, unroll=min(8, t_blk))

    # Emit the whole (b_blk, t_blk, Hp) output slab in (B, T, H) layout with
    # static, lane-dense stores -> no wrapper-side transpose of the output.
    for k in range(t_blk):
        out_ref[:, k:k + 1, :] = hist_ref[k][:, None, :].astype(out_ref.dtype)


@functools.partial(
    jax.jit,
    static_argnames=("hidden_size", "time_block", "batch_block", "gx_dtype"))
def rnn_forward(x_btc, w_ih, w_hh, b_ih, b_hh, *, hidden_size,
                time_block=32, batch_block=None, gx_dtype=jnp.float32):
    """Equivalent of RNN(torch.nn.LSTM(I, H, batch_first=True))(x).

    Args:
      x_btc : (B, T, I) float32
      w_ih  : (4H, I)   float32   (PyTorch weight_ih_l0)
      w_hh  : (4H, H)   float32   (PyTorch weight_hh_l0)
      b_ih  : (4H,)     float32
      b_hh  : (4H,)     float32
      time_block : timesteps per grid step (rounded up to a multiple of 8).
                   Raise to 64-128 on v6e/v5e (128 MiB VMEM); keep smaller on
                   v7x (64 MiB VMEM).
      batch_block: rows per batch block ("parallel" grid axis, e.g. for v7x's
                   two TensorCores).  None -> whole (padded) batch.
      gx_dtype   : dtype used to stream the precomputed input projection.
                   Use jnp.bfloat16 on v5e to halve the dominant HBM stream.
    Returns:
      output: (B, T, H) in x dtype (only the output, state is discarded).
    """
    B, T, I = x_btc.shape
    H = hidden_size

    # ---- Lane-dense padding ------------------------------------------------
    # Each gate occupies whole 128-lane blocks; batch (MXU M dim / sublanes)
    # is a multiple of 8.  Padded gate pre-activations are 0, so padded h/c
    # lanes stay exactly 0 and never leak into real lanes (W_hh pad is 0).
    hp = _round_up(H, 128)
    b_blk = _round_up(B, 8) if batch_block is None else _round_up(batch_block, 8)
    bp = _round_up(_round_up(B, 8), b_blk)
    t_blk = min(_round_up(time_block, 8), _round_up(T, 8))
    tp = _round_up(T, t_blk)

    # ---- Hoisted input projection: one big parallel matmul -----------------
    # Produced directly in (T, B, 4H) layout (transpose fused into the matmul).
    # TODO(synk): pass precision=lax.Precision.HIGHEST here if full f32
    # fidelity of the input projection is required.
    gx = jnp.einsum("bti,gi->tbg", x_btc, w_ih) + (b_ih + b_hh)   # (T, B, 4H)
    gx = gx.reshape(T, B, 4, H)                                    # gate-wise pad
    gx = jnp.pad(gx, ((0, tp - T), (0, bp - B), (0, 0), (0, hp - H)))
    gx = gx.reshape(tp, bp, 4 * hp).astype(gx_dtype)

    # Recurrent weight W_hh^T, gate-padded, bf16 for the MXU.
    whh_t = jnp.transpose(w_hh, (1, 0)).reshape(H, 4, H)
    whh_t = jnp.pad(whh_t, ((0, hp - H), (0, 0), (0, hp - H)))
    whh_t = whh_t.reshape(hp, 4 * hp).astype(jnp.bfloat16)

    # ---- VMEM budget derived from the actual block sizes -------------------
    gx_blk_b = t_blk * b_blk * 4 * hp * jnp.dtype(gx_dtype).itemsize
    out_blk_b = b_blk * t_blk * hp * jnp.dtype(x_btc.dtype).itemsize
    whh_b = hp * 4 * hp * 2                      # single-buffered scratch
    hist_b = t_blk * b_blk * hp * 4
    hc_b = 2 * b_blk * hp * 4
    need = 2 * gx_blk_b + 2 * out_blk_b + whh_b + hist_b + hc_b
    vmem_limit = max(32 * 2**20, min(100 * 2**20, int(need * 1.5) + (1 << 20)))
    vmem_limit = int(max(vmem_limit, need + (2 << 20)))
    # TODO(synk): on v7x cap time_block so `need` stays under ~56 MiB
    # (64 MiB physical VMEM per TensorCore).

    out = pl.pallas_call(
        _lstm_recurrence_kernel,
        out_shape=jax.ShapeDtypeStruct((bp, tp, hp), x_btc.dtype),
        grid_spec=pltpu.PrefetchScalarGridSpec(
            num_scalar_prefetch=0,
            grid=(bp // b_blk, tp // t_blk),
            in_specs=[
                # gx streamed per (batch block, time block)
                pl.BlockSpec((t_blk, b_blk, 4 * hp), lambda b, t: (t, b, 0)),
                # W_hh^T stays in HBM; DMA'd once per batch block (no double
                # buffering of a constant block)
                pl.BlockSpec(memory_space=pl.ANY),
            ],
            out_specs=pl.BlockSpec((b_blk, t_blk, hp), lambda b, t: (b, t, 0)),
            scratch_shapes=[
                pltpu.VMEM((hp, 4 * hp), jnp.bfloat16),      # resident W_hh^T
                pltpu.SemaphoreType.DMA(()),                 # its DMA sem
                pltpu.VMEM((t_blk, b_blk, hp), jnp.float32),  # block h history
                pltpu.VMEM((b_blk, hp), jnp.float32),         # h state
                pltpu.VMEM((b_blk, hp), jnp.float32),         # c state
            ],
        ),
        compiler_params=pltpu.CompilerParams(
            # batch blocks are independent (v7x megacore); time is sequential
            dimension_semantics=("parallel", "arbitrary"),
            vmem_limit_bytes=vmem_limit,
        ),
    )(gx, whh_t)

    # Padded timesteps keep evolving h/c on zero gx; harmless because the
    # final state is discarded (the wrapper returns only `output`).
    return out[:B, :T, :H]


def _reference_lstm(x_btc, w_ih, w_hh, b_ih, b_hh, hidden_size):
    """Pure-JAX f32 reference (mirrors torch.nn.LSTM, batch_first=True)."""
    B, T, I = x_btc.shape
    H = hidden_size

    def step(carry, x_t):
        h, c = carry
        gates = x_t @ w_ih.T + h @ w_hh.T + b_ih + b_hh
        i = jax.nn.sigmoid(gates[:, 0 * H:1 * H])
        f = jax.nn.sigmoid(gates[:, 1 * H:2 * H])
        g = jnp.tanh(gates[:, 2 * H:3 * H])
        o = jax.nn.sigmoid(gates[:, 3 * H:4 * H])
        c_new = f * c + i * g
        h_new = o * jnp.tanh(c_new)
        return (h_new, c_new), h_new

    init = (jnp.zeros((B, H), jnp.float32), jnp.zeros((B, H), jnp.float32))
    _, out_tbh = jax.lax.scan(step, init, jnp.transpose(x_btc, (1, 0, 2)))
    return jnp.transpose(out_tbh, (1, 0, 2))


if __name__ == "__main__":
    B, T, I, H = 2, 8, 16, 32

    key = jax.random.PRNGKey(0)
    kx, k1, k2, k3, k4 = jax.random.split(key, 5)

    # PyTorch LSTM init: uniform(-1/sqrt(H), 1/sqrt(H))
    bound = 1.0 / (H ** 0.5)
    x = jax.random.normal(kx, (B, T, I), jnp.float32)
    w_ih = jax.random.uniform(k1, (4 * H, I), jnp.float32, -bound, bound)
    w_hh = jax.random.uniform(k2, (4 * H, H), jnp.float32, -bound, bound)
    b_ih = jax.random.uniform(k3, (4 * H,), jnp.float32, -bound, bound)
    b_hh = jax.random.uniform(k4, (4 * H,), jnp.float32, -bound, bound)

    out = rnn_forward(x, w_ih, w_hh, b_ih, b_hh, hidden_size=H)
    out = jax.block_until_ready(out)

    ref = _reference_lstm(x, w_ih, w_hh, b_ih, b_hh, H)
    assert out.shape == (B, T, H), out.shape
    # bf16 recurrent matmul (f32 accumulation) -> bf16-level tolerance vs f32.
    # TODO(synk): for production-length sequences where bf16 drift matters,
    # add an f32-weight recurrence path.
    assert jnp.allclose(out, ref, atol=2e-2, rtol=2e-2), "mismatch vs reference"

    print("KERNEL_OK")
</pallas_src>

<mosaic_0001>
module attributes {stable_mosaic.version = 11 : i64} {
  func.func @_lstm_recurrence_kernel(%arg0: i32, %arg1: i32, %arg2: memref<8x8x512xf32, #tpu.memory_space<vmem>>, %arg3: memref<128x512xbf16, #tpu.memory_space<any>>, %arg4: memref<8x8x128xf32, #tpu.memory_space<vmem>>, %arg5: memref<128x512xbf16, #tpu.memory_space<vmem>>, %arg6: memref<!tpu.dma_semaphore, #tpu.memory_space<semaphore_mem>>, %arg7: memref<8x8x128xf32, #tpu.memory_space<vmem>>, %arg8: memref<8x128xf32, #tpu.memory_space<vmem>>, %arg9: memref<8x128xf32, #tpu.memory_space<vmem>>) attributes {dimension_semantics = [#tpu.dimension_semantics<parallel>, #tpu.dimension_semantics<arbitrary>], iteration_bounds = array<i64: 1, 1>, scalar_prefetch = 0 : i64, scratch_operands = 5 : i64, tpu.core_type = #tpu.core_type<tc>, window_params = [{transform_indices = @transform_0, window_bounds = array<i64: 8, 8, 512>}, {}, {transform_indices = @transform_2, window_bounds = array<i64: 8, 8, 128>}]} {
    %c0_i32 = arith.constant 0 : i32
    %0 = arith.cmpi eq, %arg1, %c0_i32 : i32
    %1 = arith.extui %0 : i1 to i32
    %c0_i32_0 = arith.constant 0 : i32
    %2 = arith.cmpi ne, %1, %c0_i32_0 : i32
    scf.if %2 {
      tpu.enqueue_dma source(%arg3 : memref<128x512xbf16, #tpu.memory_space<any>>) target(%arg5 : memref<128x512xbf16, #tpu.memory_space<vmem>>) target_semaphore(%arg6 : memref<!tpu.dma_semaphore, #tpu.memory_space<semaphore_mem>>)
      %cst_233 = arith.constant 0.000000e+00 : f32
      %403 = vector.broadcast %cst_233 : f32 to vector<8x128xf32>
      %c0_234 = arith.constant 0 : index
      %c0_235 = arith.constant 0 : index
      %404 = vector.load %arg8[%c0_234, %c0_235] : memref<8x128xf32, #tpu.memory_space<vmem>>, vector<8x128xf32>
      tpu.vector_store %arg8[%c0_234, %c0_235], %403 {strides = array<i32>} : memref<8x128xf32, #tpu.memory_space<vmem>>, vector<8x128xf32>,
      %cst_236 = arith.constant 0.000000e+00 : f32
      %405 = vector.broadcast %cst_236 : f32 to vector<8x128xf32>
      %c0_237 = arith.constant 0 : index
      %c0_238 = arith.constant 0 : index
      %406 = vector.load %arg9[%c0_237, %c0_238] : memref<8x128xf32, #tpu.memory_space<vmem>>, vector<8x128xf32>
      tpu.vector_store %arg9[%c0_237, %c0_238], %405 {strides = array<i32>} : memref<8x128xf32, #tpu.memory_space<vmem>>, vector<8x128xf32>,
      tpu.wait_dma2 semaphore(%arg6 : memref<!tpu.dma_semaphore, #tpu.memory_space<semaphore_mem>>) src(%arg3 : memref<128x512xbf16, #tpu.memory_space<any>>) dst(%arg5 : memref<128x512xbf16, #tpu.memory_space<vmem>>)
    } else {
    }
    %c0_i32_1 = arith.constant 0 : i32
    %c0 = arith.constant 0 : index
    %c0_2 = arith.constant 0 : index
    %3 = vector.load %arg8[%c0, %c0_2] : memref<8x128xf32, #tpu.memory_space<vmem>>, vector<8x128xf32>
    %c0_3 = arith.constant 0 : index
    %c0_4 = arith.constant 0 : index
    %4 = vector.load %arg9[%c0_3, %c0_4] : memref<8x128xf32, #tpu.memory_space<vmem>>, vector<8x128xf32>
    %5 = arith.index_cast %c0_i32_1 : i32 to index
    %c0_5 = arith.constant 0 : index
    %c0_6 = arith.constant 0 : index
    %6 = vector.load %arg2[%5, %c0_5, %c0_6] : memref<8x8x512xf32, #tpu.memory_space<vmem>>, vector<1x8x512xf32>
    %7 = vector.shape_cast %6 : vector<1x8x512xf32> to vector<8x512xf32>
    %8 = arith.truncf %3 : vector<8x128xf32> to vector<8x128xbf16>
    %c0_7 = arith.constant 0 : index
    %c0_8 = arith.constant 0 : index
    %9 = vector.load %arg5[%c0_7, %c0_8] : memref<128x512xbf16, #tpu.memory_space<vmem>>, vector<128x512xbf16>
    %cst = arith.constant dense<0.000000e+00> : vector<8x512xf32>
    %10 = tpu.matmul %8, %9, %cst {dimension_numbers = #tpu.dot_dimension_numbers<[1], [0], [0], [1], [0, 0, 1, 1], [], []>} : vector<8x128xbf16>, vector<128x512xbf16>, vector<8x512xf32> -> vector<8x512xf32>
    %11 = arith.addf %7, %10 : vector<8x512xf32>
    %12 = vector.extract_strided_slice %11 {offsets = [0, 0], sizes = [8, 128], strides = [1, 1]} : vector<8x512xf32> to vector<8x128xf32>
    %cst_9 = arith.constant 5.000000e-01 : f32
    %13 = vector.broadcast %cst_9 : f32 to vector<8x128xf32>
    %14 = arith.mulf %13, %12 : vector<8x128xf32>
    %15 = math.tanh %14 : vector<8x128xf32>
    %cst_10 = arith.constant 5.000000e-01 : f32
    %16 = vector.broadcast %cst_10 : f32 to vector<8x128xf32>
    %17 = arith.mulf %16, %15 : vector<8x128xf32>
    %cst_11 = arith.constant 5.000000e-01 : f32
    %18 = vector.broadcast %cst_11 : f32 to vector<8x128xf32>
    %19 = arith.addf %17, %18 : vector<8x128xf32>
    %20 = vector.extract_strided_slice %11 {offsets = [0, 128], sizes = [8, 128], strides = [1, 1]} : vector<8x512xf32> to vector<8x128xf32>
    %cst_12 = arith.constant 5.000000e-01 : f32
    %21 = vector.broadcast %cst_12 : f32 to vector<8x128xf32>
    %22 = arith.mulf %21, %20 : vector<8x128xf32>
    %23 = math.tanh %22 : vector<8x128xf32>
    %cst_13 = arith.constant 5.000000e-01 : f32
    %24 = vector.broadcast %cst_13 : f32 to vector<8x128xf32>
    %25 = arith.mulf %24, %23 : vector<8x128xf32>
    %cst_14 = arith.constant 5.000000e-01 : f32
    %26 = vector.broadcast %cst_14 : f32 to vector<8x128xf32>
    %27 = arith.addf %25, %26 : vector<8x128xf32>
    %28 = vector.extract_strided_slice %11 {offsets = [0, 256], sizes = [8, 128], strides = [1, 1]} : vector<8x512xf32> to vector<8x128xf32>
    %29 = math.tanh %28 : vector<8x128xf32>
    %30 = vector.extract_strided_slice %11 {offsets = [0, 384], sizes = [8, 128], strides = [1, 1]} : vector<8x512xf32> to vector<8x128xf32>
    %cst_15 = arith.constant 5.000000e-01 : f32
    %31 = vector.broadcast %cst_15 : f32 to vector<8x128xf32>
    %32 = arith.mulf %31, %30 : vector<8x128xf32>
    %33 = math.tanh %32 : vector<8x128xf32>
    %cst_16 = arith.constant 5.000000e-01 : f32
    %34 = vector.broadcast %cst_16 : f32 to vector<8x128xf32>
    %35 = arith.mulf %34, %33 : vector<8x128xf32>
    %cst_17 = arith.constant 5.000000e-01 : f32
    %36 = vector.broadcast %cst_17 : f32 to vector<8x128xf32>
    %37 = arith.addf %35, %36 : vector<8x128xf32>
    %38 = arith.mulf %27, %4 : vector<8x128xf32>
    %39 = arith.mulf %19, %29 : vector<8x128xf32>
    %40 = arith.addf %38, %39 : vector<8x128xf32>
    %41 = math.tanh %40 : vector<8x128xf32>
    %42 = arith.mulf %37, %41 : vector<8x128xf32>
    %c0_18 = arith.constant 0 : index
    %c0_19 = arith.constant 0 : index
    %43 = vector.load %arg9[%c0_18, %c0_19] : memref<8x128xf32, #tpu.memory_space<vmem>>, vector<8x128xf32>
    tpu.vector_store %arg9[%c0_18, %c0_19], %40 {strides = array<i32>} : memref<8x128xf32, #tpu.memory_space<vmem>>, vector<8x128xf32>,
    %c0_20 = arith.constant 0 : index
    %c0_21 = arith.constant 0 : index
    %44 = vector.load %arg8[%c0_20, %c0_21] : memref<8x128xf32, #tpu.memory_space<vmem>>, vector<8x128xf32>
    tpu.vector_store %arg8[%c0_20, %c0_21], %42 {strides = array<i32>} : memref<8x128xf32, #tpu.memory_space<vmem>>, vector<8x128xf32>,
    %45 = arith.index_cast %c0_i32_1 : i32 to index
    %c0_22 = arith.constant 0 : index
    %c0_23 = arith.constant 0 : index
    %46 = vector.load %arg7[%45, %c0_22, %c0_23] : memref<8x8x128xf32, #tpu.memory_space<vmem>>, vector<1x8x128xf32>
    %47 = vector.shape_cast %46 : vector<1x8x128xf32> to vector<8x128xf32>
    %48 = vector.shape_cast %42 : vector<8x128xf32> to vector<1x8x128xf32>
    tpu.vector_store %arg7[%45, %c0_22, %c0_23], %48 {strides = array<i32>} : memref<8x8x128xf32, #tpu.memory_space<vmem>>, vector<1x8x128xf32>,
    %c1_i32 = arith.constant 1 : i32
    %c0_24 = arith.constant 0 : index
    %c0_25 = arith.constant 0 : index
    %49 = vector.load %arg8[%c0_24, %c0_25] : memref<8x128xf32, #tpu.memory_space<vmem>>, vector<8x128xf32>
    %c0_26 = arith.constant 0 : index
    %c0_27 = arith.constant 0 : index
    %50 = vector.load %arg9[%c0_26, %c0_27] : memref<8x128xf32, #tpu.memory_space<vmem>>, vector<8x128xf32>
    %51 = arith.index_cast %c1_i32 : i32 to index
    %c0_28 = arith.constant 0 : index
    %c0_29 = arith.constant 0 : index
    %52 = vector.load %arg2[%51, %c0_28, %c0_29] : memref<8x8x512xf32, #tpu.memory_space<vmem>>, vector<1x8x512xf32>
    %53 = vector.shape_cast %52 : vector<1x8x512xf32> to vector<8x512xf32>
    %54 = arith.truncf %49 : vector<8x128xf32> to vector<8x128xbf16>
    %c0_30 = arith.constant 0 : index
    %c0_31 = arith.constant 0 : index
    %55 = vector.load %arg5[%c0_30, %c0_31] : memref<128x512xbf16, #tpu.memory_space<vmem>>, vector<128x512xbf16>
    %cst_32 = arith.constant dense<0.000000e+00> : vector<8x512xf32>
    %56 = tpu.matmul %54, %55, %cst_32 {dimension_numbers = #tpu.dot_dimension_numbers<[1], [0], [0], [1], [0, 0, 1, 1], [], []>} : vector<8x128xbf16>, vector<128x512xbf16>, vector<8x512xf32> -> vector<8x512xf32>
    %57 = arith.addf %53, %56 : vector<8x512xf32>
    %58 = vector.extract_strided_slice %57 {offsets = [0, 0], sizes = [8, 128], strides = [1, 1]} : vector<8x512xf32> to vector<8x128xf32>
    %cst_33 = arith.constant 5.000000e-01 : f32
    %59 = vector.broadcast %cst_33 : f32 to vector<8x128xf32>
    %60 = arith.mulf %59, %58 : vector<8x128xf32>
    %61 = math.tanh %60 : vector<8x128xf32>
    %cst_34 = arith.constant 5.000000e-01 : f32
    %62 = vector.broadcast %cst_34 : f32 to vector<8x128xf32>
    %63 = arith.mulf %62, %61 : vector<8x128xf32>
    %cst_35 = arith.constant 5.000000e-01 : f32
    %64 = vector.broadcast %cst_35 : f32 to vector<8x128xf32>
    %65 = arith.addf %63, %64 : vector<8x128xf32>
    %66 = vector.extract_strided_slice %57 {offsets = [0, 128], sizes = [8, 128], strides = [1, 1]} : vector<8x512xf32> to vector<8x128xf32>
    %cst_36 = arith.constant 5.000000e-01 : f32
    %67 = vector.broadcast %cst_36 : f32 to vector<8x128xf32>
    %68 = arith.mulf %67, %66 : vector<8x128xf32>
    %69 = math.tanh %68 : vector<8x128xf32>
    %cst_37 = arith.constant 5.000000e-01 : f32
    %70 = vector.broadcast %cst_37 : f32 to vector<8x128xf32>
    %71 = arith.mulf %70, %69 : vector<8x128xf32>
    %cst_38 = arith.constant 5.000000e-01 : f32
    %72 = vector.broadcast %cst_38 : f32 to vector<8x128xf32>
    %73 = arith.addf %71, %72 : vector<8x128xf32>
    %74 = vector.extract_strided_slice %57 {offsets = [0, 256], sizes = [8, 128], strides = [1, 1]} : vector<8x512xf32> to vector<8x128xf32>
    %75 = math.tanh %74 : vector<8x128xf32>
    %76 = vector.extract_strided_slice %57 {offsets = [0, 384], sizes = [8, 128], strides = [1, 1]} : vector<8x512xf32> to vector<8x128xf32>
    %cst_39 = arith.constant 5.000000e-01 : f32
    %77 = vector.broadcast %cst_39 : f32 to vector<8x128xf32>
    %78 = arith.mulf %77, %76 : vector<8x128xf32>
    %79 = math.tanh %78 : vector<8x128xf32>
    %cst_40 = arith.constant 5.000000e-01 : f32
    %80 = vector.broadcast %cst_40 : f32 to vector<8x128xf32>
    %81 = arith.mulf %80, %79 : vector<8x128xf32>
    %cst_41 = arith.constant 5.000000e-01 : f32
    %82 = vector.broadcast %cst_41 : f32 to vector<8x128xf32>
    %83 = arith.addf %81, %82 : vector<8x128xf32>
    %84 = arith.mulf %73, %50 : vector<8x128xf32>
    %85 = arith.mulf %65, %75 : vector<8x128xf32>
    %86 = arith.addf %84, %85 : vector<8x128xf32>
    %87 = math.tanh %86 : vector<8x128xf32>
    %88 = arith.mulf %83, %87 : vector<8x128xf32>
    %c0_42 = arith.constant 0 : index
    %c0_43 = arith.constant 0 : index
    %89 = vector.load %arg9[%c0_42, %c0_43] : memref<8x128xf32, #tpu.memory_space<vmem>>, vector<8x128xf32>
    tpu.vector_store %arg9[%c0_42, %c0_43], %86 {strides = array<i32>} : memref<8x128xf32, #tpu.memory_space<vmem>>, vector<8x128xf32>,
    %c0_44 = arith.constant 0 : index
    %c0_45 = arith.constant 0 : index
    %90 = vector.load %arg8[%c0_44, %c0_45] : memref<8x128xf32, #tpu.memory_space<vmem>>, vector<8x128xf32>
    tpu.vector_store %arg8[%c0_44, %c0_45], %88 {strides = array<i32>} : memref<8x128xf32, #tpu.memory_space<vmem>>, vector<8x128xf32>,
    %91 = arith.index_cast %c1_i32 : i32 to index
    %c0_46 = arith.constant 0 : index
    %c0_47 = arith.constant 0 : index
    %92 = vector.load %arg7[%91, %c0_46, %c0_47] : memref<8x8x128xf32, #tpu.memory_space<vmem>>, vector<1x8x128xf32>
    %93 = vector.shape_cast %92 : vector<1x8x128xf32> to vector<8x128xf32>
    %94 = vector.shape_cast %88 : vector<8x128xf32> to vector<1x8x128xf32>
    tpu.vector_store %arg7[%91, %c0_46, %c0_47], %94 {strides = array<i32>} : memref<8x8x128xf32, #tpu.memory_space<vmem>>, vector<1x8x128xf32>,
    %c2_i32 = arith.constant 2 : i32
    %c0_48 = arith.constant 0 : index
    %c0_49 = arith.constant 0 : index
    %95 = vector.load %arg8[%c0_48, %c0_49] : memref<8x128xf32, #tpu.memory_space<vmem>>, vector<8x128xf32>
    %c0_50 = arith.constant 0 : index
    %c0_51 = arith.constant 0 : index
    %96 = vector.load %arg9[%c0_50, %c0_51] : memref<8x128xf32, #tpu.memory_space<vmem>>, vector<8x128xf32>
    %97 = arith.index_cast %c2_i32 : i32 to index
    %c0_52 = arith.constant 0 : index
    %c0_53 = arith.constant 0 : index
    %98 = vector.load %arg2[%97, %c0_52, %c0_53] : memref<8x8x512xf32, #tpu.memory_space<vmem>>, vector<1x8x512xf32>
    %99 = vector.shape_cast %98 : vector<1x8x512xf32> to vector<8x512xf32>
    %100 = arith.truncf %95 : vector<8x128xf32> to vector<8x128xbf16>
    %c0_54 = arith.constant 0 : index
    %c0_55 = arith.constant 0 : index
    %101 = vector.load %arg5[%c0_54, %c0_55] : memref<128x512xbf16, #tpu.memory_space<vmem>>, vector<128x512xbf16>
    %cst_56 = arith.constant dense<0.000000e+00> : vector<8x512xf32>
    %102 = tpu.matmul %100, %101, %cst_56 {dimension_numbers = #tpu.dot_dimension_numbers<[1], [0], [0], [1], [0, 0, 1, 1], [], []>} : vector<8x128xbf16>, vector<128x512xbf16>, vector<8x512xf32> -> vector<8x512xf32>
    %103 = arith.addf %99, %102 : vector<8x512xf32>
    %104 = vector.extract_strided_slice %103 {offsets = [0, 0], sizes = [8, 128], strides = [1, 1]} : vector<8x512xf32> to vector<8x128xf32>
    %cst_57 = arith.constant 5.000000e-01 : f32
    %105 = vector.broadcast %cst_57 : f32 to vector<8x128xf32>
    %106 = arith.mulf %105, %104 : vector<8x128xf32>
    %107 = math.tanh %106 : vector<8x128xf32>
    %cst_58 = arith.constant 5.000000e-01 : f32
    %108 = vector.broadcast %cst_58 : f32 to vector<8x128xf32>
    %109 = arith.mulf %108, %107 : vector<8x128xf32>
    %cst_59 = arith.constant 5.000000e-01 : f32
    %110 = vector.broadcast %cst_59 : f32 to vector<8x128xf32>
    %111 = arith.addf %109, %110 : vector<8x128xf32>
    %112 = vector.extract_strided_slice %103 {offsets = [0, 128], sizes = [8, 128], strides = [1, 1]} : vector<8x512xf32> to vector<8x128xf32>
    %cst_60 = arith.constant 5.000000e-01 : f32
    %113 = vector.broadcast %cst_60 : f32 to vector<8x128xf32>
    %114 = arith.mulf %113, %112 : vector<8x128xf32>
    %115 = math.tanh %114 : vector<8x128xf32>
    %cst_61 = arith.constant 5.000000e-01 : f32
    %116 = vector.broadcast %cst_61 : f32 to vector<8x128xf32>
    %117 = arith.mulf %116, %115 : vector<8x128xf32>
    %cst_62 = arith.constant 5.000000e-01 : f32
    %118 = vector.broadcast %cst_62 : f32 to vector<8x128xf32>
    %119 = arith.addf %117, %118 : vector<8x128xf32>
    %120 = vector.extract_strided_slice %103 {offsets = [0, 256], sizes = [8, 128], strides = [1, 1]} : vector<8x512xf32> to vector<8x128xf32>
    %121 = math.tanh %120 : vector<8x128xf32>
    %122 = vector.extract_strided_slice %103 {offsets = [0, 384], sizes = [8, 128], strides = [1, 1]} : vector<8x512xf32> to vector<8x128xf32>
    %cst_63 = arith.constant 5.000000e-01 : f32
    %123 = vector.broadcast %cst_63 : f32 to vector<8x128xf32>
    %124 = arith.mulf %123, %122 : vector<8x128xf32>
    %125 = math.tanh %124 : vector<8x128xf32>
    %cst_64 = arith.constant 5.000000e-01 : f32
    %126 = vector.broadcast %cst_64 : f32 to vector<8x128xf32>
    %127 = arith.mulf %126, %125 : vector<8x128xf32>
    %cst_65 = arith.constant 5.000000e-01 : f32
    %128 = vector.broadcast %cst_65 : f32 to vector<8x128xf32>
    %129 = arith.addf %127, %128 : vector<8x128xf32>
    %130 = arith.mulf %119, %96 : vector<8x128xf32>
    %131 = arith.mulf %111, %121 : vector<8x128xf32>
    %132 = arith.addf %130, %131 : vector<8x128xf32>
    %133 = math.tanh %132 : vector<8x128xf32>
    %134 = arith.mulf %129, %133 : vector<8x128xf32>
    %c0_66 = arith.constant 0 : index
    %c0_67 = arith.constant 0 : index
    %135 = vector.load %arg9[%c0_66, %c0_67] : memref<8x128xf32, #tpu.memory_space<vmem>>, vector<8x128xf32>
    tpu.vector_store %arg9[%c0_66, %c0_67], %132 {strides = array<i32>} : memref<8x128xf32, #tpu.memory_space<vmem>>, vector<8x128xf32>,
    %c0_68 = arith.constant 0 : index
    %c0_69 = arith.constant 0 : index
    %136 = vector.load %arg8[%c0_68, %c0_69] : memref<8x128xf32, #tpu.memory_space<vmem>>, vector<8x128xf32>
    tpu.vector_store %arg8[%c0_68, %c0_69], %134 {strides = array<i32>} : memref<8x128xf32, #tpu.memory_space<vmem>>, vector<8x128xf32>,
    %137 = arith.index_cast %c2_i32 : i32 to index
    %c0_70 = arith.constant 0 : index
    %c0_71 = arith.constant 0 : index
    %138 = vector.load %arg7[%137, %c0_70, %c0_71] : memref<8x8x128xf32, #tpu.memory_space<vmem>>, vector<1x8x128xf32>
    %139 = vector.shape_cast %138 : vector<1x8x128xf32> to vector<8x128xf32>
    %140 = vector.shape_cast %134 : vector<8x128xf32> to vector<1x8x128xf32>
    tpu.vector_store %arg7[%137, %c0_70, %c0_71], %140 {strides = array<i32>} : memref<8x8x128xf32, #tpu.memory_space<vmem>>, vector<1x8x128xf32>,
    %c3_i32 = arith.constant 3 : i32
    %c0_72 = arith.constant 0 : index
    %c0_73 = arith.constant 0 : index
    %141 = vector.load %arg8[%c0_72, %c0_73] : memref<8x128xf32, #tpu.memory_space<vmem>>, vector<8x128xf32>
    %c0_74 = arith.constant 0 : index
    %c0_75 = arith.constant 0 : index
    %142 = vector.load %arg9[%c0_74, %c0_75] : memref<8x128xf32, #tpu.memory_space<vmem>>, vector<8x128xf32>
    %143 = arith.index_cast %c3_i32 : i32 to index
    %c0_76 = arith.constant 0 : index
    %c0_77 = arith.constant 0 : index
    %144 = vector.load %arg2[%143, %c0_76, %c0_77] : memref<8x8x512xf32, #tpu.memory_space<vmem>>, vector<1x8x512xf32>
    %145 = vector.shape_cast %144 : vector<1x8x512xf32> to vector<8x512xf32>
    %146 = arith.truncf %141 : vector<8x128xf32> to vector<8x128xbf16>
    %c0_78 = arith.constant 0 : index
    %c0_79 = arith.constant 0 : index
    %147 = vector.load %arg5[%c0_78, %c0_79] : memref<128x512xbf16, #tpu.memory_space<vmem>>, vector<128x512xbf16>
    %cst_80 = arith.constant dense<0.000000e+00> : vector<8x512xf32>
    %148 = tpu.matmul %146, %147, %cst_80 {dimension_numbers = #tpu.dot_dimension_numbers<[1], [0], [0], [1], [0, 0, 1, 1], [], []>} : vector<8x128xbf16>, vector<128x512xbf16>, vector<8x512xf32> -> vector<8x512xf32>
    %149 = arith.addf %145, %148 : vector<8x512xf32>
    %150 = vector.extract_strided_slice %149 {offsets = [0, 0], sizes = [8, 128], strides = [1, 1]} : vector<8x512xf32> to vector<8x128xf32>
    %cst_81 = arith.constant 5.000000e-01 : f32
    %151 = vector.broadcast %cst_81 : f32 to vector<8x128xf32>
    %152 = arith.mulf %151, %150 : vector<8x128xf32>
    %153 = math.tanh %152 : vector<8x128xf32>
    %cst_82 = arith.constant 5.000000e-01 : f32
    %154 = vector.broadcast %cst_82 : f32 to vector<8x128xf32>
    %155 = arith.mulf %154, %153 : vector<8x128xf32>
    %cst_83 = arith.constant 5.000000e-01 : f32
    %156 = vector.broadcast %cst_83 : f32 to vector<8x128xf32>
    %157 = arith.addf %155, %156 : vector<8x128xf32>
    %158 = vector.extract_strided_slice %149 {offsets = [0, 128], sizes = [8, 128], strides = [1, 1]} : vector<8x512xf32> to vector<8x128xf32>
    %cst_84 = arith.constant 5.000000e-01 : f32
    %159 = vector.broadcast %cst_84 : f32 to vector<8x128xf32>
    %160 = arith.mulf %159, %158 : vector<8x128xf32>
    %161 = math.tanh %160 : vector<8x128xf32>
    %cst_85 = arith.constant 5.000000e-01 : f32
    %162 = vector.broadcast %cst_85 : f32 to vector<8x128xf32>
    %163 = arith.mulf %162, %161 : vector<8x128xf32>
    %cst_86 = arith.constant 5.000000e-01 : f32
    %164 = vector.broadcast %cst_86 : f32 to vector<8x128xf32>
    %165 = arith.addf %163, %164 : vector<8x128xf32>
    %166 = vector.extract_strided_slice %149 {offsets = [0, 256], sizes = [8, 128], strides = [1, 1]} : vector<8x512xf32> to vector<8x128xf32>
    %167 = math.tanh %166 : vector<8x128xf32>
    %168 = vector.extract_strided_slice %149 {offsets = [0, 384], sizes = [8, 128], strides = [1, 1]} : vector<8x512xf32> to vector<8x128xf32>
    %cst_87 = arith.constant 5.000000e-01 : f32
    %169 = vector.broadcast %cst_87 : f32 to vector<8x128xf32>
    %170 = arith.mulf %169, %168 : vector<8x128xf32>
    %171 = math.tanh %170 : vector<8x128xf32>
    %cst_88 = arith.constant 5.000000e-01 : f32
    %172 = vector.broadcast %cst_88 : f32 to vector<8x128xf32>
    %173 = arith.mulf %172, %171 : vector<8x128xf32>
    %cst_89 = arith.constant 5.000000e-01 : f32
    %174 = vector.broadcast %cst_89 : f32 to vector<8x128xf32>
    %175 = arith.addf %173, %174 : vector<8x128xf32>
    %176 = arith.mulf %165, %142 : vector<8x128xf32>
    %177 = arith.mulf %157, %167 : vector<8x128xf32>
    %178 = arith.addf %176, %177 : vector<8x128xf32>
    %179 = math.tanh %178 : vector<8x128xf32>
    %180 = arith.mulf %175, %179 : vector<8x128xf32>
    %c0_90 = arith.constant 0 : index
    %c0_91 = arith.constant 0 : index
    %181 = vector.load %arg9[%c0_90, %c0_91] : memref<8x128xf32, #tpu.memory_space<vmem>>, vector<8x128xf32>
    tpu.vector_store %arg9[%c0_90, %c0_91], %178 {strides = array<i32>} : memref<8x128xf32, #tpu.memory_space<vmem>>, vector<8x128xf32>,
    %c0_92 = arith.constant 0 : index
    %c0_93 = arith.constant 0 : index
    %182 = vector.load %arg8[%c0_92, %c0_93] : memref<8x128xf32, #tpu.memory_space<vmem>>, vector<8x128xf32>
    tpu.vector_store %arg8[%c0_92, %c0_93], %180 {strides = array<i32>} : memref<8x128xf32, #tpu.memory_space<vmem>>, vector<8x128xf32>,
    %183 = arith.index_cast %c3_i32 : i32 to index
    %c0_94 = arith.constant 0 : index
    %c0_95 = arith.constant 0 : index
    %184 = vector.load %arg7[%183, %c0_94, %c0_95] : memref<8x8x128xf32, #tpu.memory_space<vmem>>, vector<1x8x128xf32>
    %185 = vector.shape_cast %184 : vector<1x8x128xf32> to vector<8x128xf32>
    %186 = vector.shape_cast %180 : vector<8x128xf32> to vector<1x8x128xf32>
    tpu.vector_store %arg7[%183, %c0_94, %c0_95], %186 {strides = array<i32>} : memref<8x8x128xf32, #tpu.memory_space<vmem>>, vector<1x8x128xf32>,
    %c4_i32 = arith.constant 4 : i32
    %c0_96 = arith.constant 0 : index
    %c0_97 = arith.constant 0 : index
    %187 = vector.load %arg8[%c0_96, %c0_97] : memref<8x128xf32, #tpu.memory_space<vmem>>, vector<8x128xf32>
    %c0_98 = arith.constant 0 : index
    %c0_99 = arith.constant 0 : index
    %188 = vector.load %arg9[%c0_98, %c0_99] : memref<8x128xf32, #tpu.memory_space<vmem>>, vector<8x128xf32>
    %189 = arith.index_cast %c4_i32 : i32 to index
    %c0_100 = arith.constant 0 : index
    %c0_101 = arith.constant 0 : index
    %190 = vector.load %arg2[%189, %c0_100, %c0_101] : memref<8x8x512xf32, #tpu.memory_space<vmem>>, vector<1x8x512xf32>
    %191 = vector.shape_cast %190 : vector<1x8x512xf32> to vector<8x512xf32>
    %192 = arith.truncf %187 : vector<8x128xf32> to vector<8x128xbf16>
    %c0_102 = arith.constant 0 : index
    %c0_103 = arith.constant 0 : index
    %193 = vector.load %arg5[%c0_102, %c0_103] : memref<128x512xbf16, #tpu.memory_space<vmem>>, vector<128x512xbf16>
    %cst_104 = arith.constant dense<0.000000e+00> : vector<8x512xf32>
    %194 = tpu.matmul %192, %193, %cst_104 {dimension_numbers = #tpu.dot_dimension_numbers<[1], [0], [0], [1], [0, 0, 1, 1], [], []>} : vector<8x128xbf16>, vector<128x512xbf16>, vector<8x512xf32> -> vector<8x512xf32>
    %195 = arith.addf %191, %194 : vector<8x512xf32>
    %196 = vector.extract_strided_slice %195 {offsets = [0, 0], sizes = [8, 128], strides = [1, 1]} : vector<8x512xf32> to vector<8x128xf32>
    %cst_105 = arith.constant 5.000000e-01 : f32
    %197 = vector.broadcast %cst_105 : f32 to vector<8x128xf32>
    %198 = arith.mulf %197, %196 : vector<8x128xf32>
    %199 = math.tanh %198 : vector<8x128xf32>
    %cst_106 = arith.constant 5.000000e-01 : f32
    %200 = vector.broadcast %cst_106 : f32 to vector<8x128xf32>
    %201 = arith.mulf %200, %199 : vector<8x128xf32>
    %cst_107 = arith.constant 5.000000e-01 : f32
    %202 = vector.broadcast %cst_107 : f32 to vector<8x128xf32>
    %203 = arith.addf %201, %202 : vector<8x128xf32>
    %204 = vector.extract_strided_slice %195 {offsets = [0, 128], sizes = [8, 128], strides = [1, 1]} : vector<8x512xf32> to vector<8x128xf32>
    %cst_108 = arith.constant 5.000000e-01 : f32
    %205 = vector.broadcast %cst_108 : f32 to vector<8x128xf32>
    %206 = arith.mulf %205, %204 : vector<8x128xf32>
    %207 = math.tanh %206 : vector<8x128xf32>
    %cst_109 = arith.constant 5.000000e-01 : f32
    %208 = vector.broadcast %cst_109 : f32 to vector<8x128xf32>
    %209 = arith.mulf %208, %207 : vector<8x128xf32>
    %cst_110 = arith.constant 5.000000e-01 : f32
    %210 = vector.broadcast %cst_110 : f32 to vector<8x128xf32>
    %211 = arith.addf %209, %210 : vector<8x128xf32>
    %212 = vector.extract_strided_slice %195 {offsets = [0, 256], sizes = [8, 128], strides = [1, 1]} : vector<8x512xf32> to vector<8x128xf32>
    %213 = math.tanh %212 : vector<8x128xf32>
    %214 = vector.extract_strided_slice %195 {offsets = [0, 384], sizes = [8, 128], strides = [1, 1]} : vector<8x512xf32> to vector<8x128xf32>
    %cst_111 = arith.constant 5.000000e-01 : f32
    %215 = vector.broadcast %cst_111 : f32 to vector<8x128xf32>
    %216 = arith.mulf %215, %214 : vector<8x128xf32>
    %217 = math.tanh %216 : vector<8x128xf32>
    %cst_112 = arith.constant 5.000000e-01 : f32
    %218 = vector.broadcast %cst_112 : f32 to vector<8x128xf32>
    %219 = arith.mulf %218, %217 : vector<8x128xf32>
    %cst_113 = arith.constant 5.000000e-01 : f32
    %220 = vector.broadcast %cst_113 : f32 to vector<8x128xf32>
    %221 = arith.addf %219, %220 : vector<8x128xf32>
    %222 = arith.mulf %211, %188 : vector<8x128xf32>
    %223 = arith.mulf %203, %213 : vector<8x128xf32>
    %224 = arith.addf %222, %223 : vector<8x128xf32>
    %225 = math.tanh %224 : vector<8x128xf32>
    %226 = arith.mulf %221, %225 : vector<8x128xf32>
    %c0_114 = arith.constant 0 : index
    %c0_115 = arith.constant 0 : index
    %227 = vector.load %arg9[%c0_114, %c0_115] : memref<8x128xf32, #tpu.memory_space<vmem>>, vector<8x128xf32>
    tpu.vector_store %arg9[%c0_114, %c0_115], %224 {strides = array<i32>} : memref<8x128xf32, #tpu.memory_space<vmem>>, vector<8x128xf32>,
    %c0_116 = arith.constant 0 : index
    %c0_117 = arith.constant 0 : index
    %228 = vector.load %arg8[%c0_116, %c0_117] : memref<8x128xf32, #tpu.memory_space<vmem>>, vector<8x128xf32>
    tpu.vector_store %arg8[%c0_116, %c0_117], %226 {strides = array<i32>} : memref<8x128xf32, #tpu.memory_space<vmem>>, vector<8x128xf32>,
    %229 = arith.index_cast %c4_i32 : i32 to index
    %c0_118 = arith.constant 0 : index
    %c0_119 = arith.constant 0 : index
    %230 = vector.load %arg7[%229, %c0_118, %c0_119] : memref<8x8x128xf32, #tpu.memory_space<vmem>>, vector<1x8x128xf32>
    %231 = vector.shape_cast %230 : vector<1x8x128xf32> to vector<8x128xf32>
    %232 = vector.shape_cast %226 : vector<8x128xf32> to vector<1x8x128xf32>
    tpu.vector_store %arg7[%229, %c0_118, %c0_119], %232 {strides = array<i32>} : memref<8x8x128xf32, #tpu.memory_space<vmem>>, vector<1x8x128xf32>,
    %c5_i32 = arith.constant 5 : i32
    %c0_120 = arith.constant 0 : index
    %c0_121 = arith.constant 0 : index
    %233 = vector.load %arg8[%c0_120, %c0_121] : memref<8x128xf32, #tpu.memory_space<vmem>>, vector<8x128xf32>
    %c0_122 = arith.constant 0 : index
    %c0_123 = arith.constant 0 : index
    %234 = vector.load %arg9[%c0_122, %c0_123] : memref<8x128xf32, #tpu.memory_space<vmem>>, vector<8x128xf32>
    %235 = arith.index_cast %c5_i32 : i32 to index
    %c0_124 = arith.constant 0 : index
    %c0_125 = arith.constant 0 : index
    %236 = vector.load %arg2[%235, %c0_124, %c0_125] : memref<8x8x512xf32, #tpu.memory_space<vmem>>, vector<1x8x512xf32>
    %237 = vector.shape_cast %236 : vector<1x8x512xf32> to vector<8x512xf32>
    %238 = arith.truncf %233 : vector<8x128xf32> to vector<8x128xbf16>
    %c0_126 = arith.constant 0 : index
    %c0_127 = arith.constant 0 : index
    %239 = vector.load %arg5[%c0_126, %c0_127] : memref<128x512xbf16, #tpu.memory_space<vmem>>, vector<128x512xbf16>
    %cst_128 = arith.constant dense<0.000000e+00> : vector<8x512xf32>
    %240 = tpu.matmul %238, %239, %cst_128 {dimension_numbers = #tpu.dot_dimension_numbers<[1], [0], [0], [1], [0, 0, 1, 1], [], []>} : vector<8x128xbf16>, vector<128x512xbf16>, vector<8x512xf32> -> vector<8x512xf32>
    %241 = arith.addf %237, %240 : vector<8x512xf32>
    %242 = vector.extract_strided_slice %241 {offsets = [0, 0], sizes = [8, 128], strides = [1, 1]} : vector<8x512xf32> to vector<8x128xf32>
    %cst_129 = arith.constant 5.000000e-01 : f32
    %243 = vector.broadcast %cst_129 : f32 to vector<8x128xf32>
    %244 = arith.mulf %243, %242 : vector<8x128xf32>
    %245 = math.tanh %244 : vector<8x128xf32>
    %cst_130 = arith.constant 5.000000e-01 : f32
    %246 = vector.broadcast %cst_130 : f32 to vector<8x128xf32>
    %247 = arith.mulf %246, %245 : vector<8x128xf32>
    %cst_131 = arith.constant 5.000000e-01 : f32
    %248 = vector.broadcast %cst_131 : f32 to vector<8x128xf32>
    %249 = arith.addf %247, %248 : vector<8x128xf32>
    %250 = vector.extract_strided_slice %241 {offsets = [0, 128], sizes = [8, 128], strides = [1, 1]} : vector<8x512xf32> to vector<8x128xf32>
    %cst_132 = arith.constant 5.000000e-01 : f32
    %251 = vector.broadcast %cst_132 : f32 to vector<8x128xf32>
    %252 = arith.mulf %251, %250 : vector<8x128xf32>
    %253 = math.tanh %252 : vector<8x128xf32>
    %cst_133 = arith.constant 5.000000e-01 : f32
    %254 = vector.broadcast %cst_133 : f32 to vector<8x128xf32>
    %255 = arith.mulf %254, %253 : vector<8x128xf32>
    %cst_134 = arith.constant 5.000000e-01 : f32
    %256 = vector.broadcast %cst_134 : f32 to vector<8x128xf32>
    %257 = arith.addf %255, %256 : vector<8x128xf32>
    %258 = vector.extract_strided_slice %241 {offsets = [0, 256], sizes = [8, 128], strides = [1, 1]} : vector<8x512xf32> to vector<8x128xf32>
    %259 = math.tanh %258 : vector<8x128xf32>
    %260 = vector.extract_strided_slice %241 {offsets = [0, 384], sizes = [8, 128], strides = [1, 1]} : vector<8x512xf32> to vector<8x128xf32>
    %cst_135 = arith.constant 5.000000e-01 : f32
    %261 = vector.broadcast %cst_135 : f32 to vector<8x128xf32>
    %262 = arith.mulf %261, %260 : vector<8x128xf32>
    %263 = math.tanh %262 : vector<8x128xf32>
    %cst_136 = arith.constant 5.000000e-01 : f32
    %264 = vector.broadcast %cst_136 : f32 to vector<8x128xf32>
    %265 = arith.mulf %264, %263 : vector<8x128xf32>
    %cst_137 = arith.constant 5.000000e-01 : f32
    %266 = vector.broadcast %cst_137 : f32 to vector<8x128xf32>
    %267 = arith.addf %265, %266 : vector<8x128xf32>
    %268 = arith.mulf %257, %234 : vector<8x128xf32>
    %269 = arith.mulf %249, %259 : vector<8x128xf32>
    %270 = arith.addf %268, %269 : vector<8x128xf32>
    %271 = math.tanh %270 : vector<8x128xf32>
    %272 = arith.mulf %267, %271 : vector<8x128xf32>
    %c0_138 = arith.constant 0 : index
    %c0_139 = arith.constant 0 : index
    %273 = vector.load %arg9[%c0_138, %c0_139] : memref<8x128xf32, #tpu.memory_space<vmem>>, vector<8x128xf32>
    tpu.vector_store %arg9[%c0_138, %c0_139], %270 {strides = array<i32>} : memref<8x128xf32, #tpu.memory_space<vmem>>, vector<8x128xf32>,
    %c0_140 = arith.constant 0 : index
    %c0_141 = arith.constant 0 : index
    %274 = vector.load %arg8[%c0_140, %c0_141] : memref<8x128xf32, #tpu.memory_space<vmem>>, vector<8x128xf32>
    tpu.vector_store %arg8[%c0_140, %c0_141], %272 {strides = array<i32>} : memref<8x128xf32, #tpu.memory_space<vmem>>, vector<8x128xf32>,
    %275 = arith.index_cast %c5_i32 : i32 to index
    %c0_142 = arith.constant 0 : index
    %c0_143 = arith.constant 0 : index
    %276 = vector.load %arg7[%275, %c0_142, %c0_143] : memref<8x8x128xf32, #tpu.memory_space<vmem>>, vector<1x8x128xf32>
    %277 = vector.shape_cast %276 : vector<1x8x128xf32> to vector<8x128xf32>
    %278 = vector.shape_cast %272 : vector<8x128xf32> to vector<1x8x128xf32>
    tpu.vector_store %arg7[%275, %c0_142, %c0_143], %278 {strides = array<i32>} : memref<8x8x128xf32, #tpu.memory_space<vmem>>, vector<1x8x128xf32>,
    %c6_i32 = arith.constant 6 : i32
    %c0_144 = arith.constant 0 : index
    %c0_145 = arith.constant 0 : index
    %279 = vector.load %arg8[%c0_144, %c0_145] : memref<8x128xf32, #tpu.memory_space<vmem>>, vector<8x128xf32>
    %c0_146 = arith.constant 0 : index
    %c0_147 = arith.constant 0 : index
    %280 = vector.load %arg9[%c0_146, %c0_147] : memref<8x128xf32, #tpu.memory_space<vmem>>, vector<8x128xf32>
    %281 = arith.index_cast %c6_i32 : i32 to index
    %c0_148 = arith.constant 0 : index
    %c0_149 = arith.constant 0 : index
    %282 = vector.load %arg2[%281, %c0_148, %c0_149] : memref<8x8x512xf32, #tpu.memory_space<vmem>>, vector<1x8x512xf32>
    %283 = vector.shape_cast %282 : vector<1x8x512xf32> to vector<8x512xf32>
    %284 = arith.truncf %279 : vector<8x128xf32> to vector<8x128xbf16>
    %c0_150 = arith.constant 0 : index
    %c0_151 = arith.constant 0 : index
    %285 = vector.load %arg5[%c0_150, %c0_151] : memref<128x512xbf16, #tpu.memory_space<vmem>>, vector<128x512xbf16>
    %cst_152 = arith.constant dense<0.000000e+00> : vector<8x512xf32>
    %286 = tpu.matmul %284, %285, %cst_152 {dimension_numbers = #tpu.dot_dimension_numbers<[1], [0], [0], [1], [0, 0, 1, 1], [], []>} : vector<8x128xbf16>, vector<128x512xbf16>, vector<8x512xf32> -> vector<8x512xf32>
    %287 = arith.addf %283, %286 : vector<8x512xf32>
    %288 = vector.extract_strided_slice %287 {offsets = [0, 0], sizes = [8, 128], strides = [1, 1]} : vector<8x512xf32> to vector<8x128xf32>
    %cst_153 = arith.constant 5.000000e-01 : f32
    %289 = vector.broadcast %cst_153 : f32 to vector<8x128xf32>
    %290 = arith.mulf %289, %288 : vector<8x128xf32>
    %291 = math.tanh %290 : vector<8x128xf32>
    %cst_154 = arith.constant 5.000000e-01 : f32
    %292 = vector.broadcast %cst_154 : f32 to vector<8x128xf32>
    %293 = arith.mulf %292, %291 : vector<8x128xf32>
    %cst_155 = arith.constant 5.000000e-01 : f32
    %294 = vector.broadcast %cst_155 : f32 to vector<8x128xf32>
    %295 = arith.addf %293, %294 : vector<8x128xf32>
    %296 = vector.extract_strided_slice %287 {offsets = [0, 128], sizes = [8, 128], strides = [1, 1]} : vector<8x512xf32> to vector<8x128xf32>
    %cst_156 = arith.constant 5.000000e-01 : f32
    %297 = vector.broadcast %cst_156 : f32 to vector<8x128xf32>
    %298 = arith.mulf %297, %296 : vector<8x128xf32>
    %299 = math.tanh %298 : vector<8x128xf32>
    %cst_157 = arith.constant 5.000000e-01 : f32
    %300 = vector.broadcast %cst_157 : f32 to vector<8x128xf32>
    %301 = arith.mulf %300, %299 : vector<8x128xf32>
    %cst_158 = arith.constant 5.000000e-01 : f32
    %302 = vector.broadcast %cst_158 : f32 to vector<8x128xf32>
    %303 = arith.addf %301, %302 : vector<8x128xf32>
    %304 = vector.extract_strided_slice %287 {offsets = [0, 256], sizes = [8, 128], strides = [1, 1]} : vector<8x512xf32> to vector<8x128xf32>
    %305 = math.tanh %304 : vector<8x128xf32>
    %306 = vector.extract_strided_slice %287 {offsets = [0, 384], sizes = [8, 128], strides = [1, 1]} : vector<8x512xf32> to vector<8x128xf32>
    %cst_159 = arith.constant 5.000000e-01 : f32
    %307 = vector.broadcast %cst_159 : f32 to vector<8x128xf32>
    %308 = arith.mulf %307, %306 : vector<8x128xf32>
    %309 = math.tanh %308 : vector<8x128xf32>
    %cst_160 = arith.constant 5.000000e-01 : f32
    %310 = vector.broadcast %cst_160 : f32 to vector<8x128xf32>
    %311 = arith.mulf %310, %309 : vector<8x128xf32>
    %cst_161 = arith.constant 5.000000e-01 : f32
    %312 = vector.broadcast %cst_161 : f32 to vector<8x128xf32>
    %313 = arith.addf %311, %312 : vector<8x128xf32>
    %314 = arith.mulf %303, %280 : vector<8x128xf32>
    %315 = arith.mulf %295, %305 : vector<8x128xf32>
    %316 = arith.addf %314, %315 : vector<8x128xf32>
    %317 = math.tanh %316 : vector<8x128xf32>
    %318 = arith.mulf %313, %317 : vector<8x128xf32>
    %c0_162 = arith.constant 0 : index
    %c0_163 = arith.constant 0 : index
    %319 = vector.load %arg9[%c0_162, %c0_163] : memref<8x128xf32, #tpu.memory_space<vmem>>, vector<8x128xf32>
    tpu.vector_store %arg9[%c0_162, %c0_163], %316 {strides = array<i32>} : memref<8x128xf32, #tpu.memory_space<vmem>>, vector<8x128xf32>,
    %c0_164 = arith.constant 0 : index
    %c0_165 = arith.constant 0 : index
    %320 = vector.load %arg8[%c0_164, %c0_165] : memref<8x128xf32, #tpu.memory_space<vmem>>, vector<8x128xf32>
    tpu.vector_store %arg8[%c0_164, %c0_165], %318 {strides = array<i32>} : memref<8x128xf32, #tpu.memory_space<vmem>>, vector<8x128xf32>,
    %321 = arith.index_cast %c6_i32 : i32 to index
    %c0_166 = arith.constant 0 : index
    %c0_167 = arith.constant 0 : index
    %322 = vector.load %arg7[%321, %c0_166, %c0_167] : memref<8x8x128xf32, #tpu.memory_space<vmem>>, vector<1x8x128xf32>
    %323 = vector.shape_cast %322 : vector<1x8x128xf32> to vector<8x128xf32>
    %324 = vector.shape_cast %318 : vector<8x128xf32> to vector<1x8x128xf32>
    tpu.vector_store %arg7[%321, %c0_166, %c0_167], %324 {strides = array<i32>} : memref<8x8x128xf32, #tpu.memory_space<vmem>>, vector<1x8x128xf32>,
    %c7_i32 = arith.constant 7 : i32
    %c0_168 = arith.constant 0 : index
    %c0_169 = arith.constant 0 : index
    %325 = vector.load %arg8[%c0_168, %c0_169] : memref<8x128xf32, #tpu.memory_space<vmem>>, vector<8x128xf32>
    %c0_170 = arith.constant 0 : index
    %c0_171 = arith.constant 0 : index
    %326 = vector.load %arg9[%c0_170, %c0_171] : memref<8x128xf32, #tpu.memory_space<vmem>>, vector<8x128xf32>
    %327 = arith.index_cast %c7_i32 : i32 to index
    %c0_172 = arith.constant 0 : index
    %c0_173 = arith.constant 0 : index
    %328 = vector.load %arg2[%327, %c0_172, %c0_173] : memref<8x8x512xf32, #tpu.memory_space<vmem>>, vector<1x8x512xf32>
    %329 = vector.shape_cast %328 : vector<1x8x512xf32> to vector<8x512xf32>
    %330 = arith.truncf %325 : vector<8x128xf32> to vector<8x128xbf16>
    %c0_174 = arith.constant 0 : index
    %c0_175 = arith.constant 0 : index
    %331 = vector.load %arg5[%c0_174, %c0_175] : memref<128x512xbf16, #tpu.memory_space<vmem>>, vector<128x512xbf16>
    %cst_176 = arith.constant dense<0.000000e+00> : vector<8x512xf32>
    %332 = tpu.matmul %330, %331, %cst_176 {dimension_numbers = #tpu.dot_dimension_numbers<[1], [0], [0], [1], [0, 0, 1, 1], [], []>} : vector<8x128xbf16>, vector<128x512xbf16>, vector<8x512xf32> -> vector<8x512xf32>
    %333 = arith.addf %329, %332 : vector<8x512xf32>
    %334 = vector.extract_strided_slice %333 {offsets = [0, 0], sizes = [8, 128], strides = [1, 1]} : vector<8x512xf32> to vector<8x128xf32>
    %cst_177 = arith.constant 5.000000e-01 : f32
    %335 = vector.broadcast %cst_177 : f32 to vector<8x128xf32>
    %336 = arith.mulf %335, %334 : vector<8x128xf32>
    %337 = math.tanh %336 : vector<8x128xf32>
    %cst_178 = arith.constant 5.000000e-01 : f32
    %338 = vector.broadcast %cst_178 : f32 to vector<8x128xf32>
    %339 = arith.mulf %338, %337 : vector<8x128xf32>
    %cst_179 = arith.constant 5.000000e-01 : f32
    %340 = vector.broadcast %cst_179 : f32 to vector<8x128xf32>
    %341 = arith.addf %339, %340 : vector<8x128xf32>
    %342 = vector.extract_strided_slice %333 {offsets = [0, 128], sizes = [8, 128], strides = [1, 1]} : vector<8x512xf32> to vector<8x128xf32>
    %cst_180 = arith.constant 5.000000e-01 : f32
    %343 = vector.broadcast %cst_180 : f32 to vector<8x128xf32>
    %344 = arith.mulf %343, %342 : vector<8x128xf32>
    %345 = math.tanh %344 : vector<8x128xf32>
    %cst_181 = arith.constant 5.000000e-01 : f32
    %346 = vector.broadcast %cst_181 : f32 to vector<8x128xf32>
    %347 = arith.mulf %346, %345 : vector<8x128xf32>
    %cst_182 = arith.constant 5.000000e-01 : f32
    %348 = vector.broadcast %cst_182 : f32 to vector<8x128xf32>
    %349 = arith.addf %347, %348 : vector<8x128xf32>
    %350 = vector.extract_strided_slice %333 {offsets = [0, 256], sizes = [8, 128], strides = [1, 1]} : vector<8x512xf32> to vector<8x128xf32>
    %351 = math.tanh %350 : vector<8x128xf32>
    %352 = vector.extract_strided_slice %333 {offsets = [0, 384], sizes = [8, 128], strides = [1, 1]} : vector<8x512xf32> to vector<8x128xf32>
    %cst_183 = arith.constant 5.000000e-01 : f32
    %353 = vector.broadcast %cst_183 : f32 to vector<8x128xf32>
    %354 = arith.mulf %353, %352 : vector<8x128xf32>
    %355 = math.tanh %354 : vector<8x128xf32>
    %cst_184 = arith.constant 5.000000e-01 : f32
    %356 = vector.broadcast %cst_184 : f32 to vector<8x128xf32>
    %357 = arith.mulf %356, %355 : vector<8x128xf32>
    %cst_185 = arith.constant 5.000000e-01 : f32
    %358 = vector.broadcast %cst_185 : f32 to vector<8x128xf32>
    %359 = arith.addf %357, %358 : vector<8x128xf32>
    %360 = arith.mulf %349, %326 : vector<8x128xf32>
    %361 = arith.mulf %341, %351 : vector<8x128xf32>
    %362 = arith.addf %360, %361 : vector<8x128xf32>
    %363 = math.tanh %362 : vector<8x128xf32>
    %364 = arith.mulf %359, %363 : vector<8x128xf32>
    %c0_186 = arith.constant 0 : index
    %c0_187 = arith.constant 0 : index
    %365 = vector.load %arg9[%c0_186, %c0_187] : memref<8x128xf32, #tpu.memory_space<vmem>>, vector<8x128xf32>
    tpu.vector_store %arg9[%c0_186, %c0_187], %362 {strides = array<i32>} : memref<8x128xf32, #tpu.memory_space<vmem>>, vector<8x128xf32>,
    %c0_188 = arith.constant 0 : index
    %c0_189 = arith.constant 0 : index
    %366 = vector.load %arg8[%c0_188, %c0_189] : memref<8x128xf32, #tpu.memory_space<vmem>>, vector<8x128xf32>
    tpu.vector_store %arg8[%c0_188, %c0_189], %364 {strides = array<i32>} : memref<8x128xf32, #tpu.memory_space<vmem>>, vector<8x128xf32>,
    %367 = arith.index_cast %c7_i32 : i32 to index
    %c0_190 = arith.constant 0 : index
    %c0_191 = arith.constant 0 : index
    %368 = vector.load %arg7[%367, %c0_190, %c0_191] : memref<8x8x128xf32, #tpu.memory_space<vmem>>, vector<1x8x128xf32>
    %369 = vector.shape_cast %368 : vector<1x8x128xf32> to vector<8x128xf32>
    %370 = vector.shape_cast %364 : vector<8x128xf32> to vector<1x8x128xf32>
    tpu.vector_store %arg7[%367, %c0_190, %c0_191], %370 {strides = array<i32>} : memref<8x8x128xf32, #tpu.memory_space<vmem>>, vector<1x8x128xf32>,
    %c8_i32 = arith.constant 8 : i32
    %c0_192 = arith.constant 0 : index
    %c0_193 = arith.constant 0 : index
    %c0_194 = arith.constant 0 : index
    %371 = vector.load %arg7[%c0_192, %c0_193, %c0_194] : memref<8x8x128xf32, #tpu.memory_space<vmem>>, vector<1x8x128xf32>
    %372 = vector.shape_cast %371 : vector<1x8x128xf32> to vector<8x128xf32>
    %373 = vector.shape_cast %372 : vector<8x128xf32> to vector<8x1x128xf32>
    %c0_195 = arith.constant 0 : index
    %c0_196 = arith.constant 0 : index
    %c0_197 = arith.constant 0 : index
    %374 = vector.load %arg4[%c0_195, %c0_196, %c0_197] : memref<8x8x128xf32, #tpu.memory_space<vmem>>, vector<8x1x128xf32>
    tpu.vector_store %arg4[%c0_195, %c0_196, %c0_197], %373 {strides = array<i32>} : memref<8x8x128xf32, #tpu.memory_space<vmem>>, vector<8x1x128xf32>,
    %c1 = arith.constant 1 : index
    %c0_198 = arith.constant 0 : index
    %c0_199 = arith.constant 0 : index
    %375 = vector.load %arg7[%c1, %c0_198, %c0_199] : memref<8x8x128xf32, #tpu.memory_space<vmem>>, vector<1x8x128xf32>
    %376 = vector.shape_cast %375 : vector<1x8x128xf32> to vector<8x128xf32>
    %377 = vector.shape_cast %376 : vector<8x128xf32> to vector<8x1x128xf32>
    %c0_200 = arith.constant 0 : index
    %c1_201 = arith.constant 1 : index
    %c0_202 = arith.constant 0 : index
    %378 = vector.load %arg4[%c0_200, %c1_201, %c0_202] : memref<8x8x128xf32, #tpu.memory_space<vmem>>, vector<8x1x128xf32>
    tpu.vector_store %arg4[%c0_200, %c1_201, %c0_202], %377 {strides = array<i32>} : memref<8x8x128xf32, #tpu.memory_space<vmem>>, vector<8x1x128xf32>,
    %c2 = arith.constant 2 : index
    %c0_203 = arith.constant 0 : index
    %c0_204 = arith.constant 0 : index
    %379 = vector.load %arg7[%c2, %c0_203, %c0_204] : memref<8x8x128xf32, #tpu.memory_space<vmem>>, vector<1x8x128xf32>
    %380 = vector.shape_cast %379 : vector<1x8x128xf32> to vector<8x128xf32>
    %381 = vector.shape_cast %380 : vector<8x128xf32> to vector<8x1x128xf32>
    %c0_205 = arith.constant 0 : index
    %c2_206 = arith.constant 2 : index
    %c0_207 = arith.constant 0 : index
    %382 = vector.load %arg4[%c0_205, %c2_206, %c0_207] : memref<8x8x128xf32, #tpu.memory_space<vmem>>, vector<8x1x128xf32>
    tpu.vector_store %arg4[%c0_205, %c2_206, %c0_207], %381 {strides = array<i32>} : memref<8x8x128xf32, #tpu.memory_space<vmem>>, vector<8x1x128xf32>,
    %c3 = arith.constant 3 : index
    %c0_208 = arith.constant 0 : index
    %c0_209 = arith.constant 0 : index
    %383 = vector.load %arg7[%c3, %c0_208, %c0_209] : memref<8x8x128xf32, #tpu.memory_space<vmem>>, vector<1x8x128xf32>
    %384 = vector.shape_cast %383 : vector<1x8x128xf32> to vector<8x128xf32>
    %385 = vector.shape_cast %384 : vector<8x128xf32> to vector<8x1x128xf32>
    %c0_210 = arith.constant 0 : index
    %c3_211 = arith.constant 3 : index
    %c0_212 = arith.constant 0 : index
    %386 = vector.load %arg4[%c0_210, %c3_211, %c0_212] : memref<8x8x128xf32, #tpu.memory_space<vmem>>, vector<8x1x128xf32>
    tpu.vector_store %arg4[%c0_210, %c3_211, %c0_212], %385 {strides = array<i32>} : memref<8x8x128xf32, #tpu.memory_space<vmem>>, vector<8x1x128xf32>,
    %c4 = arith.constant 4 : index
    %c0_213 = arith.constant 0 : index
    %c0_214 = arith.constant 0 : index
    %387 = vector.load %arg7[%c4, %c0_213, %c0_214] : memref<8x8x128xf32, #tpu.memory_space<vmem>>, vector<1x8x128xf32>
    %388 = vector.shape_cast %387 : vector<1x8x128xf32> to vector<8x128xf32>
    %389 = vector.shape_cast %388 : vector<8x128xf32> to vector<8x1x128xf32>
    %c0_215 = arith.constant 0 : index
    %c4_216 = arith.constant 4 : index
    %c0_217 = arith.constant 0 : index
    %390 = vector.load %arg4[%c0_215, %c4_216, %c0_217] : memref<8x8x128xf32, #tpu.memory_space<vmem>>, vector<8x1x128xf32>
    tpu.vector_store %arg4[%c0_215, %c4_216, %c0_217], %389 {strides = array<i32>} : memref<8x8x128xf32, #tpu.memory_space<vmem>>, vector<8x1x128xf32>,
    %c5 = arith.constant 5 : index
    %c0_218 = arith.constant 0 : index
    %c0_219 = arith.constant 0 : index
    %391 = vector.load %arg7[%c5, %c0_218, %c0_219] : memref<8x8x128xf32, #tpu.memory_space<vmem>>, vector<1x8x128xf32>
    %392 = vector.shape_cast %391 : vector<1x8x128xf32> to vector<8x128xf32>
    %393 = vector.shape_cast %392 : vector<8x128xf32> to vector<8x1x128xf32>
    %c0_220 = arith.constant 0 : index
    %c5_221 = arith.constant 5 : index
    %c0_222 = arith.constant 0 : index
    %394 = vector.load %arg4[%c0_220, %c5_221, %c0_222] : memref<8x8x128xf32, #tpu.memory_space<vmem>>, vector<8x1x128xf32>
    tpu.vector_store %arg4[%c0_220, %c5_221, %c0_222], %393 {strides = array<i32>} : memref<8x8x128xf32, #tpu.memory_space<vmem>>, vector<8x1x128xf32>,
    %c6 = arith.constant 6 : index
    %c0_223 = arith.constant 0 : index
    %c0_224 = arith.constant 0 : index
    %395 = vector.load %arg7[%c6, %c0_223, %c0_224] : memref<8x8x128xf32, #tpu.memory_space<vmem>>, vector<1x8x128xf32>
    %396 = vector.shape_cast %395 : vector<1x8x128xf32> to vector<8x128xf32>
    %397 = vector.shape_cast %396 : vector<8x128xf32> to vector<8x1x128xf32>
    %c0_225 = arith.constant 0 : index
    %c6_226 = arith.constant 6 : index
    %c0_227 = arith.constant 0 : index
    %398 = vector.load %arg4[%c0_225, %c6_226, %c0_227] : memref<8x8x128xf32, #tpu.memory_space<vmem>>, vector<8x1x128xf32>
    tpu.vector_store %arg4[%c0_225, %c6_226, %c0_227], %397 {strides = array<i32>} : memref<8x8x128xf32, #tpu.memory_space<vmem>>, vector<8x1x128xf32>,
    %c7 = arith.constant 7 : index
    %c0_228 = arith.constant 0 : index
    %c0_229 = arith.constant 0 : index
    %399 = vector.load %arg7[%c7, %c0_228, %c0_229] : memref<8x8x128xf32, #tpu.memory_space<vmem>>, vector<1x8x128xf32>
    %400 = vector.shape_cast %399 : vector<1x8x128xf32> to vector<8x128xf32>
    %401 = vector.shape_cast %400 : vector<8x128xf32> to vector<8x1x128xf32>
    %c0_230 = arith.constant 0 : index
    %c7_231 = arith.constant 7 : index
    %c0_232 = arith.constant 0 : index
    %402 = vector.load %arg4[%c0_230, %c7_231, %c0_232] : memref<8x8x128xf32, #tpu.memory_space<vmem>>, vector<8x1x128xf32>
    tpu.vector_store %arg4[%c0_230, %c7_231, %c0_232], %401 {strides = array<i32>} : memref<8x8x128xf32, #tpu.memory_space<vmem>>, vector<8x1x128xf32>,
    return
  }
  func.func @transform_0(%arg0: i32, %arg1: i32) -> (i32, i32, i32) {
    %c0_i32 = arith.constant 0 : i32
    %c0_i32_0 = arith.constant 0 : i32
    return %arg1, %arg0, %c0_i32 : i32, i32, i32
  }
  func.func @transform_2(%arg0: i32, %arg1: i32) -> (i32, i32, i32) {
    %c0_i32 = arith.constant 0 : i32
    %c0_i32_0 = arith.constant 0 : i32
    return %arg0, %arg1, %c0_i32 : i32, i32, i32
  }
}

</mosaic_0001>

<bundles_post_ra>
// kernel: rnn_forward.1
= control target key start
LH: loop header
LB: loop body
LE: loop exit
PB: predicated region body
PF: predicated region fallthrough
CT: control target
= control target key end

     0   :  { %s4343_s0 = inlined_call_operand.vmem [shape: f32[8,8,512], index: 0, kind: input, shape index: {}]   ;;  %s4344_s1 = inlined_call_operand.vmem [shape: bf16[128,512], index: 1, kind: input, shape index: {}]   ;;  %s4345_s2 = inlined_call_operand.vmem [shape: f32[8,8,128], index: 2, kind: output, shape index: {}]  }
   0x1   :  { %v23_v0 = vld [vmem:[%s4344_s1] sm:$0xff]  ;;  %v25_v1 = vld [vmem:[%s4344_s1 + $0x8] sm:$0xff]  ;;  %v27_v2 = vld [vmem:[%s4344_s1 + $0x10] sm:$0xff] }
   0x2   :  { %24 = vst [vmem:[#allocation2] sm:$0xff] %v23_v0  ;;  %v29_v3 = vld [vmem:[%s4344_s1 + $0x18] sm:$0xff]  ;;  %v31_v4 = vld [vmem:[%s4344_s1 + $0x20] sm:$0xff]  ;;  %v33_v5 = vld [vmem:[%s4344_s1 + $0x28] sm:$0xff] }
   0x3   :  { %26 = vst [vmem:[#allocation2 + $0x8] sm:$0xff] %v25_v1  ;;  %v35_v6 = vld [vmem:[%s4344_s1 + $0x30] sm:$0xff]  ;;  %v37_v7 = vld [vmem:[%s4344_s1 + $0x38] sm:$0xff]  ;;  %v39_v8 = vld [vmem:[%s4344_s1 + $0x40] sm:$0xff] }
   0x4   :  { %28 = vst [vmem:[#allocation2 + $0x10] sm:$0xff] %v27_v2  ;;  %v41_v9 = vld [vmem:[%s4344_s1 + $0x48] sm:$0xff]  ;;  %v43_v10 = vld [vmem:[%s4344_s1 + $0x50] sm:$0xff]  ;;  %v45_v11 = vld [vmem:[%s4344_s1 + $0x58] sm:$0xff] }
   0x5   :  { %30 = vst [vmem:[#allocation2 + $0x18] sm:$0xff] %v29_v3  ;;  %v47_v12 = vld [vmem:[%s4344_s1 + $0x60] sm:$0xff]  ;;  %v49_v13 = vld [vmem:[%s4344_s1 + $0x68] sm:$0xff]  ;;  %v51_v14 = vld [vmem:[%s4344_s1 + $0x70] sm:$0xff] }
   0x6   :  { %32 = vst [vmem:[#allocation2 + $0x20] sm:$0xff] %v31_v4  ;;  %v53_v15 = vld [vmem:[%s4344_s1 + $0x78] sm:$0xff]  ;;  %v55_v16 = vld [vmem:[%s4344_s1 + $0x80] sm:$0xff]  ;;  %v57_v17 = vld [vmem:[%s4344_s1 + $0x88] sm:$0xff] }
   0x7   :  { %34 = vst [vmem:[#allocation2 + $0x28] sm:$0xff] %v33_v5  ;;  %v59_v18 = vld [vmem:[%s4344_s1 + $0x90] sm:$0xff]  ;;  %v61_v19 = vld [vmem:[%s4344_s1 + $0x98] sm:$0xff]  ;;  %v63_v20 = vld [vmem:[%s4344_s1 + $0xa0] sm:$0xff] }
   0x8   :  { %36 = vst [vmem:[#allocation2 + $0x30] sm:$0xff] %v35_v6  ;;  %v65_v21 = vld [vmem:[%s4344_s1 + $0xa8] sm:$0xff]  ;;  %v67_v22 = vld [vmem:[%s4344_s1 + $0xb0] sm:$0xff]  ;;  %v69_v23 = vld [vmem:[%s4344_s1 + $0xb8] sm:$0xff] }
   0x9   :  { %38 = vst [vmem:[#allocation2 + $0x38] sm:$0xff] %v37_v7  ;;  %v71_v24 = vld [vmem:[%s4344_s1 + $0xc0] sm:$0xff]  ;;  %v73_v25 = vld [vmem:[%s4344_s1 + $0xc8] sm:$0xff]  ;;  %v75_v26 = vld [vmem:[%s4344_s1 + $0xd0] sm:$0xff] }
   0xa   :  { %40 = vst [vmem:[#allocation2 + $0x40] sm:$0xff] %v39_v8  ;;  %v77_v27 = vld [vmem:[%s4344_s1 + $0xd8] sm:$0xff]  ;;  %v79_v28 = vld [vmem:[%s4344_s1 + $0xe0] sm:$0xff]  ;;  %v81_v29 = vld [vmem:[%s4344_s1 + $0xe8] sm:$0xff] }
   0xb   :  { %42 = vst [vmem:[#allocation2 + $0x48] sm:$0xff] %v41_v9  ;;  %v83_v30 = vld [vmem:[%s4344_s1 + $0xf0] sm:$0xff]  ;;  %v85_v31 = vld [vmem:[%s4344_s1 + $0xf8] sm:$0xff] }
   0xc   :  { %44 = vst [vmem:[#allocation2 + $0x50] sm:$0xff] %v43_v10 }
   0xd   :  { %46 = vst [vmem:[#allocation2 + $0x58] sm:$0xff] %v45_v11 }
   0xe   :  { %48 = vst [vmem:[#allocation2 + $0x60] sm:$0xff] %v47_v12 }
   0xf   :  { %50 = vst [vmem:[#allocation2 + $0x68] sm:$0xff] %v49_v13 }
  0x10   :  { %52 = vst [vmem:[#allocation2 + $0x70] sm:$0xff] %v51_v14 }
  0x11   :  { %54 = vst [vmem:[#allocation2 + $0x78] sm:$0xff] %v53_v15 }
  0x12   :  { %56 = vst [vmem:[#allocation2 + $0x80] sm:$0xff] %v55_v16 }
  0x13   :  { %58 = vst [vmem:[#allocation2 + $0x88] sm:$0xff] %v57_v17 }
  0x14   :  { %60 = vst [vmem:[#allocation2 + $0x90] sm:$0xff] %v59_v18 }
  0x15   :  { %62 = vst [vmem:[#allocation2 + $0x98] sm:$0xff] %v61_v19 }
  0x16   :  { %64 = vst [vmem:[#allocation2 + $0xa0] sm:$0xff] %v63_v20 }
  0x17   :  { %66 = vst [vmem:[#allocation2 + $0xa8] sm:$0xff] %v65_v21 }
  0x18   :  { %68 = vst [vmem:[#allocation2 + $0xb0] sm:$0xff] %v67_v22 }
  0x19   :  { %70 = vst [vmem:[#allocation2 + $0xb8] sm:$0xff] %v69_v23 }
  0x1a   :  { %72 = vst [vmem:[#allocation2 + $0xc0] sm:$0xff] %v71_v24 }
  0x1b   :  { %74 = vst [vmem:[#allocation2 + $0xc8] sm:$0xff] %v73_v25 }
  0x1c   :  { %76 = vst [vmem:[#allocation2 + $0xd0] sm:$0xff] %v75_v26 }
  0x1d   :  { %78 = vst [vmem:[#allocation2 + $0xd8] sm:$0xff] %v77_v27 }
  0x1e   :  { %80 = vst [vmem:[#allocation2 + $0xe0] sm:$0xff] %v79_v28 }
  0x1f   :  { %82 = vst [vmem:[#allocation2 + $0xe8] sm:$0xff] %v81_v29 }
  0x20   :  { %84 = vst [vmem:[#allocation2 + $0xf0] sm:$0xff] %v83_v30 }
  0x21   :  { %86 = vst [vmem:[#allocation2 + $0xf8] sm:$0xff] %v85_v31 }
  0x22   :  { %92 = vsyncadd [#allocation3], 4096 }
  0x23   :  { %3917 = dma.done.wait [#allocation3], 4096 }
  0x24   :  { %3918 = vsyncadd [#allocation3], 4294963200  ;;  %v2625_v43 = vld [vmem:[#allocation2 + $0xc0] sm:$0xf]  ;;  %v3606_v45 = vld [vmem:[#allocation2 + $0xcc] sm:$0xf0] }
  0x25   :  { %v2641_v32 = vld [vmem:[#allocation2 + $0xe0] sm:$0xf]  ;;  %v3608_v34 = vld [vmem:[#allocation2 + $0xe4] sm:$0xf]  ;;  %v2627_v47 = vld [vmem:[#allocation2 + $0xd0] sm:$0xf0]  ;;  %v2626_v48 = vor.u32 %v3606_v45, %v2625_v43 }
  0x26   :  { %v2649_v37 = vld [vmem:[#allocation2 + $0xe8] sm:$0xf]  ;;  %v3609_v41 = vld [vmem:[#allocation2 + $0xec] sm:$0xf]  ;;  %v3604_v46 = vld [vmem:[#allocation2 + $0xc4] sm:$0xf] }
  0x27   :  { %v3610_v33 = vld [vmem:[#allocation2 + $0xec] sm:$0xf0]  ;;  %v2643_v36 = vld [vmem:[#allocation2 + $0xf0] sm:$0xf0]  ;;  %v2630_v49 = vor.u32 %v3604_v46, %v2627_v47  ;;  %v2633_v50 = vld [vmem:[#allocation2 + $0xc8] sm:$0xf] }
  0x28   :  { %v2642_v35 = vor.u32 %v3610_v33, %v2641_v32  ;;  %v3611_v38 = vld [vmem:[#allocation2 + $0xf4] sm:$0xf0]  ;;  %v2646_v39 = vor.u32 %v3608_v34, %v2643_v36  ;;  %v2651_v42 = vld [vmem:[#allocation2 + $0xf8] sm:$0xf0]  ;;  %v3605_v52 = vld [vmem:[#allocation2 + $0xcc] sm:$0xf] }
  0x29   :  { %v2650_v40 = vor.u32 %v3611_v38, %v2649_v37  ;;  %v2654_v44 = vor.u32 %v3609_v41, %v2651_v42  ;;  %v3607_v51 = vld [vmem:[#allocation2 + $0xd4] sm:$0xf0]  ;;  %v2635_v54 = vld [vmem:[#allocation2 + $0xd8] sm:$0xf0]  ;;  %v2609_v55 = vld [vmem:[#allocation2 + $0xa0] sm:$0xf] }
  0x2a   :  { %298 = vmatpush.bf16.msra.mxu0 %v2642_v35  ;;  %311 = vmatpush.bf16.msra.mxu1 %v2646_v39  ;;  %v2634_v53 = vor.u32 %v3607_v51, %v2633_v50  ;;  %v3602_v56 = vld [vmem:[#allocation2 + $0xac] sm:$0xf0]  ;;  %v2638_v57 = vor.u32 %v3605_v52, %v2635_v54  ;;  %v3600_v58 = vld [vmem:[#allocation2 + $0xa4] sm:$0xf]  ;;  %v2611_v59 = vld [vmem:[#allocation2 + $0xb0] sm:$0xf0] }
  0x2b   :  { %324 = vmatpush.bf16.msra.mxu2 %v2650_v40  ;;  %337 = vmatpush.bf16.msra.mxu3 %v2654_v44  ;;  %v2617_v60 = vld [vmem:[#allocation2 + $0xa8] sm:$0xf]  ;;  %v2610_v61 = vor.u32 %v3602_v56, %v2609_v55  ;;  %v3603_v62 = vld [vmem:[#allocation2 + $0xb4] sm:$0xf0]  ;;  %v3601_v63 = vld [vmem:[#allocation2 + $0xac] sm:$0xf]  ;;  %v2614_v1 = vor.u32 %v3600_v58, %v2611_v59 }
  0x2c   :  { %v2619_v0 = vld [vmem:[#allocation2 + $0xb8] sm:$0xf0]  ;;  %v2618_v2 = vor.u32 %v3603_v62, %v2617_v60  ;;  %v2593_v3 = vld [vmem:[#allocation2 + $0x80] sm:$0xf]  ;;  %v3598_v4 = vld [vmem:[#allocation2 + $0x8c] sm:$0xf0] }
  0x2d   :  { %v3596_v5 = vld [vmem:[#allocation2 + $0x84] sm:$0xf]  ;;  %v2622_v6 = vor.u32 %v3601_v63, %v2619_v0  ;;  %v2595_v7 = vld [vmem:[#allocation2 + $0x90] sm:$0xf0]  ;;  %v2601_v8 = vld [vmem:[#allocation2 + $0x88] sm:$0xf]  ;;  %v2594_v12 = vor.u32 %v3598_v4, %v2593_v3 }
  0x2e   :  { %299 = vmatpush.bf16.msra.mxu0 %v2626_v48  ;;  %312 = vmatpush.bf16.msra.mxu1 %v2630_v49  ;;  %v3599_v9 = vld [vmem:[#allocation2 + $0x94] sm:$0xf0]  ;;  %v3597_v10 = vld [vmem:[#allocation2 + $0x8c] sm:$0xf]  ;;  %v2603_v11 = vld [vmem:[#allocation2 + $0x98] sm:$0xf0]  ;;  %v2598_v13 = vor.u32 %v3596_v5, %v2595_v7 }
  0x2f   :  { %325 = vmatpush.bf16.msra.mxu2 %v2634_v53  ;;  %338 = vmatpush.bf16.msra.mxu3 %v2638_v57  ;;  %v2602_v14 = vor.u32 %v3599_v9, %v2601_v8  ;;  %v2577_v15 = vld [vmem:[#allocation2 + $0x60] sm:$0xf]  ;;  %v3594_v16 = vld [vmem:[#allocation2 + $0x6c] sm:$0xf0]  ;;  %v3592_v17 = vld [vmem:[#allocation2 + $0x64] sm:$0xf]  ;;  %v2606_v18 = vor.u32 %v3597_v10, %v2603_v11 }
  0x30   :  { %v2579_v19 = vld [vmem:[#allocation2 + $0x70] sm:$0xf0]  ;;  %v2585_v20 = vld [vmem:[#allocation2 + $0x68] sm:$0xf]  ;;  %v3595_v21 = vld [vmem:[#allocation2 + $0x74] sm:$0xf0]  ;;  %v2578_v24 = vor.u32 %v3594_v16, %v2577_v15 }
  0x31   :  { %v3593_v22 = vld [vmem:[#allocation2 + $0x6c] sm:$0xf]  ;;  %v2587_v23 = vld [vmem:[#allocation2 + $0x78] sm:$0xf0]  ;;  %v2582_v25 = vor.u32 %v3592_v17, %v2579_v19  ;;  %v2586_v26 = vor.u32 %v3595_v21, %v2585_v20  ;;  %v2561_v27 = vld [vmem:[#allocation2 + $0x40] sm:$0xf] }
  0x32   :  { %300 = vmatpush.bf16.msra.mxu0 %v2610_v61  ;;  %313 = vmatpush.bf16.msra.mxu1 %v2614_v1  ;;  %v3590_v28 = vld [vmem:[#allocation2 + $0x4c] sm:$0xf0]  ;;  %v3588_v29 = vld [vmem:[#allocation2 + $0x44] sm:$0xf]  ;;  %v2590_v30 = vor.u32 %v3593_v22, %v2587_v23  ;;  %v2563_v31 = vld [vmem:[#allocation2 + $0x50] sm:$0xf0] }
  0x33   :  { %326 = vmatpush.bf16.msra.mxu2 %v2618_v2  ;;  %339 = vmatpush.bf16.msra.mxu3 %v2622_v6  ;;  %v2569_v32 = vld [vmem:[#allocation2 + $0x48] sm:$0xf]  ;;  %v3591_v33 = vld [vmem:[#allocation2 + $0x54] sm:$0xf0]  ;;  %v3589_v34 = vld [vmem:[#allocation2 + $0x4c] sm:$0xf]  ;;  %v2562_v36 = vor.u32 %v3590_v28, %v2561_v27  ;;  %v2566_v37 = vor.u32 %v3588_v29, %v2563_v31 }
  0x34   :  { %v2571_v35 = vld [vmem:[#allocation2 + $0x58] sm:$0xf0]  ;;  %v2570_v38 = vor.u32 %v3591_v33, %v2569_v32  ;;  %v2545_v39 = vld [vmem:[#allocation2 + $0x20] sm:$0xf]  ;;  %v3586_v40 = vld [vmem:[#allocation2 + $0x2c] sm:$0xf0] }
  0x35   :  { %v3584_v41 = vld [vmem:[#allocation2 + $0x24] sm:$0xf]  ;;  %v2574_v42 = vor.u32 %v3589_v34, %v2571_v35  ;;  %v2547_v43 = vld [vmem:[#allocation2 + $0x30] sm:$0xf0]  ;;  %v2553_v44 = vld [vmem:[#allocation2 + $0x28] sm:$0xf]  ;;  %v2546_v48 = vor.u32 %v3586_v40, %v2545_v39 }
  0x36   :  { %301 = vmatpush.bf16.msra.mxu0 %v2594_v12  ;;  %314 = vmatpush.bf16.msra.mxu1 %v2598_v13  ;;  %v3587_v45 = vld [vmem:[#allocation2 + $0x34] sm:$0xf0]  ;;  %v3585_v46 = vld [vmem:[#allocation2 + $0x2c] sm:$0xf]  ;;  %v2555_v47 = vld [vmem:[#allocation2 + $0x38] sm:$0xf0]  ;;  %v2550_v49 = vor.u32 %v3584_v41, %v2547_v43 }
  0x37   :  { %327 = vmatpush.bf16.msra.mxu2 %v2602_v14  ;;  %340 = vmatpush.bf16.msra.mxu3 %v2606_v18  ;;  %v2554_v50 = vor.u32 %v3587_v45, %v2553_v44  ;;  %v2529_v51 = vld [vmem:[#allocation2] sm:$0xf]  ;;  %v3582_v52 = vld [vmem:[#allocation2 + $0xc] sm:$0xf0]  ;;  %v3580_v53 = vld [vmem:[#allocation2 + $0x4] sm:$0xf]  ;;  %v2558_v54 = vor.u32 %v3585_v46, %v2555_v47 }
  0x38   :  { %v2531_v55 = vld [vmem:[#allocation2 + $0x10] sm:$0xf0]  ;;  %v2537_v56 = vld [vmem:[#allocation2 + $0x8] sm:$0xf]  ;;  %v3583_v57 = vld [vmem:[#allocation2 + $0x14] sm:$0xf0]  ;;  %v2530_v60 = vor.u32 %v3582_v52, %v2529_v51 }
  0x39   :  { %v3581_v58 = vld [vmem:[#allocation2 + $0xc] sm:$0xf]  ;;  %v2539_v59 = vld [vmem:[#allocation2 + $0x18] sm:$0xf0]  ;;  %v2534_v61 = vor.u32 %v3580_v53, %v2531_v55  ;;  %v2538_v62 = vor.u32 %v3583_v57, %v2537_v56  ;;  %v3919_v0 = vmov 0.0|0.0  }
  0x3a   :  { %302 = vmatpush.bf16.msra.mxu0 %v2578_v24  ;;  %315 = vmatpush.bf16.msra.mxu1 %v2582_v25  ;;  %v2542_v63 = vor.u32 %v3581_v58, %v2539_v59  ;;  %v2773_v1 = vld [vmem:[#allocation2 + $0xe0] sm:$0xf]  ;;  %v3642_v2 = vld [vmem:[#allocation2 + $0xec] sm:$0xf0]  ;;  %v3640_v3 = vld [vmem:[#allocation2 + $0xe4] sm:$0xf] }
  0x3b   :  { %328 = vmatpush.bf16.msra.mxu2 %v2586_v26  ;;  %341 = vmatpush.bf16.msra.mxu3 %v2590_v30  ;;  %v2774_v4 = vor.u32 %v3642_v2, %v2773_v1  ;;  %v2775_v5 = vld [vmem:[#allocation2 + $0xf0] sm:$0xf0]  ;;  %v2781_v6 = vld [vmem:[#allocation2 + $0xe8] sm:$0xf]  ;;  %v3643_v7 = vld [vmem:[#allocation2 + $0xf4] sm:$0xf0] }
  0x3c   :  { %v2778_v8 = vor.u32 %v3640_v3, %v2775_v5  ;;  %v2782_v9 = vor.u32 %v3643_v7, %v2781_v6  ;;  %v3641_v10 = vld [vmem:[#allocation2 + $0xec] sm:$0xf]  ;;  %v2783_v11 = vld [vmem:[#allocation2 + $0xf8] sm:$0xf0]  ;;  %v2757_v13 = vld [vmem:[#allocation2 + $0xc0] sm:$0xf] }
  0x3d   :  { %v2786_v12 = vor.u32 %v3641_v10, %v2783_v11  ;;  %v3638_v14 = vld [vmem:[#allocation2 + $0xcc] sm:$0xf0]  ;;  %v3636_v15 = vld [vmem:[#allocation2 + $0xc4] sm:$0xf]  ;;  %v2759_v17 = vld [vmem:[#allocation2 + $0xd0] sm:$0xf0] }
  0x3e   :  { %303 = vmatpush.bf16.msra.mxu0 %v2562_v36  ;;  %316 = vmatpush.bf16.msra.mxu1 %v2566_v37  ;;  %v2758_v16 = vor.u32 %v3638_v14, %v2757_v13  ;;  %v2765_v18 = vld [vmem:[#allocation2 + $0xc8] sm:$0xf]  ;;  %v3639_v19 = vld [vmem:[#allocation2 + $0xd4] sm:$0xf0]  ;;  %v2762_v20 = vor.u32 %v3636_v15, %v2759_v17  ;;  %v3637_v22 = vld [vmem:[#allocation2 + $0xcc] sm:$0xf] }
  0x3f   :  { %329 = vmatpush.bf16.msra.mxu2 %v2570_v38  ;;  %342 = vmatpush.bf16.msra.mxu3 %v2574_v42  ;;  %v2766_v21 = vor.u32 %v3639_v19, %v2765_v18  ;;  %v2767_v23 = vld [vmem:[#allocation2 + $0xd8] sm:$0xf0]  ;;  %v2741_v25 = vld [vmem:[#allocation2 + $0xa0] sm:$0xf]  ;;  %v3634_v26 = vld [vmem:[#allocation2 + $0xac] sm:$0xf0] }
  0x40   :  { %v2770_v24 = vor.u32 %v3637_v22, %v2767_v23  ;;  %v3632_v27 = vld [vmem:[#allocation2 + $0xa4] sm:$0xf]  ;;  %v2742_v28 = vor.u32 %v3634_v26, %v2741_v25  ;;  %v2743_v29 = vld [vmem:[#allocation2 + $0xb0] sm:$0xf0]  ;;  %v2749_v30 = vld [vmem:[#allocation2 + $0xa8] sm:$0xf] }
  0x41   :  { %v2746_v31 = vor.u32 %v3632_v27, %v2743_v29  ;;  %v3635_v32 = vld [vmem:[#allocation2 + $0xb4] sm:$0xf0]  ;;  %v3633_v33 = vld [vmem:[#allocation2 + $0xac] sm:$0xf]  ;;  %v2751_v34 = vld [vmem:[#allocation2 + $0xb8] sm:$0xf0] }
  0x42   :  { %304 = vmatpush.bf16.msra.mxu0 %v2546_v48  ;;  %317 = vmatpush.bf16.msra.mxu1 %v2550_v49  ;;  %v2750_v35 = vor.u32 %v3635_v32, %v2749_v30  ;;  %v2754_v36 = vor.u32 %v3633_v33, %v2751_v34  ;;  %v2725_v37 = vld [vmem:[#allocation2 + $0x80] sm:$0xf]  ;;  %v3630_v38 = vld [vmem:[#allocation2 + $0x8c] sm:$0xf0]  ;;  %v3628_v39 = vld [vmem:[#allocation2 + $0x84] sm:$0xf] }
  0x43   :  { %330 = vmatpush.bf16.msra.mxu2 %v2554_v50  ;;  %343 = vmatpush.bf16.msra.mxu3 %v2558_v54  ;;  %v2726_v40 = vor.u32 %v3630_v38, %v2725_v37  ;;  %v2727_v41 = vld [vmem:[#allocation2 + $0x90] sm:$0xf0]  ;;  %v2733_v42 = vld [vmem:[#allocation2 + $0x88] sm:$0xf]  ;;  %v3631_v43 = vld [vmem:[#allocation2 + $0x94] sm:$0xf0] }
  0x44   :  { %v2730_v44 = vor.u32 %v3628_v39, %v2727_v41  ;;  %v2734_v45 = vor.u32 %v3631_v43, %v2733_v42  ;;  %v3629_v46 = vld [vmem:[#allocation2 + $0x8c] sm:$0xf]  ;;  %v2735_v47 = vld [vmem:[#allocation2 + $0x98] sm:$0xf0]  ;;  %v2709_v49 = vld [vmem:[#allocation2 + $0x60] sm:$0xf] }
  0x45   :  { %v2738_v48 = vor.u32 %v3629_v46, %v2735_v47  ;;  %v3626_v50 = vld [vmem:[#allocation2 + $0x6c] sm:$0xf0]  ;;  %v3624_v51 = vld [vmem:[#allocation2 + $0x64] sm:$0xf]  ;;  %v2711_v53 = vld [vmem:[#allocation2 + $0x70] sm:$0xf0] }
  0x46   :  { %305 = vmatpush.bf16.msra.mxu0 %v2530_v60  ;;  %318 = vmatpush.bf16.msra.mxu1 %v2534_v61  ;;  %v2710_v52 = vor.u32 %v3626_v50, %v2709_v49  ;;  %v2717_v54 = vld [vmem:[#allocation2 + $0x68] sm:$0xf]  ;;  %v3627_v55 = vld [vmem:[#allocation2 + $0x74] sm:$0xf0]  ;;  %v2714_v56 = vor.u32 %v3624_v51, %v2711_v53  ;;  %v3625_v58 = vld [vmem:[#allocation2 + $0x6c] sm:$0xf] }
  0x47   :  { %331 = vmatpush.bf16.msra.mxu2 %v2538_v62  ;;  %344 = vmatpush.bf16.msra.mxu3 %v2542_v63  ;;  %v2718_v57 = vor.u32 %v3627_v55, %v2717_v54  ;;  %v2719_v59 = vld [vmem:[#allocation2 + $0x78] sm:$0xf0]  ;;  %v2693_v61 = vld [vmem:[#allocation2 + $0x40] sm:$0xf]  ;;  %v3622_v62 = vld [vmem:[#allocation2 + $0x4c] sm:$0xf0] }
  0x48   :  { %v2722_v60 = vor.u32 %v3625_v58, %v2719_v59  ;;  %v3620_v63 = vld [vmem:[#allocation2 + $0x44] sm:$0xf]  ;;  %v2695_v1 = vld [vmem:[#allocation2 + $0x50] sm:$0xf0]  ;;  %v2701_v2 = vld [vmem:[#allocation2 + $0x48] sm:$0xf] }
  0x49   :  { %306 = vmatmul.bf16.vlgmr.msra.gmra.mxu0 %v3919_v0  ;;  %319 = vmatmul.bf16.vlgmr.msra.gmra.mxu1 %v3919_v0  ;;  %v3623_v3 = vld [vmem:[#allocation2 + $0x54] sm:$0xf0]  ;;  %v3621_v6 = vld [vmem:[#allocation2 + $0x4c] sm:$0xf]  ;;  %v2703_v7 = vld [vmem:[#allocation2 + $0x58] sm:$0xf0] }
  0x4a   :  { %332 = vmatmul.bf16.vlgmr.msra.gmra.mxu2 %v3919_v0  ;;  %345 = vmatmul.bf16.vlgmr.msra.gmra.mxu3 %v3919_v0  ;;  %v2694_v0 = vor.u32 %v3622_v62, %v2693_v61  ;;  %v2702_v5 = vor.u32 %v3623_v3, %v2701_v2  ;;  %v3618_v10 = vld [vmem:[#allocation2 + $0x2c] sm:$0xf0]  ;;  %v3616_v11 = vld [vmem:[#allocation2 + $0x24] sm:$0xf]  ;;  %v2679_v13 = vld [vmem:[#allocation2 + $0x30] sm:$0xf0] }
  0x4b   :  { %575 = vmatpush.bf16.msrb.mxu0 %v2774_v4  ;;  %588 = vmatpush.bf16.msrb.mxu1 %v2778_v8  ;;  %v2698_v4 = vor.u32 %v3620_v63, %v2695_v1  ;;  %v2706_v8 = vor.u32 %v3621_v6, %v2703_v7  ;;  %v2685_v14 = vld [vmem:[#allocation2 + $0x28] sm:$0xf]  ;;  %v3619_v15 = vld [vmem:[#allocation2 + $0x34] sm:$0xf0]  ;;  %v2682_v17 = vor.u32 %v3616_v11, %v2679_v13  ;;  %v3617_v19 = vld [vmem:[#allocation2 + $0x2c] sm:$0xf] }
  0x4c   :  { %601 = vmatpush.bf16.msrb.mxu2 %v2782_v9  ;;  %614 = vmatpush.bf16.msrb.mxu3 %v2786_v12  ;;  %v2677_v9 = vld [vmem:[#allocation2 + $0x20] sm:$0xf]  ;;  %v2686_v18 = vor.u32 %v3619_v15, %v2685_v14  ;;  %v3614_v25 = vld [vmem:[#allocation2 + $0xc] sm:$0xf0]  ;;  %v3612_v26 = vld [vmem:[#allocation2 + $0x4] sm:$0xf] }
  0x4d   :  { %v2678_v12 = vor.u32 %v3618_v10, %v2677_v9  ;;  %v2663_v30 = vld [vmem:[#allocation2 + $0x10] sm:$0xf0]  ;;  %v3615_v32 = vld [vmem:[#allocation2 + $0x14] sm:$0xf0]  ;;  %v2671_v37 = vld [vmem:[#allocation2 + $0x18] sm:$0xf0] }
  0x4e   :  { %v2666_v34 = vor.u32 %v3612_v26, %v2663_v30  ;;  %v103_v41 = vld [vmem:[%s4343_s0 + $0x10] sm:$0xff]  ;;  %v104_v42 = vld [vmem:[%s4343_s0 + $0x18] sm:$0xff]  ;;  %v2905_v11 = vld [vmem:[#allocation2 + $0xe0] sm:$0xf] }
  0x4f   :  { %576 = vmatpush.bf16.msrb.mxu0 %v2758_v16  ;;  %589 = vmatpush.bf16.msrb.mxu1 %v2762_v20  ;;  %v101_v16 = vld [vmem:[%s4343_s0] sm:$0xff]  ;;  %v2687_v20 = vld [vmem:[#allocation2 + $0x38] sm:$0xf0]  ;;  %v2907_v15 = vld [vmem:[#allocation2 + $0xf0] sm:$0xf0] }
  0x50   :  { %602 = vmatpush.bf16.msrb.mxu2 %v2766_v21  ;;  %615 = vmatpush.bf16.msrb.mxu3 %v2770_v24  ;;  %v102_v21 = vld [vmem:[%s4343_s0 + $0x8] sm:$0xff]  ;;  %v2690_v22 = vor.u32 %v3617_v19, %v2687_v20  ;;  %v2661_v24 = vld [vmem:[#allocation2] sm:$0xf]  ;;  %v3672_v13 = vld [vmem:[#allocation2 + $0xe4] sm:$0xf] }
  0x51   :  { %v2662_v29 = vor.u32 %v3614_v25, %v2661_v24  ;;  %v3673_v20 = vld [vmem:[#allocation2 + $0xec] sm:$0xf]  ;;  %v3670_v24 = vld [vmem:[#allocation2 + $0xcc] sm:$0xf0]  ;;  %v3668_v25 = vld [vmem:[#allocation2 + $0xc4] sm:$0xf] }
  0x53   :  { %577 = vmatpush.bf16.msrb.mxu0 %v2742_v28  ;;  %590 = vmatpush.bf16.msrb.mxu1 %v2746_v31  ;;  %v2669_v31 = vld [vmem:[#allocation2 + $0x8] sm:$0xf] }
  0x54   :  { %603 = vmatpush.bf16.msrb.mxu2 %v2750_v35  ;;  %616 = vmatpush.bf16.msrb.mxu3 %v2754_v36  ;;  %v2670_v35 = vor.u32 %v3615_v32, %v2669_v31  ;;  %v3613_v36 = vld [vmem:[#allocation2 + $0xc] sm:$0xf] }
  0x55   :  { %v2674_v39 = vor.u32 %v3613_v36, %v2671_v37  ;;  %v3669_v32 = vld [vmem:[#allocation2 + $0xcc] sm:$0xf]  ;;  %v3666_v36 = vld [vmem:[#allocation2 + $0xac] sm:$0xf0]  ;;  %v3664_v37 = vld [vmem:[#allocation2 + $0xa4] sm:$0xf] }
  0x57   :  { %578 = vmatpush.bf16.msrb.mxu0 %v2726_v40  ;;  %591 = vmatpush.bf16.msrb.mxu1 %v2730_v44 }
  0x58   :  { %604 = vmatpush.bf16.msrb.mxu2 %v2734_v45  ;;  %617 = vmatpush.bf16.msrb.mxu3 %v2738_v48 }
  0x5b   :  { %579 = vmatpush.bf16.msrb.mxu0 %v2710_v52  ;;  %592 = vmatpush.bf16.msrb.mxu1 %v2714_v56 }
  0x5c   :  { %605 = vmatpush.bf16.msrb.mxu2 %v2718_v57  ;;  %618 = vmatpush.bf16.msrb.mxu3 %v2722_v60 }
  0x5f   :  { %580 = vmatpush.bf16.msrb.mxu0 %v2694_v0  ;;  %593 = vmatpush.bf16.msrb.mxu1 %v2698_v4 }
  0x60   :  { %606 = vmatpush.bf16.msrb.mxu2 %v2702_v5  ;;  %619 = vmatpush.bf16.msrb.mxu3 %v2706_v8 }
  0x63   :  { %581 = vmatpush.bf16.msrb.mxu0 %v2678_v12  ;;  %594 = vmatpush.bf16.msrb.mxu1 %v2682_v17  ;;  %v3674_v12 = vld [vmem:[#allocation2 + $0xec] sm:$0xf0]  ;;  %v3675_v17 = vld [vmem:[#allocation2 + $0xf4] sm:$0xf0] }
  0x64   :  { %607 = vmatpush.bf16.msrb.mxu2 %v2686_v18  ;;  %620 = vmatpush.bf16.msrb.mxu3 %v2690_v22  ;;  %v2906_v14 = vor.u32 %v3674_v12, %v2905_v11  ;;  %v2910_v18 = vor.u32 %v3672_v13, %v2907_v15  ;;  %v2827_v12 = vld [vmem:[#allocation2 + $0x50] sm:$0xf0]  ;;  %v2833_v13 = vld [vmem:[#allocation2 + $0x48] sm:$0xf] }
  0x67   :  { %582 = vmatpush.bf16.msrb.mxu0 %v2662_v29  ;;  %595 = vmatpush.bf16.msrb.mxu1 %v2666_v34  ;;  %v3671_v29 = vld [vmem:[#allocation2 + $0xd4] sm:$0xf0] }
  0x68   :  { %608 = vmatpush.bf16.msrb.mxu2 %v2670_v35  ;;  %621 = vmatpush.bf16.msrb.mxu3 %v2674_v39  ;;  %v2873_v35 = vld [vmem:[#allocation2 + $0xa0] sm:$0xf]  ;;  %v2875_v39 = vld [vmem:[#allocation2 + $0xb0] sm:$0xf0] }
  0x6b   :  { %853 = vmatpush.bf16.msra.mxu0 %v2906_v14  ;;  %866 = vmatpush.bf16.msra.mxu1 %v2910_v18  ;;  %v3655_v14 = vld [vmem:[#allocation2 + $0x54] sm:$0xf0]  ;;  %v2835_v18 = vld [vmem:[#allocation2 + $0x58] sm:$0xf0] }
  0xc6   :  { %v307_v23 = vpop.f32.mrf.mxu0  ;;  %v320_v28 = vpop.f32.mrf.mxu1 }
  0xc7   :  { %v350_v27 = vadd.f32 %v307_v23, %v101_v16  ;;  %v351_v33 = vadd.f32 %v320_v28, %v102_v21  ;;  %v2913_v16 = vld [vmem:[#allocation2 + $0xe8] sm:$0xf]  ;;  %v2915_v21 = vld [vmem:[#allocation2 + $0xf8] sm:$0xf0]  ;;  %v2889_v23 = vld [vmem:[#allocation2 + $0xc0] sm:$0xf] }
  0xc8   :  { %v2914_v19 = vor.u32 %v3675_v17, %v2913_v16  ;;  %v2918_v22 = vor.u32 %v3673_v20, %v2915_v21  ;;  %v2890_v26 = vor.u32 %v3670_v24, %v2889_v23  ;;  %v2897_v28 = vld [vmem:[#allocation2 + $0xc8] sm:$0xf]  ;;  %v2834_v16 = vor.u32 %v3655_v14, %v2833_v13  ;;  %v3653_v17 = vld [vmem:[#allocation2 + $0x4c] sm:$0xf]  ;;  %v2655_v20 = vld [vmem:[%s4343_s0 + $0x20] sm:$0xff] }
  0xc9   :  { %v354_v38 = vmul.f32 0.5, %v350_v27  ;;  %v358_v40 = vmul.f32 0.5, %v351_v33  ;;  %v2891_v27 = vld [vmem:[#allocation2 + $0xd0] sm:$0xf0]  ;;  %v2898_v31 = vor.u32 %v3671_v29, %v2897_v28  ;;  %v2899_v33 = vld [vmem:[#allocation2 + $0xd8] sm:$0xf0] }
  0xca   :  { %879 = vmatpush.bf16.msra.mxu2 %v2914_v19  ;;  %892 = vmatpush.bf16.msra.mxu3 %v2918_v22  ;;  %v2894_v30 = vor.u32 %v3668_v25, %v2891_v27  ;;  %v2902_v34 = vor.u32 %v3669_v32, %v2899_v33  ;;  %v2838_v19 = vor.u32 %v3653_v17, %v2835_v18  ;;  %v2809_v21 = vld [vmem:[#allocation2 + $0x20] sm:$0xf]  ;;  %v3650_v22 = vld [vmem:[#allocation2 + $0x2c] sm:$0xf0]  ;;  %v3648_v23 = vld [vmem:[#allocation2 + $0x24] sm:$0xf] }
  0xcb   :  { %3837 = vtanh.f32 %v354_v38  ;;  %854 = vmatpush.bf16.msra.mxu0 %v2890_v26  ;;  %v2874_v38 = vor.u32 %v3666_v36, %v2873_v35  ;;  %v2810_v24 = vor.u32 %v3650_v22, %v2809_v21  ;;  %v2811_v25 = vld [vmem:[#allocation2 + $0x30] sm:$0xf0]  ;;  %v2817_v26 = vld [vmem:[#allocation2 + $0x28] sm:$0xf]  ;;  %v3651_v27 = vld [vmem:[#allocation2 + $0x34] sm:$0xf0] }
  0xcc   :  { %3839 = vtanh.f32 %v358_v40  ;;  %867 = vmatpush.bf16.msra.mxu1 %v2894_v30  ;;  %v2881_v40 = vld [vmem:[#allocation2 + $0xa8] sm:$0xf]  ;;  %v2814_v29 = vor.u32 %v3648_v23, %v2811_v25  ;;  %v2818_v30 = vor.u32 %v3651_v27, %v2817_v26  ;;  %v2819_v32 = vld [vmem:[#allocation2 + $0x38] sm:$0xf0]  ;;  %v2793_v36 = vld [vmem:[#allocation2] sm:$0xf] }
  0xcd   :  { %v333_v43 = vpop.f32.mrf.mxu2  ;;  %v346_v45 = vpop.f32.mrf.mxu3  ;;  %v2656_v28 = vld [vmem:[%s4343_s0 + $0x28] sm:$0xff]  ;;  %v3037_v22 = vld [vmem:[#allocation2 + $0xe0] sm:$0xf]  ;;  %v3706_v23 = vld [vmem:[#allocation2 + $0xec] sm:$0xf0] }
  0xce   :  { %v352_v44 = vadd.f32 %v333_v43, %v103_v41  ;;  %v309_v46 = vpop.f32.mrf.mxu0  ;;  %v353_v47 = vadd.f32 %v346_v45, %v104_v42  ;;  %v322_v48 = vpop.f32.mrf.mxu1  ;;  %880 = vmatpush.bf16.msra.mxu2 %v2898_v31  ;;  %893 = vmatpush.bf16.msra.mxu3 %v2902_v34  ;;  %v3667_v41 = vld [vmem:[#allocation2 + $0xb4] sm:$0xf0]  ;;  %v2878_v42 = vor.u32 %v3664_v37, %v2875_v39  ;;  %v2883_v45 = vld [vmem:[#allocation2 + $0xb8] sm:$0xf0]  ;;  %v3649_v31 = vld [vmem:[#allocation2 + $0x2c] sm:$0xf] }
  0xcf   :  { %v2882_v43 = vor.u32 %v3667_v41, %v2881_v40  ;;  %855 = vmatpush.bf16.msra.mxu0 %v2874_v38  ;;  %v3662_v48 = vld [vmem:[#allocation2 + $0x8c] sm:$0xf0]  ;;  %v2822_v33 = vor.u32 %v3649_v31, %v2819_v32  ;;  %v3644_v38 = vld [vmem:[#allocation2 + $0x4] sm:$0xf]  ;;  %v3038_v25 = vor.u32 %v3706_v23, %v3037_v22  ;;  %v3039_v26 = vld [vmem:[#allocation2 + $0xf0] sm:$0xf0] }
  0xd0   :  { %3841 = vtanh.f32 %v352_v44  ;;  %v363_v50 = vmul.f32 0.5, %v353_v47  ;;  %v3665_v44 = vld [vmem:[#allocation2 + $0xac] sm:$0xf]  ;;  %868 = vmatpush.bf16.msra.mxu1 %v2878_v42  ;;  %v2857_v47 = vld [vmem:[#allocation2 + $0x80] sm:$0xf] }
  0xd1   :  { %v3838_v49 = vpop.eup %3837  ;;  %v2886_v46 = vor.u32 %v3665_v44, %v2883_v45  ;;  %v3646_v37 = vld [vmem:[#allocation2 + $0xc] sm:$0xf0]  ;;  %v2795_v42 = vld [vmem:[#allocation2 + $0x10] sm:$0xf0]  ;;  %v3647_v44 = vld [vmem:[#allocation2 + $0x14] sm:$0xf0] }
  0xd2   :  { %v3840_v51 = vpop.eup %3839  ;;  %v356_v52 = vmul.f32 0.5, %v3838_v49  ;;  %3843 = vtanh.f32 %v363_v50  ;;  %881 = vmatpush.bf16.msra.mxu2 %v2882_v43  ;;  %v3660_v49 = vld [vmem:[#allocation2 + $0x84] sm:$0xf]  ;;  %v2858_v50 = vor.u32 %v3662_v48, %v2857_v47  ;;  %v2794_v41 = vor.u32 %v3646_v37, %v2793_v36  ;;  %v2801_v43 = vld [vmem:[#allocation2 + $0x8] sm:$0xf] }
  0xd3   :  { %v360_v53 = vmul.f32 0.5, %v3840_v51  ;;  %894 = vmatpush.bf16.msra.mxu3 %v2886_v46  ;;  %v2859_v51 = vld [vmem:[#allocation2 + $0x90] sm:$0xf0]  ;;  %v2798_v45 = vor.u32 %v3644_v38, %v2795_v42  ;;  %v2802_v46 = vor.u32 %v3647_v44, %v2801_v43  ;;  %v3645_v47 = vld [vmem:[#allocation2 + $0xc] sm:$0xf] }
  0xd4   :  { %v357_v54 = vadd.f32 0.5, %v356_v52  ;;  %v2865_v52 = vld [vmem:[#allocation2 + $0x88] sm:$0xf]  ;;  %856 = vmatpush.bf16.msra.mxu0 %v2858_v50  ;;  %v2803_v48 = vld [vmem:[#allocation2 + $0x18] sm:$0xf0] }
  0xd5   :  { %v361_v55 = vadd.f32 0.5, %v360_v53  ;;  %v335_v56 = vpop.f32.mrf.mxu2  ;;  %v348_v58 = vpop.f32.mrf.mxu3  ;;  %v3663_v53 = vld [vmem:[#allocation2 + $0x94] sm:$0xf0]  ;;  %v3045_v27 = vld [vmem:[#allocation2 + $0xe8] sm:$0xf] }
  0xd6   :  { %v3842_v57 = vpop.eup %3841  ;;  %v3661_v56 = vld [vmem:[#allocation2 + $0x8c] sm:$0xf]  ;;  %v3047_v32 = vld [vmem:[#allocation2 + $0xf8] sm:$0xf0]  ;;  %v3700_v36 = vld [vmem:[#allocation2 + $0xc4] sm:$0xf] }
  0xd7   :  { %v367_v59 = vmul.f32 0.0, %v361_v55  ;;  %v368_v60 = vmul.f32 %v3842_v57, %v357_v54  ;;  %v2862_v54 = vor.u32 %v3660_v49, %v2859_v51  ;;  %v2866_v55 = vor.u32 %v3663_v53, %v2865_v52  ;;  %v2867_v57 = vld [vmem:[#allocation2 + $0x98] sm:$0xf0]  ;;  %v2657_v52 = vld [vmem:[%s4343_s0 + $0x30] sm:$0xff]  ;;  %v3705_v31 = vld [vmem:[#allocation2 + $0xec] sm:$0xf] }
  0xd8   :  { %v3844_v61 = vpop.eup %3843  ;;  %v2870_v58 = vor.u32 %v3661_v56, %v2867_v57  ;;  %v2806_v51 = vor.u32 %v3645_v47, %v2803_v48  ;;  %v2658_v53 = vld [vmem:[%s4343_s0 + $0x38] sm:$0xff]  ;;  %v3023_v38 = vld [vmem:[#allocation2 + $0xd0] sm:$0xf0]  ;;  %v3701_v43 = vld [vmem:[#allocation2 + $0xcc] sm:$0xf] }
  0xd9   :  { %v4043_v62 = vadd.f32 %v368_v60, %v367_v59  ;;  %v365_v63 = vmul.f32 0.5, %v3844_v61  ;;  %869 = vmatpush.bf16.msra.mxu1 %v2862_v54  ;;  %882 = vmatpush.bf16.msra.mxu2 %v2866_v55  ;;  %v2841_v59 = vld [vmem:[#allocation2 + $0x60] sm:$0xf]  ;;  %v3658_v60 = vld [vmem:[#allocation2 + $0x6c] sm:$0xf0] }
  0xda   :  { %v3656_v61 = vld [vmem:[#allocation2 + $0x64] sm:$0xf]  ;;  %895 = vmatpush.bf16.msra.mxu3 %v2870_v58  ;;  %v3031_v44 = vld [vmem:[#allocation2 + $0xd8] sm:$0xf0]  ;;  %v3698_v47 = vld [vmem:[#allocation2 + $0xac] sm:$0xf0] }
  0xdb   :  { %3845 = vtanh.f32 %v4043_v62  ;;  %v366_v0 = vadd.f32 0.5, %v365_v63  ;;  %v2842_v63 = vor.u32 %v3658_v60, %v2841_v59  ;;  %v3696_v48 = vld [vmem:[#allocation2 + $0xa4] sm:$0xf]  ;;  %v2959_v23 = vld [vmem:[#allocation2 + $0x50] sm:$0xf0] }
  0xdd   :  { %857 = vmatpush.bf16.msra.mxu0 %v2842_v63 }
  0xe1   :  { %v3846_v1 = vpop.eup %3845 }
  0xe2   :  { %v371_v2 = vmul.f32 %v3846_v1, %v366_v0  ;;  %v2843_v0 = vld [vmem:[#allocation2 + $0x70] sm:$0xf0]  ;;  %v2849_v1 = vld [vmem:[#allocation2 + $0x68] sm:$0xf] }
  0xe4   :  { %v2323_v3 = vrot.slane %v371_v2, 1  ;;  %v2324_v4 = vrot.slane %v371_v2, 2  ;;  %v2325_v5 = vrot.slane %v371_v2, 3  ;;  %2337 = vst [vmem:[%s4345_s2] sm:$0x1] %v371_v2  ;;  %v2326_v6 = vrot.slane %v371_v2, 4 }
  0xe5   :  { %v382_v7 = vpack.c.bf16 %v371_v2, %v371_v2  ;;  %v2327_v8 = vrot.slane %v371_v2, 5  ;;  %v2328_v9 = vrot.slane %v371_v2, 6  ;;  %v2329_v10 = vrot.slane %v371_v2, 7  ;;  %v3659_v2 = vld [vmem:[#allocation2 + $0x74] sm:$0xf0] }
  0xe6   :  { %2338 = vst [vmem:[%s4345_s2 + $0x8] sm:$0x1] %v2323_v3  ;;  %v2846_v3 = vor.u32 %v3656_v61, %v2843_v0 }
  0xe7   :  { %2339 = vst [vmem:[%s4345_s2 + $0x10] sm:$0x1] %v2324_v4  ;;  %583 = vmatmul.bf16.vlgmr.msrb.gmra.mxu0 %v382_v7  ;;  %596 = vmatmul.bf16.vlgmr.msrb.gmra.mxu1 %v382_v7  ;;  %v2850_v4 = vor.u32 %v3659_v2, %v2849_v1 }
  0xe8   :  { %2340 = vst [vmem:[%s4345_s2 + $0x18] sm:$0x1] %v2325_v5  ;;  %609 = vmatmul.bf16.vlgmr.msrb.gmra.mxu2 %v382_v7  ;;  %622 = vmatmul.bf16.vlgmr.msrb.gmra.mxu3 %v382_v7  ;;  %v3657_v5 = vld [vmem:[#allocation2 + $0x6c] sm:$0xf] }
  0xe9   :  { %2341 = vst [vmem:[%s4345_s2 + $0x20] sm:$0x1] %v2326_v6  ;;  %v2851_v6 = vld [vmem:[#allocation2 + $0x78] sm:$0xf0]  ;;  %870 = vmatpush.bf16.msra.mxu1 %v2846_v3  ;;  %883 = vmatpush.bf16.msra.mxu2 %v2850_v4 }
  0xea   :  { %2342 = vst [vmem:[%s4345_s2 + $0x28] sm:$0x1] %v2327_v8  ;;  %v2854_v7 = vor.u32 %v3657_v5, %v2851_v6  ;;  %v2825_v8 = vld [vmem:[#allocation2 + $0x40] sm:$0xf] }
  0xeb   :  { %2343 = vst [vmem:[%s4345_s2 + $0x30] sm:$0x1] %v2328_v9  ;;  %v3654_v9 = vld [vmem:[#allocation2 + $0x4c] sm:$0xf0] }
  0xec   :  { %2344 = vst [vmem:[%s4345_s2 + $0x38] sm:$0x1] %v2329_v10  ;;  %v3652_v10 = vld [vmem:[#allocation2 + $0x44] sm:$0xf]  ;;  %896 = vmatpush.bf16.msra.mxu3 %v2854_v7  ;;  %v2826_v11 = vor.u32 %v3654_v9, %v2825_v8 }
  0xed   :  { %v2830_v15 = vor.u32 %v3652_v10, %v2827_v12  ;;  %884 = vmatpush.bf16.msra.mxu2 %v2834_v16 }
  0xee   :  { %858 = vmatpush.bf16.msra.mxu0 %v2826_v11 }
  0xef   :  { %871 = vmatpush.bf16.msra.mxu1 %v2830_v15 }
  0xf0   :  { %897 = vmatpush.bf16.msra.mxu3 %v2838_v19 }
  0xf1   :  { %885 = vmatpush.bf16.msra.mxu2 %v2818_v30 }
  0xf2   :  { %859 = vmatpush.bf16.msra.mxu0 %v2810_v24  ;;  %v3704_v24 = vld [vmem:[#allocation2 + $0xe4] sm:$0xf] }
  0xf3   :  { %872 = vmatpush.bf16.msra.mxu1 %v2814_v29  ;;  %v3042_v29 = vor.u32 %v3704_v24, %v3039_v26  ;;  %v2965_v24 = vld [vmem:[#allocation2 + $0x48] sm:$0xf] }
  0xf4   :  { %898 = vmatpush.bf16.msra.mxu3 %v2822_v33  ;;  %v3050_v33 = vor.u32 %v3705_v31, %v3047_v32  ;;  %v2787_v31 = vld [vmem:[%s4343_s0 + $0x40] sm:$0xff] }
  0xf5   :  { %886 = vmatpush.bf16.msra.mxu2 %v2802_v46  ;;  %v3005_v46 = vld [vmem:[#allocation2 + $0xa0] sm:$0xf] }
  0xf6   :  { %860 = vmatpush.bf16.msra.mxu0 %v2794_v41  ;;  %v3026_v41 = vor.u32 %v3700_v36, %v3023_v38  ;;  %v2941_v32 = vld [vmem:[#allocation2 + $0x20] sm:$0xf]  ;;  %v2943_v36 = vld [vmem:[#allocation2 + $0x30] sm:$0xf0]  ;;  %v3683_v38 = vld [vmem:[#allocation2 + $0x34] sm:$0xf0] }
  0xf7   :  { %873 = vmatpush.bf16.msra.mxu1 %v2798_v45  ;;  %v3034_v45 = vor.u32 %v3701_v43, %v3031_v44  ;;  %v2951_v43 = vld [vmem:[#allocation2 + $0x38] sm:$0xf0] }
  0xf8   :  { %899 = vmatpush.bf16.msra.mxu3 %v2806_v51  ;;  %v3013_v51 = vld [vmem:[#allocation2 + $0xa8] sm:$0xf] }
  0xfa   :  { %1131 = vmatpush.bf16.msrb.mxu0 %v3038_v25  ;;  %v3687_v25 = vld [vmem:[#allocation2 + $0x54] sm:$0xf0] }
  0xfb   :  { %1144 = vmatpush.bf16.msrb.mxu1 %v3042_v29  ;;  %v2967_v29 = vld [vmem:[#allocation2 + $0x58] sm:$0xf0] }
  0xfc   :  { %1170 = vmatpush.bf16.msrb.mxu3 %v3050_v33  ;;  %v3682_v33 = vld [vmem:[#allocation2 + $0x2c] sm:$0xf0] }
  0xff   :  { %1145 = vmatpush.bf16.msrb.mxu1 %v3026_v41 }
 0x100   :  { %1171 = vmatpush.bf16.msrb.mxu3 %v3034_v45 }
 0x164   :  { %v584_v34 = vpop.f32.mrf.mxu0  ;;  %v597_v35 = vpop.f32.mrf.mxu1 }
 0x165   :  { %v627_v39 = vadd.f32 %v2655_v20, %v584_v34  ;;  %v628_v40 = vadd.f32 %v2656_v28, %v597_v35  ;;  %v3707_v28 = vld [vmem:[#allocation2 + $0xf4] sm:$0xf0]  ;;  %v3021_v34 = vld [vmem:[#allocation2 + $0xc0] sm:$0xf]  ;;  %v3702_v35 = vld [vmem:[#allocation2 + $0xcc] sm:$0xf0] }
 0x166   :  { %v3046_v30 = vor.u32 %v3707_v28, %v3045_v27  ;;  %v3022_v37 = vor.u32 %v3702_v35, %v3021_v34  ;;  %v2966_v27 = vor.u32 %v3687_v25, %v2965_v24  ;;  %v3685_v28 = vld [vmem:[#allocation2 + $0x4c] sm:$0xf]  ;;  %v3680_v34 = vld [vmem:[#allocation2 + $0x24] sm:$0xf]  ;;  %v2942_v35 = vor.u32 %v3682_v33, %v2941_v32  ;;  %v3169_v33 = vld [vmem:[#allocation2 + $0xe0] sm:$0xf] }
 0x167   :  { %v631_v49 = vmul.f32 0.5, %v627_v39  ;;  %v635_v50 = vmul.f32 0.5, %v628_v40  ;;  %v3029_v39 = vld [vmem:[#allocation2 + $0xc8] sm:$0xf]  ;;  %v3703_v40 = vld [vmem:[#allocation2 + $0xd4] sm:$0xf0] }
 0x168   :  { %1157 = vmatpush.bf16.msrb.mxu2 %v3046_v30  ;;  %v3030_v42 = vor.u32 %v3703_v40, %v3029_v39  ;;  %1132 = vmatpush.bf16.msrb.mxu0 %v3022_v37  ;;  %v2970_v30 = vor.u32 %v3685_v28, %v2967_v29  ;;  %v2949_v37 = vld [vmem:[#allocation2 + $0x28] sm:$0xf]  ;;  %v2946_v40 = vor.u32 %v3680_v34, %v2943_v36  ;;  %v3738_v34 = vld [vmem:[#allocation2 + $0xec] sm:$0xf0] }
 0x169   :  { %3847 = vtanh.f32 %v631_v49  ;;  %v3006_v49 = vor.u32 %v3698_v47, %v3005_v46  ;;  %v2788_v39 = vld [vmem:[%s4343_s0 + $0x48] sm:$0xff]  ;;  %v2950_v41 = vor.u32 %v3683_v38, %v2949_v37  ;;  %v2925_v47 = vld [vmem:[#allocation2] sm:$0xf]  ;;  %v3170_v36 = vor.u32 %v3738_v34, %v3169_v33  ;;  %v3171_v37 = vld [vmem:[#allocation2 + $0xf0] sm:$0xf0] }
 0x16a   :  { %3849 = vtanh.f32 %v635_v50  ;;  %v3007_v50 = vld [vmem:[#allocation2 + $0xb0] sm:$0xf0]  ;;  %v3177_v38 = vld [vmem:[#allocation2 + $0xe8] sm:$0xf] }
 0x16b   :  { %v610_v54 = vpop.f32.mrf.mxu2  ;;  %v623_v55 = vpop.f32.mrf.mxu3  ;;  %v3091_v34 = vld [vmem:[#allocation2 + $0x50] sm:$0xf0] }
 0x16c   :  { %v629_v56 = vadd.f32 %v2657_v52, %v610_v54  ;;  %v630_v57 = vadd.f32 %v2658_v53, %v623_v55  ;;  %v586_v58 = vpop.f32.mrf.mxu0  ;;  %v599_v59 = vpop.f32.mrf.mxu1  ;;  %1158 = vmatpush.bf16.msrb.mxu2 %v3030_v42  ;;  %v3699_v52 = vld [vmem:[#allocation2 + $0xb4] sm:$0xf0]  ;;  %v3010_v53 = vor.u32 %v3696_v48, %v3007_v50  ;;  %v3697_v55 = vld [vmem:[#allocation2 + $0xac] sm:$0xf]  ;;  %1133 = vmatpush.bf16.msrb.mxu0 %v3006_v49  ;;  %v3678_v48 = vld [vmem:[#allocation2 + $0xc] sm:$0xf0] }
 0x16d   :  { %v3014_v54 = vor.u32 %v3699_v52, %v3013_v51  ;;  %v2989_v58 = vld [vmem:[#allocation2 + $0x80] sm:$0xf]  ;;  %v3694_v59 = vld [vmem:[#allocation2 + $0x8c] sm:$0xf0]  ;;  %v3681_v42 = vld [vmem:[#allocation2 + $0x2c] sm:$0xf]  ;;  %v2926_v52 = vor.u32 %v3678_v48, %v2925_v47 }
 0x16e   :  { %3851 = vtanh.f32 %v629_v56  ;;  %v640_v60 = vmul.f32 0.5, %v630_v57  ;;  %v3015_v56 = vld [vmem:[#allocation2 + $0xb8] sm:$0xf0]  ;;  %1146 = vmatpush.bf16.msrb.mxu1 %v3010_v53  ;;  %v2954_v44 = vor.u32 %v3681_v42, %v2951_v43  ;;  %v3676_v49 = vld [vmem:[#allocation2 + $0x4] sm:$0xf] }
 0x16f   :  { %v3848_v61 = vpop.eup %3847  ;;  %v3018_v57 = vor.u32 %v3697_v55, %v3015_v56  ;;  %v2927_v53 = vld [vmem:[#allocation2 + $0x10] sm:$0xf0]  ;;  %v3679_v55 = vld [vmem:[#allocation2 + $0x14] sm:$0xf0]  ;;  %v3737_v42 = vld [vmem:[#allocation2 + $0xec] sm:$0xf] }
 0x170   :  { %v3850_v63 = vpop.eup %3849  ;;  %v633_v0 = vmul.f32 0.5, %v3848_v61  ;;  %3853 = vtanh.f32 %v640_v60  ;;  %1159 = vmatpush.bf16.msrb.mxu2 %v3014_v54  ;;  %v3692_v60 = vld [vmem:[#allocation2 + $0x84] sm:$0xf]  ;;  %v2990_v61 = vor.u32 %v3694_v59, %v2989_v58  ;;  %v2933_v54 = vld [vmem:[#allocation2 + $0x8] sm:$0xf]  ;;  %v2930_v56 = vor.u32 %v3676_v49, %v2927_v53 }
 0x171   :  { %v637_v1 = vmul.f32 0.5, %v3850_v63  ;;  %1172 = vmatpush.bf16.msrb.mxu3 %v3018_v57  ;;  %v2991_v63 = vld [vmem:[#allocation2 + $0x90] sm:$0xf0]  ;;  %v2934_v57 = vor.u32 %v3679_v55, %v2933_v54  ;;  %v3677_v58 = vld [vmem:[#allocation2 + $0xc] sm:$0xf] }
 0x172   :  { %v634_v2 = vadd.f32 0.5, %v633_v0  ;;  %v2997_v0 = vld [vmem:[#allocation2 + $0x88] sm:$0xf]  ;;  %1134 = vmatpush.bf16.msrb.mxu0 %v2990_v61  ;;  %v2935_v59 = vld [vmem:[#allocation2 + $0x18] sm:$0xf0] }
 0x173   :  { %v638_v3 = vadd.f32 0.5, %v637_v1  ;;  %v612_v4 = vpop.f32.mrf.mxu2  ;;  %v625_v5 = vpop.f32.mrf.mxu3  ;;  %v3695_v1 = vld [vmem:[#allocation2 + $0x94] sm:$0xf0]  ;;  %v3179_v43 = vld [vmem:[#allocation2 + $0xf8] sm:$0xf0] }
 0x174   :  { %v3852_v6 = vpop.eup %3851  ;;  %v3693_v4 = vld [vmem:[#allocation2 + $0x8c] sm:$0xf]  ;;  %v2999_v5 = vld [vmem:[#allocation2 + $0x98] sm:$0xf0]  ;;  %v3732_v47 = vld [vmem:[#allocation2 + $0xc4] sm:$0xf] }
 0x175   :  { %v644_v7 = vmul.f32 %v638_v3, %v4043_v62  ;;  %v645_v8 = vmul.f32 %v3852_v6, %v634_v2  ;;  %v2994_v2 = vor.u32 %v3692_v60, %v2991_v63  ;;  %v2998_v3 = vor.u32 %v3695_v1, %v2997_v0  ;;  %v2789_v0 = vld [vmem:[%s4343_s0 + $0x50] sm:$0xff]  ;;  %v2790_v1 = vld [vmem:[%s4343_s0 + $0x58] sm:$0xff]  ;;  %v3733_v54 = vld [vmem:[#allocation2 + $0xcc] sm:$0xf] }
 0x176   :  { %v3854_v9 = vpop.eup %3853  ;;  %v3002_v6 = vor.u32 %v3693_v4, %v2999_v5  ;;  %v2938_v63 = vor.u32 %v3677_v58, %v2935_v59  ;;  %v3155_v49 = vld [vmem:[#allocation2 + $0xd0] sm:$0xf0]  ;;  %v3163_v55 = vld [vmem:[#allocation2 + $0xd8] sm:$0xf0]  ;;  %v3730_v58 = vld [vmem:[#allocation2 + $0xac] sm:$0xf0] }
 0x177   :  { %v4083_v10 = vadd.f32 %v645_v8, %v644_v7  ;;  %v642_v11 = vmul.f32 0.5, %v3854_v9  ;;  %1147 = vmatpush.bf16.msrb.mxu1 %v2994_v2  ;;  %1160 = vmatpush.bf16.msrb.mxu2 %v2998_v3  ;;  %v2973_v7 = vld [vmem:[#allocation2 + $0x60] sm:$0xf]  ;;  %v3690_v8 = vld [vmem:[#allocation2 + $0x6c] sm:$0xf0] }
 0x178   :  { %v3688_v9 = vld [vmem:[#allocation2 + $0x64] sm:$0xf]  ;;  %1173 = vmatpush.bf16.msrb.mxu3 %v3002_v6 }
 0x179   :  { %3855 = vtanh.f32 %v4083_v10  ;;  %v643_v12 = vadd.f32 0.5, %v642_v11  ;;  %v2974_v11 = vor.u32 %v3690_v8, %v2973_v7  ;;  %v3728_v59 = vld [vmem:[#allocation2 + $0xa4] sm:$0xf] }
 0x17b   :  { %1135 = vmatpush.bf16.msrb.mxu0 %v2974_v11 }
 0x17f   :  { %v3856_v13 = vpop.eup %3855 }
 0x180   :  { %v648_v14 = vmul.f32 %v3856_v13, %v643_v12  ;;  %v2975_v12 = vld [vmem:[#allocation2 + $0x70] sm:$0xf0]  ;;  %v2981_v13 = vld [vmem:[#allocation2 + $0x68] sm:$0xf] }
 0x182   :  { %v2347_v15 = vrot.slane %v648_v14, 1  ;;  %v2348_v16 = vrot.slane %v648_v14, 2  ;;  %v2349_v17 = vrot.slane %v648_v14, 3  ;;  %2361 = vst [vmem:[%s4345_s2 + $0x1] sm:$0x1] %v648_v14  ;;  %v2350_v18 = vrot.slane %v648_v14, 4 }
 0x183   :  { %v660_v19 = vpack.c.bf16 %v648_v14, %v648_v14  ;;  %v2351_v62 = vrot.slane %v648_v14, 5  ;;  %v2352_v20 = vrot.slane %v648_v14, 6  ;;  %v2353_v21 = vrot.slane %v648_v14, 7  ;;  %v3691_v14 = vld [vmem:[#allocation2 + $0x74] sm:$0xf0] }
 0x184   :  { %2362 = vst [vmem:[%s4345_s2 + $0x9] sm:$0x1] %v2347_v15  ;;  %v2978_v15 = vor.u32 %v3688_v9, %v2975_v12 }
 0x185   :  { %2363 = vst [vmem:[%s4345_s2 + $0x11] sm:$0x1] %v2348_v16  ;;  %861 = vmatmul.bf16.vlgmr.msra.gmra.mxu0 %v660_v19  ;;  %874 = vmatmul.bf16.vlgmr.msra.gmra.mxu1 %v660_v19  ;;  %v2982_v16 = vor.u32 %v3691_v14, %v2981_v13 }
 0x186   :  { %2364 = vst [vmem:[%s4345_s2 + $0x19] sm:$0x1] %v2349_v17  ;;  %887 = vmatmul.bf16.vlgmr.msra.gmra.mxu2 %v660_v19  ;;  %900 = vmatmul.bf16.vlgmr.msra.gmra.mxu3 %v660_v19  ;;  %v3689_v17 = vld [vmem:[#allocation2 + $0x6c] sm:$0xf] }
 0x187   :  { %2365 = vst [vmem:[%s4345_s2 + $0x21] sm:$0x1] %v2350_v18  ;;  %v2983_v18 = vld [vmem:[#allocation2 + $0x78] sm:$0xf0]  ;;  %1148 = vmatpush.bf16.msrb.mxu1 %v2978_v15  ;;  %1161 = vmatpush.bf16.msrb.mxu2 %v2982_v16 }
 0x188   :  { %2366 = vst [vmem:[%s4345_s2 + $0x29] sm:$0x1] %v2351_v62  ;;  %v2986_v19 = vor.u32 %v3689_v17, %v2983_v18  ;;  %v2957_v62 = vld [vmem:[#allocation2 + $0x40] sm:$0xf] }
 0x189   :  { %2367 = vst [vmem:[%s4345_s2 + $0x31] sm:$0x1] %v2352_v20  ;;  %v3686_v20 = vld [vmem:[#allocation2 + $0x4c] sm:$0xf0] }
 0x18a   :  { %2368 = vst [vmem:[%s4345_s2 + $0x39] sm:$0x1] %v2353_v21  ;;  %v3684_v21 = vld [vmem:[#allocation2 + $0x44] sm:$0xf]  ;;  %1174 = vmatpush.bf16.msrb.mxu3 %v2986_v19  ;;  %v2958_v22 = vor.u32 %v3686_v20, %v2957_v62 }
 0x18b   :  { %v2962_v26 = vor.u32 %v3684_v21, %v2959_v23  ;;  %1162 = vmatpush.bf16.msrb.mxu2 %v2966_v27 }
 0x18c   :  { %1136 = vmatpush.bf16.msrb.mxu0 %v2958_v22 }
 0x18d   :  { %1149 = vmatpush.bf16.msrb.mxu1 %v2962_v26 }
 0x18e   :  { %1175 = vmatpush.bf16.msrb.mxu3 %v2970_v30 }
 0x18f   :  { %1163 = vmatpush.bf16.msrb.mxu2 %v2950_v41 }
 0x190   :  { %1137 = vmatpush.bf16.msrb.mxu0 %v2942_v35  ;;  %v3736_v35 = vld [vmem:[#allocation2 + $0xe4] sm:$0xf] }
 0x191   :  { %1150 = vmatpush.bf16.msrb.mxu1 %v2946_v40  ;;  %v3174_v40 = vor.u32 %v3736_v35, %v3171_v37  ;;  %v3097_v35 = vld [vmem:[#allocation2 + $0x48] sm:$0xf] }
 0x192   :  { %1176 = vmatpush.bf16.msrb.mxu3 %v2954_v44  ;;  %v3182_v44 = vor.u32 %v3737_v42, %v3179_v43  ;;  %v2919_v42 = vld [vmem:[%s4343_s0 + $0x60] sm:$0xff] }
 0x193   :  { %1164 = vmatpush.bf16.msrb.mxu2 %v2934_v57  ;;  %v3137_v57 = vld [vmem:[#allocation2 + $0xa0] sm:$0xf] }
 0x194   :  { %1138 = vmatpush.bf16.msrb.mxu0 %v2926_v52  ;;  %v3158_v52 = vor.u32 %v3732_v47, %v3155_v49  ;;  %v3073_v43 = vld [vmem:[#allocation2 + $0x20] sm:$0xf]  ;;  %v3075_v47 = vld [vmem:[#allocation2 + $0x30] sm:$0xf0]  ;;  %v3715_v49 = vld [vmem:[#allocation2 + $0x34] sm:$0xf0] }
 0x195   :  { %1151 = vmatpush.bf16.msrb.mxu1 %v2930_v56  ;;  %v3166_v56 = vor.u32 %v3733_v54, %v3163_v55  ;;  %v3083_v54 = vld [vmem:[#allocation2 + $0x38] sm:$0xf0] }
 0x196   :  { %1177 = vmatpush.bf16.msrb.mxu3 %v2938_v63  ;;  %v3145_v63 = vld [vmem:[#allocation2 + $0xa8] sm:$0xf] }
 0x198   :  { %1409 = vmatpush.bf16.msra.mxu0 %v3170_v36  ;;  %v3719_v36 = vld [vmem:[#allocation2 + $0x54] sm:$0xf0] }
 0x199   :  { %1422 = vmatpush.bf16.msra.mxu1 %v3174_v40  ;;  %v3099_v40 = vld [vmem:[#allocation2 + $0x58] sm:$0xf0] }
 0x19a   :  { %1448 = vmatpush.bf16.msra.mxu3 %v3182_v44  ;;  %v3714_v44 = vld [vmem:[#allocation2 + $0x2c] sm:$0xf0] }
 0x19d   :  { %1423 = vmatpush.bf16.msra.mxu1 %v3158_v52 }
 0x19e   :  { %1449 = vmatpush.bf16.msra.mxu3 %v3166_v56 }
 0x202   :  { %v862_v45 = vpop.f32.mrf.mxu0  ;;  %v875_v46 = vpop.f32.mrf.mxu1 }
 0x203   :  { %v905_v50 = vadd.f32 %v2787_v31, %v862_v45  ;;  %v906_v51 = vadd.f32 %v2788_v39, %v875_v46  ;;  %v3739_v39 = vld [vmem:[#allocation2 + $0xf4] sm:$0xf0]  ;;  %v3153_v45 = vld [vmem:[#allocation2 + $0xc0] sm:$0xf]  ;;  %v3734_v46 = vld [vmem:[#allocation2 + $0xcc] sm:$0xf0] }
 0x204   :  { %v3178_v41 = vor.u32 %v3739_v39, %v3177_v38  ;;  %v3154_v48 = vor.u32 %v3734_v46, %v3153_v45  ;;  %v3098_v38 = vor.u32 %v3719_v36, %v3097_v35  ;;  %v3717_v39 = vld [vmem:[#allocation2 + $0x4c] sm:$0xf]  ;;  %v3712_v45 = vld [vmem:[#allocation2 + $0x24] sm:$0xf]  ;;  %v3074_v46 = vor.u32 %v3714_v44, %v3073_v43  ;;  %v3301_v44 = vld [vmem:[#allocation2 + $0xe0] sm:$0xf] }
 0x205   :  { %v909_v60 = vmul.f32 0.5, %v905_v50  ;;  %v913_v61 = vmul.f32 0.5, %v906_v51  ;;  %v3161_v50 = vld [vmem:[#allocation2 + $0xc8] sm:$0xf]  ;;  %v3735_v51 = vld [vmem:[#allocation2 + $0xd4] sm:$0xf0] }
 0x206   :  { %1435 = vmatpush.bf16.msra.mxu2 %v3178_v41  ;;  %v3162_v53 = vor.u32 %v3735_v51, %v3161_v50  ;;  %1410 = vmatpush.bf16.msra.mxu0 %v3154_v48  ;;  %v3102_v41 = vor.u32 %v3717_v39, %v3099_v40  ;;  %v3081_v48 = vld [vmem:[#allocation2 + $0x28] sm:$0xf]  ;;  %v3078_v51 = vor.u32 %v3712_v45, %v3075_v47  ;;  %v3770_v45 = vld [vmem:[#allocation2 + $0xec] sm:$0xf0] }
 0x207   :  { %3857 = vtanh.f32 %v909_v60  ;;  %v3138_v60 = vor.u32 %v3730_v58, %v3137_v57  ;;  %v2920_v50 = vld [vmem:[%s4343_s0 + $0x68] sm:$0xff]  ;;  %v3082_v52 = vor.u32 %v3715_v49, %v3081_v48  ;;  %v3057_v58 = vld [vmem:[#allocation2] sm:$0xf]  ;;  %v3302_v47 = vor.u32 %v3770_v45, %v3301_v44  ;;  %v3303_v48 = vld [vmem:[#allocation2 + $0xf0] sm:$0xf0] }
 0x208   :  { %3859 = vtanh.f32 %v913_v61  ;;  %v3139_v61 = vld [vmem:[#allocation2 + $0xb0] sm:$0xf0]  ;;  %v3309_v49 = vld [vmem:[#allocation2 + $0xe8] sm:$0xf] }
 0x209   :  { %v888_v2 = vpop.f32.mrf.mxu2  ;;  %v901_v3 = vpop.f32.mrf.mxu3  ;;  %v3223_v45 = vld [vmem:[#allocation2 + $0x50] sm:$0xf0] }
 0x20a   :  { %v907_v4 = vadd.f32 %v2789_v0, %v888_v2  ;;  %v908_v5 = vadd.f32 %v2790_v1, %v901_v3  ;;  %v864_v6 = vpop.f32.mrf.mxu0  ;;  %v877_v7 = vpop.f32.mrf.mxu1  ;;  %1436 = vmatpush.bf16.msra.mxu2 %v3162_v53  ;;  %v3731_v0 = vld [vmem:[#allocation2 + $0xb4] sm:$0xf0]  ;;  %v3142_v1 = vor.u32 %v3728_v59, %v3139_v61  ;;  %v3729_v3 = vld [vmem:[#allocation2 + $0xac] sm:$0xf]  ;;  %1411 = vmatpush.bf16.msra.mxu0 %v3138_v60  ;;  %v3710_v59 = vld [vmem:[#allocation2 + $0xc] sm:$0xf0] }
 0x20b   :  { %v3146_v2 = vor.u32 %v3731_v0, %v3145_v63  ;;  %v3121_v6 = vld [vmem:[#allocation2 + $0x80] sm:$0xf]  ;;  %v3726_v7 = vld [vmem:[#allocation2 + $0x8c] sm:$0xf0]  ;;  %v3713_v53 = vld [vmem:[#allocation2 + $0x2c] sm:$0xf]  ;;  %v3058_v0 = vor.u32 %v3710_v59, %v3057_v58 }
 0x20c   :  { %3861 = vtanh.f32 %v907_v4  ;;  %v918_v8 = vmul.f32 0.5, %v908_v5  ;;  %v3147_v4 = vld [vmem:[#allocation2 + $0xb8] sm:$0xf0]  ;;  %1424 = vmatpush.bf16.msra.mxu1 %v3142_v1  ;;  %v3086_v55 = vor.u32 %v3713_v53, %v3083_v54  ;;  %v3708_v60 = vld [vmem:[#allocation2 + $0x4] sm:$0xf] }
 0x20d   :  { %v3858_v9 = vpop.eup %3857  ;;  %v3150_v5 = vor.u32 %v3729_v3, %v3147_v4  ;;  %v3059_v1 = vld [vmem:[#allocation2 + $0x10] sm:$0xf0]  ;;  %v3711_v3 = vld [vmem:[#allocation2 + $0x14] sm:$0xf0]  ;;  %v3769_v53 = vld [vmem:[#allocation2 + $0xec] sm:$0xf] }
 0x20e   :  { %v3860_v11 = vpop.eup %3859  ;;  %v911_v12 = vmul.f32 0.5, %v3858_v9  ;;  %3863 = vtanh.f32 %v918_v8  ;;  %1437 = vmatpush.bf16.msra.mxu2 %v3146_v2  ;;  %v3724_v8 = vld [vmem:[#allocation2 + $0x84] sm:$0xf]  ;;  %v3122_v9 = vor.u32 %v3726_v7, %v3121_v6  ;;  %v3065_v2 = vld [vmem:[#allocation2 + $0x8] sm:$0xf]  ;;  %v3062_v4 = vor.u32 %v3708_v60, %v3059_v1 }
 0x20f   :  { %v915_v13 = vmul.f32 0.5, %v3860_v11  ;;  %1450 = vmatpush.bf16.msra.mxu3 %v3150_v5  ;;  %v3123_v11 = vld [vmem:[#allocation2 + $0x90] sm:$0xf0]  ;;  %v3066_v5 = vor.u32 %v3711_v3, %v3065_v2  ;;  %v3709_v6 = vld [vmem:[#allocation2 + $0xc] sm:$0xf] }
 0x210   :  { %v912_v14 = vadd.f32 0.5, %v911_v12  ;;  %v3129_v12 = vld [vmem:[#allocation2 + $0x88] sm:$0xf]  ;;  %1412 = vmatpush.bf16.msra.mxu0 %v3122_v9  ;;  %v3067_v7 = vld [vmem:[#allocation2 + $0x18] sm:$0xf0] }
 0x211   :  { %v916_v15 = vadd.f32 0.5, %v915_v13  ;;  %v890_v16 = vpop.f32.mrf.mxu2  ;;  %v903_v17 = vpop.f32.mrf.mxu3  ;;  %v3727_v13 = vld [vmem:[#allocation2 + $0x94] sm:$0xf0]  ;;  %v3311_v54 = vld [vmem:[#allocation2 + $0xf8] sm:$0xf0] }
 0x212   :  { %v3862_v18 = vpop.eup %3861  ;;  %v3725_v16 = vld [vmem:[#allocation2 + $0x8c] sm:$0xf]  ;;  %v3131_v17 = vld [vmem:[#allocation2 + $0x98] sm:$0xf0]  ;;  %v3764_v58 = vld [vmem:[#allocation2 + $0xc4] sm:$0xf] }
 0x213   :  { %v922_v19 = vmul.f32 %v916_v15, %v4083_v10  ;;  %v923_v62 = vmul.f32 %v3862_v18, %v912_v14  ;;  %v3126_v14 = vor.u32 %v3724_v8, %v3123_v11  ;;  %v3130_v15 = vor.u32 %v3727_v13, %v3129_v12  ;;  %v2921_v12 = vld [vmem:[%s4343_s0 + $0x70] sm:$0xff]  ;;  %v2922_v13 = vld [vmem:[%s4343_s0 + $0x78] sm:$0xff]  ;;  %v3765_v2 = vld [vmem:[#allocation2 + $0xcc] sm:$0xf] }
 0x214   :  { %v3864_v20 = vpop.eup %3863  ;;  %v3134_v18 = vor.u32 %v3725_v16, %v3131_v17  ;;  %v3070_v11 = vor.u32 %v3709_v6, %v3067_v7  ;;  %v3287_v60 = vld [vmem:[#allocation2 + $0xd0] sm:$0xf0]  ;;  %v3295_v3 = vld [vmem:[#allocation2 + $0xd8] sm:$0xf0]  ;;  %v3762_v6 = vld [vmem:[#allocation2 + $0xac] sm:$0xf0] }
 0x215   :  { %v4123_v21 = vadd.f32 %v923_v62, %v922_v19  ;;  %v920_v22 = vmul.f32 0.5, %v3864_v20  ;;  %1425 = vmatpush.bf16.msra.mxu1 %v3126_v14  ;;  %1438 = vmatpush.bf16.msra.mxu2 %v3130_v15  ;;  %v3105_v19 = vld [vmem:[#allocation2 + $0x60] sm:$0xf]  ;;  %v3722_v62 = vld [vmem:[#allocation2 + $0x6c] sm:$0xf0] }
 0x216   :  { %v3720_v20 = vld [vmem:[#allocation2 + $0x64] sm:$0xf]  ;;  %1451 = vmatpush.bf16.msra.mxu3 %v3134_v18 }
 0x217   :  { %3865 = vtanh.f32 %v4123_v21  ;;  %v921_v23 = vadd.f32 0.5, %v920_v22  ;;  %v3106_v22 = vor.u32 %v3722_v62, %v3105_v19  ;;  %v3760_v7 = vld [vmem:[#allocation2 + $0xa4] sm:$0xf] }
 0x219   :  { %1413 = vmatpush.bf16.msra.mxu0 %v3106_v22 }
 0x21d   :  { %v3866_v24 = vpop.eup %3865 }
 0x21e   :  { %v926_v25 = vmul.f32 %v3866_v24, %v921_v23  ;;  %v3107_v23 = vld [vmem:[#allocation2 + $0x70] sm:$0xf0]  ;;  %v3113_v24 = vld [vmem:[#allocation2 + $0x68] sm:$0xf] }
 0x220   :  { %v2371_v26 = vrot.slane %v926_v25, 1  ;;  %v2372_v27 = vrot.slane %v926_v25, 2  ;;  %v2373_v28 = vrot.slane %v926_v25, 3  ;;  %2385 = vst [vmem:[%s4345_s2 + $0x2] sm:$0x1] %v926_v25  ;;  %v2374_v29 = vrot.slane %v926_v25, 4 }
 0x221   :  { %v938_v30 = vpack.c.bf16 %v926_v25, %v926_v25  ;;  %v2375_v10 = vrot.slane %v926_v25, 5  ;;  %v2376_v31 = vrot.slane %v926_v25, 6  ;;  %v2377_v32 = vrot.slane %v926_v25, 7  ;;  %v3723_v25 = vld [vmem:[#allocation2 + $0x74] sm:$0xf0] }
 0x222   :  { %2386 = vst [vmem:[%s4345_s2 + $0xa] sm:$0x1] %v2371_v26  ;;  %v3110_v26 = vor.u32 %v3720_v20, %v3107_v23 }
 0x223   :  { %2387 = vst [vmem:[%s4345_s2 + $0x12] sm:$0x1] %v2372_v27  ;;  %1139 = vmatmul.bf16.vlgmr.msrb.gmra.mxu0 %v938_v30  ;;  %1152 = vmatmul.bf16.vlgmr.msrb.gmra.mxu1 %v938_v30  ;;  %v3114_v27 = vor.u32 %v3723_v25, %v3113_v24 }
 0x224   :  { %2388 = vst [vmem:[%s4345_s2 + $0x1a] sm:$0x1] %v2373_v28  ;;  %1165 = vmatmul.bf16.vlgmr.msrb.gmra.mxu2 %v938_v30  ;;  %1178 = vmatmul.bf16.vlgmr.msrb.gmra.mxu3 %v938_v30  ;;  %v3721_v28 = vld [vmem:[#allocation2 + $0x6c] sm:$0xf] }
 0x225   :  { %2389 = vst [vmem:[%s4345_s2 + $0x22] sm:$0x1] %v2374_v29  ;;  %v3115_v29 = vld [vmem:[#allocation2 + $0x78] sm:$0xf0]  ;;  %1426 = vmatpush.bf16.msra.mxu1 %v3110_v26  ;;  %1439 = vmatpush.bf16.msra.mxu2 %v3114_v27 }
 0x226   :  { %2390 = vst [vmem:[%s4345_s2 + $0x2a] sm:$0x1] %v2375_v10  ;;  %v3118_v30 = vor.u32 %v3721_v28, %v3115_v29  ;;  %v3089_v10 = vld [vmem:[#allocation2 + $0x40] sm:$0xf] }
 0x227   :  { %2391 = vst [vmem:[%s4345_s2 + $0x32] sm:$0x1] %v2376_v31  ;;  %v3718_v31 = vld [vmem:[#allocation2 + $0x4c] sm:$0xf0] }
 0x228   :  { %2392 = vst [vmem:[%s4345_s2 + $0x3a] sm:$0x1] %v2377_v32  ;;  %v3716_v32 = vld [vmem:[#allocation2 + $0x44] sm:$0xf]  ;;  %1452 = vmatpush.bf16.msra.mxu3 %v3118_v30  ;;  %v3090_v33 = vor.u32 %v3718_v31, %v3089_v10 }
 0x229   :  { %v3094_v37 = vor.u32 %v3716_v32, %v3091_v34  ;;  %1440 = vmatpush.bf16.msra.mxu2 %v3098_v38 }
 0x22a   :  { %1414 = vmatpush.bf16.msra.mxu0 %v3090_v33 }
 0x22b   :  { %1427 = vmatpush.bf16.msra.mxu1 %v3094_v37 }
 0x22c   :  { %1453 = vmatpush.bf16.msra.mxu3 %v3102_v41 }
 0x22d   :  { %1441 = vmatpush.bf16.msra.mxu2 %v3082_v52 }
 0x22e   :  { %1415 = vmatpush.bf16.msra.mxu0 %v3074_v46  ;;  %v3768_v46 = vld [vmem:[#allocation2 + $0xe4] sm:$0xf] }
 0x22f   :  { %1428 = vmatpush.bf16.msra.mxu1 %v3078_v51  ;;  %v3306_v51 = vor.u32 %v3768_v46, %v3303_v48  ;;  %v3229_v46 = vld [vmem:[#allocation2 + $0x48] sm:$0xf] }
 0x230   :  { %1454 = vmatpush.bf16.msra.mxu3 %v3086_v55  ;;  %v3314_v55 = vor.u32 %v3769_v53, %v3311_v54  ;;  %v3051_v53 = vld [vmem:[%s4343_s0 + $0x80] sm:$0xff] }
 0x231   :  { %1442 = vmatpush.bf16.msra.mxu2 %v3066_v5  ;;  %v3269_v5 = vld [vmem:[#allocation2 + $0xa0] sm:$0xf] }
 0x232   :  { %1416 = vmatpush.bf16.msra.mxu0 %v3058_v0  ;;  %v3290_v0 = vor.u32 %v3764_v58, %v3287_v60  ;;  %v3205_v54 = vld [vmem:[#allocation2 + $0x20] sm:$0xf]  ;;  %v3207_v58 = vld [vmem:[#allocation2 + $0x30] sm:$0xf0]  ;;  %v3747_v60 = vld [vmem:[#allocation2 + $0x34] sm:$0xf0] }
 0x233   :  { %1429 = vmatpush.bf16.msra.mxu1 %v3062_v4  ;;  %v3298_v4 = vor.u32 %v3765_v2, %v3295_v3  ;;  %v3215_v2 = vld [vmem:[#allocation2 + $0x38] sm:$0xf0] }
 0x234   :  { %1455 = vmatpush.bf16.msra.mxu3 %v3070_v11  ;;  %v3277_v11 = vld [vmem:[#allocation2 + $0xa8] sm:$0xf] }
 0x236   :  { %1687 = vmatpush.bf16.msrb.mxu0 %v3302_v47  ;;  %v3751_v47 = vld [vmem:[#allocation2 + $0x54] sm:$0xf0] }
 0x237   :  { %1700 = vmatpush.bf16.msrb.mxu1 %v3306_v51  ;;  %v3231_v51 = vld [vmem:[#allocation2 + $0x58] sm:$0xf0] }
 0x238   :  { %1726 = vmatpush.bf16.msrb.mxu3 %v3314_v55  ;;  %v3746_v55 = vld [vmem:[#allocation2 + $0x2c] sm:$0xf0] }
 0x23b   :  { %1701 = vmatpush.bf16.msrb.mxu1 %v3290_v0 }
 0x23c   :  { %1727 = vmatpush.bf16.msrb.mxu3 %v3298_v4 }
 0x2a0   :  { %v1140_v56 = vpop.f32.mrf.mxu0  ;;  %v1153_v57 = vpop.f32.mrf.mxu1 }
 0x2a1   :  { %v1183_v61 = vadd.f32 %v2919_v42, %v1140_v56  ;;  %v1184_v63 = vadd.f32 %v2920_v50, %v1153_v57  ;;  %v3771_v50 = vld [vmem:[#allocation2 + $0xf4] sm:$0xf0]  ;;  %v3285_v56 = vld [vmem:[#allocation2 + $0xc0] sm:$0xf]  ;;  %v3766_v57 = vld [vmem:[#allocation2 + $0xcc] sm:$0xf0] }
 0x2a2   :  { %v3310_v52 = vor.u32 %v3771_v50, %v3309_v49  ;;  %v3286_v59 = vor.u32 %v3766_v57, %v3285_v56  ;;  %v3230_v49 = vor.u32 %v3751_v47, %v3229_v46  ;;  %v3749_v50 = vld [vmem:[#allocation2 + $0x4c] sm:$0xf]  ;;  %v3744_v56 = vld [vmem:[#allocation2 + $0x24] sm:$0xf]  ;;  %v3206_v57 = vor.u32 %v3746_v55, %v3205_v54  ;;  %v3433_v55 = vld [vmem:[#allocation2 + $0xe0] sm:$0xf] }
 0x2a3   :  { %v1187_v8 = vmul.f32 0.5, %v1183_v61  ;;  %v1191_v9 = vmul.f32 0.5, %v1184_v63  ;;  %v3293_v61 = vld [vmem:[#allocation2 + $0xc8] sm:$0xf]  ;;  %v3767_v63 = vld [vmem:[#allocation2 + $0xd4] sm:$0xf0] }
 0x2a4   :  { %1713 = vmatpush.bf16.msrb.mxu2 %v3310_v52  ;;  %v3294_v1 = vor.u32 %v3767_v63, %v3293_v61  ;;  %1688 = vmatpush.bf16.msrb.mxu0 %v3286_v59  ;;  %v3234_v52 = vor.u32 %v3749_v50, %v3231_v51  ;;  %v3213_v59 = vld [vmem:[#allocation2 + $0x28] sm:$0xf]  ;;  %v3210_v63 = vor.u32 %v3744_v56, %v3207_v58  ;;  %v3802_v56 = vld [vmem:[#allocation2 + $0xec] sm:$0xf0] }
 0x2a5   :  { %3867 = vtanh.f32 %v1187_v8  ;;  %v3270_v8 = vor.u32 %v3762_v6, %v3269_v5  ;;  %v3052_v61 = vld [vmem:[%s4343_s0 + $0x88] sm:$0xff]  ;;  %v3214_v0 = vor.u32 %v3747_v60, %v3213_v59  ;;  %v3189_v6 = vld [vmem:[#allocation2] sm:$0xf]  ;;  %v3434_v58 = vor.u32 %v3802_v56, %v3433_v55  ;;  %v3435_v59 = vld [vmem:[#allocation2 + $0xf0] sm:$0xf0] }
 0x2a6   :  { %3869 = vtanh.f32 %v1191_v9  ;;  %v3271_v9 = vld [vmem:[#allocation2 + $0xb0] sm:$0xf0]  ;;  %v3441_v60 = vld [vmem:[#allocation2 + $0xe8] sm:$0xf] }
 0x2a7   :  { %v1166_v14 = vpop.f32.mrf.mxu2  ;;  %v1179_v15 = vpop.f32.mrf.mxu3  ;;  %v3355_v56 = vld [vmem:[#allocation2 + $0x50] sm:$0xf0] }
 0x2a8   :  { %v1185_v16 = vadd.f32 %v2921_v12, %v1166_v14  ;;  %v1186_v17 = vadd.f32 %v2922_v13, %v1179_v15  ;;  %v1142_v18 = vpop.f32.mrf.mxu0  ;;  %v1155_v19 = vpop.f32.mrf.mxu1  ;;  %1714 = vmatpush.bf16.msrb.mxu2 %v3294_v1  ;;  %v3763_v12 = vld [vmem:[#allocation2 + $0xb4] sm:$0xf0]  ;;  %v3274_v13 = vor.u32 %v3760_v7, %v3271_v9  ;;  %v3761_v15 = vld [vmem:[#allocation2 + $0xac] sm:$0xf]  ;;  %1689 = vmatpush.bf16.msrb.mxu0 %v3270_v8  ;;  %v3742_v7 = vld [vmem:[#allocation2 + $0xc] sm:$0xf0] }
 0x2a9   :  { %v3278_v14 = vor.u32 %v3763_v12, %v3277_v11  ;;  %v3253_v18 = vld [vmem:[#allocation2 + $0x80] sm:$0xf]  ;;  %v3758_v19 = vld [vmem:[#allocation2 + $0x8c] sm:$0xf0]  ;;  %v3745_v1 = vld [vmem:[#allocation2 + $0x2c] sm:$0xf]  ;;  %v3190_v12 = vor.u32 %v3742_v7, %v3189_v6 }
 0x2aa   :  { %3871 = vtanh.f32 %v1185_v16  ;;  %v1196_v62 = vmul.f32 0.5, %v1186_v17  ;;  %v3279_v16 = vld [vmem:[#allocation2 + $0xb8] sm:$0xf0]  ;;  %1702 = vmatpush.bf16.msrb.mxu1 %v3274_v13  ;;  %v3218_v3 = vor.u32 %v3745_v1, %v3215_v2  ;;  %v3740_v8 = vld [vmem:[#allocation2 + $0x4] sm:$0xf] }
 0x2ab   :  { %v3868_v20 = vpop.eup %3867  ;;  %v3282_v17 = vor.u32 %v3761_v15, %v3279_v16  ;;  %v3191_v13 = vld [vmem:[#allocation2 + $0x10] sm:$0xf0]  ;;  %v3743_v15 = vld [vmem:[#allocation2 + $0x14] sm:$0xf0]  ;;  %v3801_v1 = vld [vmem:[#allocation2 + $0xec] sm:$0xf] }
 0x2ac   :  { %v3870_v22 = vpop.eup %3869  ;;  %v1189_v23 = vmul.f32 0.5, %v3868_v20  ;;  %3873 = vtanh.f32 %v1196_v62  ;;  %1715 = vmatpush.bf16.msrb.mxu2 %v3278_v14  ;;  %v3756_v62 = vld [vmem:[#allocation2 + $0x84] sm:$0xf]  ;;  %v3254_v20 = vor.u32 %v3758_v19, %v3253_v18  ;;  %v3197_v14 = vld [vmem:[#allocation2 + $0x8] sm:$0xf]  ;;  %v3194_v16 = vor.u32 %v3740_v8, %v3191_v13 }
 0x2ad   :  { %v1193_v24 = vmul.f32 0.5, %v3870_v22  ;;  %1728 = vmatpush.bf16.msrb.mxu3 %v3282_v17  ;;  %v3255_v22 = vld [vmem:[#allocation2 + $0x90] sm:$0xf0]  ;;  %v3198_v17 = vor.u32 %v3743_v15, %v3197_v14  ;;  %v3741_v18 = vld [vmem:[#allocation2 + $0xc] sm:$0xf] }
 0x2ae   :  { %v1190_v25 = vadd.f32 0.5, %v1189_v23  ;;  %v3261_v23 = vld [vmem:[#allocation2 + $0x88] sm:$0xf]  ;;  %1690 = vmatpush.bf16.msrb.mxu0 %v3254_v20  ;;  %v3199_v19 = vld [vmem:[#allocation2 + $0x18] sm:$0xf0] }
 0x2af   :  { %v1194_v26 = vadd.f32 0.5, %v1193_v24  ;;  %v1168_v27 = vpop.f32.mrf.mxu2  ;;  %v1181_v28 = vpop.f32.mrf.mxu3  ;;  %v3759_v24 = vld [vmem:[#allocation2 + $0x94] sm:$0xf0]  ;;  %v3443_v2 = vld [vmem:[#allocation2 + $0xf8] sm:$0xf0] }
 0x2b0   :  { %v3872_v29 = vpop.eup %3871  ;;  %v3757_v27 = vld [vmem:[#allocation2 + $0x8c] sm:$0xf]  ;;  %v3263_v28 = vld [vmem:[#allocation2 + $0x98] sm:$0xf0]  ;;  %v3796_v6 = vld [vmem:[#allocation2 + $0xc4] sm:$0xf] }
 0x2b1   :  { %v1200_v30 = vmul.f32 %v1194_v26, %v4123_v21  ;;  %v1201_v10 = vmul.f32 %v3872_v29, %v1190_v25  ;;  %v3258_v25 = vor.u32 %v3756_v62, %v3255_v22  ;;  %v3262_v26 = vor.u32 %v3759_v24, %v3261_v23  ;;  %v3053_v23 = vld [vmem:[%s4343_s0 + $0x90] sm:$0xff]  ;;  %v3054_v24 = vld [vmem:[%s4343_s0 + $0x98] sm:$0xff]  ;;  %v3797_v14 = vld [vmem:[#allocation2 + $0xcc] sm:$0xf] }
 0x2b2   :  { %v3874_v31 = vpop.eup %3873  ;;  %v3266_v29 = vor.u32 %v3757_v27, %v3263_v28  ;;  %v3202_v22 = vor.u32 %v3741_v18, %v3199_v19  ;;  %v3419_v8 = vld [vmem:[#allocation2 + $0xd0] sm:$0xf0]  ;;  %v3427_v15 = vld [vmem:[#allocation2 + $0xd8] sm:$0xf0]  ;;  %v3794_v18 = vld [vmem:[#allocation2 + $0xac] sm:$0xf0] }
 0x2b3   :  { %v4163_v32 = vadd.f32 %v1201_v10, %v1200_v30  ;;  %v1198_v33 = vmul.f32 0.5, %v3874_v31  ;;  %1703 = vmatpush.bf16.msrb.mxu1 %v3258_v25  ;;  %1716 = vmatpush.bf16.msrb.mxu2 %v3262_v26  ;;  %v3237_v30 = vld [vmem:[#allocation2 + $0x60] sm:$0xf]  ;;  %v3754_v10 = vld [vmem:[#allocation2 + $0x6c] sm:$0xf0] }
 0x2b4   :  { %v3752_v31 = vld [vmem:[#allocation2 + $0x64] sm:$0xf]  ;;  %1729 = vmatpush.bf16.msrb.mxu3 %v3266_v29 }
 0x2b5   :  { %3875 = vtanh.f32 %v4163_v32  ;;  %v1199_v34 = vadd.f32 0.5, %v1198_v33  ;;  %v3238_v33 = vor.u32 %v3754_v10, %v3237_v30  ;;  %v3792_v19 = vld [vmem:[#allocation2 + $0xa4] sm:$0xf] }
 0x2b7   :  { %1691 = vmatpush.bf16.msrb.mxu0 %v3238_v33 }
 0x2bb   :  { %v3876_v35 = vpop.eup %3875 }
 0x2bc   :  { %v1204_v36 = vmul.f32 %v3876_v35, %v1199_v34  ;;  %v3239_v34 = vld [vmem:[#allocation2 + $0x70] sm:$0xf0]  ;;  %v3245_v35 = vld [vmem:[#allocation2 + $0x68] sm:$0xf] }
 0x2be   :  { %v2395_v37 = vrot.slane %v1204_v36, 1  ;;  %v2396_v38 = vrot.slane %v1204_v36, 2  ;;  %v2397_v39 = vrot.slane %v1204_v36, 3  ;;  %2409 = vst [vmem:[%s4345_s2 + $0x3] sm:$0x1] %v1204_v36  ;;  %v2398_v40 = vrot.slane %v1204_v36, 4 }
 0x2bf   :  { %v1216_v41 = vpack.c.bf16 %v1204_v36, %v1204_v36  ;;  %v2399_v21 = vrot.slane %v1204_v36, 5  ;;  %v2400_v42 = vrot.slane %v1204_v36, 6  ;;  %v2401_v43 = vrot.slane %v1204_v36, 7  ;;  %v3755_v36 = vld [vmem:[#allocation2 + $0x74] sm:$0xf0] }
 0x2c0   :  { %2410 = vst [vmem:[%s4345_s2 + $0xb] sm:$0x1] %v2395_v37  ;;  %v3242_v37 = vor.u32 %v3752_v31, %v3239_v34 }
 0x2c1   :  { %2411 = vst [vmem:[%s4345_s2 + $0x13] sm:$0x1] %v2396_v38  ;;  %1417 = vmatmul.bf16.vlgmr.msra.gmra.mxu0 %v1216_v41  ;;  %1430 = vmatmul.bf16.vlgmr.msra.gmra.mxu1 %v1216_v41  ;;  %v3246_v38 = vor.u32 %v3755_v36, %v3245_v35 }
 0x2c2   :  { %2412 = vst [vmem:[%s4345_s2 + $0x1b] sm:$0x1] %v2397_v39  ;;  %1443 = vmatmul.bf16.vlgmr.msra.gmra.mxu2 %v1216_v41  ;;  %1456 = vmatmul.bf16.vlgmr.msra.gmra.mxu3 %v1216_v41  ;;  %v3753_v39 = vld [vmem:[#allocation2 + $0x6c] sm:$0xf] }
 0x2c3   :  { %2413 = vst [vmem:[%s4345_s2 + $0x23] sm:$0x1] %v2398_v40  ;;  %v3247_v40 = vld [vmem:[#allocation2 + $0x78] sm:$0xf0]  ;;  %1704 = vmatpush.bf16.msrb.mxu1 %v3242_v37  ;;  %1717 = vmatpush.bf16.msrb.mxu2 %v3246_v38 }
 0x2c4   :  { %2414 = vst [vmem:[%s4345_s2 + $0x2b] sm:$0x1] %v2399_v21  ;;  %v3250_v41 = vor.u32 %v3753_v39, %v3247_v40  ;;  %v3221_v21 = vld [vmem:[#allocation2 + $0x40] sm:$0xf] }
 0x2c5   :  { %2415 = vst [vmem:[%s4345_s2 + $0x33] sm:$0x1] %v2400_v42  ;;  %v3750_v42 = vld [vmem:[#allocation2 + $0x4c] sm:$0xf0] }
 0x2c6   :  { %2416 = vst [vmem:[%s4345_s2 + $0x3b] sm:$0x1] %v2401_v43  ;;  %v3748_v43 = vld [vmem:[#allocation2 + $0x44] sm:$0xf]  ;;  %1730 = vmatpush.bf16.msrb.mxu3 %v3250_v41  ;;  %v3222_v44 = vor.u32 %v3750_v42, %v3221_v21 }
 0x2c7   :  { %v3226_v48 = vor.u32 %v3748_v43, %v3223_v45  ;;  %1718 = vmatpush.bf16.msrb.mxu2 %v3230_v49 }
 0x2c8   :  { %1692 = vmatpush.bf16.msrb.mxu0 %v3222_v44 }
 0x2c9   :  { %1705 = vmatpush.bf16.msrb.mxu1 %v3226_v48 }
 0x2ca   :  { %1731 = vmatpush.bf16.msrb.mxu3 %v3234_v52 }
 0x2cb   :  { %1719 = vmatpush.bf16.msrb.mxu2 %v3214_v0 }
 0x2cc   :  { %1693 = vmatpush.bf16.msrb.mxu0 %v3206_v57  ;;  %v3800_v57 = vld [vmem:[#allocation2 + $0xe4] sm:$0xf] }
 0x2cd   :  { %1706 = vmatpush.bf16.msrb.mxu1 %v3210_v63  ;;  %v3438_v63 = vor.u32 %v3800_v57, %v3435_v59  ;;  %v3361_v57 = vld [vmem:[#allocation2 + $0x48] sm:$0xf] }
 0x2ce   :  { %1732 = vmatpush.bf16.msrb.mxu3 %v3218_v3  ;;  %v3446_v3 = vor.u32 %v3801_v1, %v3443_v2  ;;  %v3183_v1 = vld [vmem:[%s4343_s0 + $0xa0] sm:$0xff] }
 0x2cf   :  { %1720 = vmatpush.bf16.msrb.mxu2 %v3198_v17  ;;  %v3401_v17 = vld [vmem:[#allocation2 + $0xa0] sm:$0xf] }
 0x2d0   :  { %1694 = vmatpush.bf16.msrb.mxu0 %v3190_v12  ;;  %v3422_v12 = vor.u32 %v3796_v6, %v3419_v8  ;;  %v3337_v2 = vld [vmem:[#allocation2 + $0x20] sm:$0xf]  ;;  %v3339_v6 = vld [vmem:[#allocation2 + $0x30] sm:$0xf0]  ;;  %v3779_v8 = vld [vmem:[#allocation2 + $0x34] sm:$0xf0] }
 0x2d1   :  { %1707 = vmatpush.bf16.msrb.mxu1 %v3194_v16  ;;  %v3430_v16 = vor.u32 %v3797_v14, %v3427_v15  ;;  %v3347_v14 = vld [vmem:[#allocation2 + $0x38] sm:$0xf0] }
 0x2d2   :  { %1733 = vmatpush.bf16.msrb.mxu3 %v3202_v22  ;;  %v3409_v22 = vld [vmem:[#allocation2 + $0xa8] sm:$0xf] }
 0x2d4   :  { %1965 = vmatpush.bf16.msra.mxu0 %v3434_v58  ;;  %v3783_v58 = vld [vmem:[#allocation2 + $0x54] sm:$0xf0] }
 0x2d5   :  { %1978 = vmatpush.bf16.msra.mxu1 %v3438_v63  ;;  %v3363_v63 = vld [vmem:[#allocation2 + $0x58] sm:$0xf0] }
 0x2d6   :  { %2004 = vmatpush.bf16.msra.mxu3 %v3446_v3  ;;  %v3778_v3 = vld [vmem:[#allocation2 + $0x2c] sm:$0xf0] }
 0x2d9   :  { %1979 = vmatpush.bf16.msra.mxu1 %v3422_v12 }
 0x2da   :  { %2005 = vmatpush.bf16.msra.mxu3 %v3430_v16 }
 0x33e   :  { %v1418_v4 = vpop.f32.mrf.mxu0  ;;  %v1431_v5 = vpop.f32.mrf.mxu1 }
 0x33f   :  { %v1461_v9 = vadd.f32 %v3051_v53, %v1418_v4  ;;  %v1462_v11 = vadd.f32 %v3052_v61, %v1431_v5  ;;  %v3803_v61 = vld [vmem:[#allocation2 + $0xf4] sm:$0xf0]  ;;  %v3417_v4 = vld [vmem:[#allocation2 + $0xc0] sm:$0xf]  ;;  %v3798_v5 = vld [vmem:[#allocation2 + $0xcc] sm:$0xf0] }
 0x340   :  { %v3442_v0 = vor.u32 %v3803_v61, %v3441_v60  ;;  %v3418_v7 = vor.u32 %v3798_v5, %v3417_v4  ;;  %v3362_v60 = vor.u32 %v3783_v58, %v3361_v57  ;;  %v3781_v61 = vld [vmem:[#allocation2 + $0x4c] sm:$0xf]  ;;  %v3776_v4 = vld [vmem:[#allocation2 + $0x24] sm:$0xf]  ;;  %v3338_v5 = vor.u32 %v3778_v3, %v3337_v2  ;;  %v3565_v3 = vld [vmem:[#allocation2 + $0xe0] sm:$0xf] }
 0x341   :  { %v1465_v62 = vmul.f32 0.5, %v1461_v9  ;;  %v1469_v20 = vmul.f32 0.5, %v1462_v11  ;;  %v3425_v9 = vld [vmem:[#allocation2 + $0xc8] sm:$0xf]  ;;  %v3799_v11 = vld [vmem:[#allocation2 + $0xd4] sm:$0xf0] }
 0x342   :  { %1991 = vmatpush.bf16.msra.mxu2 %v3442_v0  ;;  %v3426_v13 = vor.u32 %v3799_v11, %v3425_v9  ;;  %1966 = vmatpush.bf16.msra.mxu0 %v3418_v7  ;;  %v3366_v0 = vor.u32 %v3781_v61, %v3363_v63  ;;  %v3345_v7 = vld [vmem:[#allocation2 + $0x28] sm:$0xf]  ;;  %v3342_v11 = vor.u32 %v3776_v4, %v3339_v6  ;;  %v3834_v4 = vld [vmem:[#allocation2 + $0xec] sm:$0xf0] }
 0x343   :  { %3877 = vtanh.f32 %v1465_v62  ;;  %v3402_v62 = vor.u32 %v3794_v18, %v3401_v17  ;;  %v3184_v9 = vld [vmem:[%s4343_s0 + $0xa8] sm:$0xff]  ;;  %v3346_v12 = vor.u32 %v3779_v8, %v3345_v7  ;;  %v3321_v18 = vld [vmem:[#allocation2] sm:$0xf]  ;;  %v3566_v6 = vor.u32 %v3834_v4, %v3565_v3  ;;  %v3567_v7 = vld [vmem:[#allocation2 + $0xf0] sm:$0xf0] }
 0x344   :  { %3879 = vtanh.f32 %v1469_v20  ;;  %v3403_v20 = vld [vmem:[#allocation2 + $0xb0] sm:$0xf0]  ;;  %v3573_v8 = vld [vmem:[#allocation2 + $0xe8] sm:$0xf] }
 0x345   :  { %v1444_v25 = vpop.f32.mrf.mxu2  ;;  %v1457_v26 = vpop.f32.mrf.mxu3  ;;  %v3487_v4 = vld [vmem:[#allocation2 + $0x50] sm:$0xf0] }
 0x346   :  { %v1463_v27 = vadd.f32 %v3053_v23, %v1444_v25  ;;  %v1464_v28 = vadd.f32 %v3054_v24, %v1457_v26  ;;  %v1420_v29 = vpop.f32.mrf.mxu0  ;;  %v1433_v30 = vpop.f32.mrf.mxu1  ;;  %1992 = vmatpush.bf16.msra.mxu2 %v3426_v13  ;;  %v3795_v23 = vld [vmem:[#allocation2 + $0xb4] sm:$0xf0]  ;;  %v3406_v24 = vor.u32 %v3792_v19, %v3403_v20  ;;  %v3793_v26 = vld [vmem:[#allocation2 + $0xac] sm:$0xf]  ;;  %1967 = vmatpush.bf16.msra.mxu0 %v3402_v62  ;;  %v3774_v19 = vld [vmem:[#allocation2 + $0xc] sm:$0xf0] }
 0x347   :  { %v3410_v25 = vor.u32 %v3795_v23, %v3409_v22  ;;  %v3385_v29 = vld [vmem:[#allocation2 + $0x80] sm:$0xf]  ;;  %v3790_v30 = vld [vmem:[#allocation2 + $0x8c] sm:$0xf0]  ;;  %v3777_v13 = vld [vmem:[#allocation2 + $0x2c] sm:$0xf]  ;;  %v3322_v23 = vor.u32 %v3774_v19, %v3321_v18 }
 0x348   :  { %3881 = vtanh.f32 %v1463_v27  ;;  %v1474_v10 = vmul.f32 0.5, %v1464_v28  ;;  %v3411_v27 = vld [vmem:[#allocation2 + $0xb8] sm:$0xf0]  ;;  %1980 = vmatpush.bf16.msra.mxu1 %v3406_v24  ;;  %v3350_v15 = vor.u32 %v3777_v13, %v3347_v14  ;;  %v3772_v62 = vld [vmem:[#allocation2 + $0x4] sm:$0xf] }
 0x349   :  { %v3878_v31 = vpop.eup %3877  ;;  %v3414_v28 = vor.u32 %v3793_v26, %v3411_v27  ;;  %v3323_v24 = vld [vmem:[#allocation2 + $0x10] sm:$0xf0]  ;;  %v3775_v26 = vld [vmem:[#allocation2 + $0x14] sm:$0xf0]  ;;  %v3833_v13 = vld [vmem:[#allocation2 + $0xec] sm:$0xf] }
 0x34a   :  { %v3880_v33 = vpop.eup %3879  ;;  %v1467_v34 = vmul.f32 0.5, %v3878_v31  ;;  %3883 = vtanh.f32 %v1474_v10  ;;  %1993 = vmatpush.bf16.msra.mxu2 %v3410_v25  ;;  %v3788_v10 = vld [vmem:[#allocation2 + $0x84] sm:$0xf]  ;;  %v3386_v31 = vor.u32 %v3790_v30, %v3385_v29  ;;  %v3329_v25 = vld [vmem:[#allocation2 + $0x8] sm:$0xf]  ;;  %v3326_v27 = vor.u32 %v3772_v62, %v3323_v24 }
 0x34b   :  { %v1471_v35 = vmul.f32 0.5, %v3880_v33  ;;  %2006 = vmatpush.bf16.msra.mxu3 %v3414_v28  ;;  %v3387_v33 = vld [vmem:[#allocation2 + $0x90] sm:$0xf0]  ;;  %v3330_v28 = vor.u32 %v3775_v26, %v3329_v25  ;;  %v3773_v29 = vld [vmem:[#allocation2 + $0xc] sm:$0xf] }
 0x34c   :  { %v1468_v36 = vadd.f32 0.5, %v1467_v34  ;;  %v3393_v34 = vld [vmem:[#allocation2 + $0x88] sm:$0xf]  ;;  %1968 = vmatpush.bf16.msra.mxu0 %v3386_v31  ;;  %v3331_v30 = vld [vmem:[#allocation2 + $0x18] sm:$0xf0] }
 0x34d   :  { %v1472_v37 = vadd.f32 0.5, %v1471_v35  ;;  %v1446_v38 = vpop.f32.mrf.mxu2  ;;  %v1459_v39 = vpop.f32.mrf.mxu3  ;;  %v3791_v35 = vld [vmem:[#allocation2 + $0x94] sm:$0xf0]  ;;  %v3575_v14 = vld [vmem:[#allocation2 + $0xf8] sm:$0xf0] }
 0x34e   :  { %v3882_v40 = vpop.eup %3881  ;;  %v3789_v38 = vld [vmem:[#allocation2 + $0x8c] sm:$0xf]  ;;  %v3395_v39 = vld [vmem:[#allocation2 + $0x98] sm:$0xf0]  ;;  %v3828_v18 = vld [vmem:[#allocation2 + $0xc4] sm:$0xf] }
 0x34f   :  { %v1478_v41 = vmul.f32 %v1472_v37, %v4163_v32  ;;  %v1479_v21 = vmul.f32 %v3882_v40, %v1468_v36  ;;  %v3390_v36 = vor.u32 %v3788_v10, %v3387_v33  ;;  %v3394_v37 = vor.u32 %v3791_v35, %v3393_v34  ;;  %v3185_v34 = vld [vmem:[%s4343_s0 + $0xb0] sm:$0xff]  ;;  %v3186_v35 = vld [vmem:[%s4343_s0 + $0xb8] sm:$0xff]  ;;  %v3829_v25 = vld [vmem:[#allocation2 + $0xcc] sm:$0xf] }
 0x350   :  { %v3884_v42 = vpop.eup %3883  ;;  %v3398_v40 = vor.u32 %v3789_v38, %v3395_v39  ;;  %v3334_v33 = vor.u32 %v3773_v29, %v3331_v30  ;;  %v3551_v62 = vld [vmem:[#allocation2 + $0xd0] sm:$0xf0]  ;;  %v3559_v26 = vld [vmem:[#allocation2 + $0xd8] sm:$0xf0]  ;;  %v3826_v29 = vld [vmem:[#allocation2 + $0xac] sm:$0xf0] }
 0x351   :  { %v4203_v43 = vadd.f32 %v1479_v21, %v1478_v41  ;;  %v1476_v44 = vmul.f32 0.5, %v3884_v42  ;;  %1981 = vmatpush.bf16.msra.mxu1 %v3390_v36  ;;  %1994 = vmatpush.bf16.msra.mxu2 %v3394_v37  ;;  %v3369_v41 = vld [vmem:[#allocation2 + $0x60] sm:$0xf]  ;;  %v3786_v21 = vld [vmem:[#allocation2 + $0x6c] sm:$0xf0] }
 0x352   :  { %v3784_v42 = vld [vmem:[#allocation2 + $0x64] sm:$0xf]  ;;  %2007 = vmatpush.bf16.msra.mxu3 %v3398_v40 }
 0x353   :  { %3885 = vtanh.f32 %v4203_v43  ;;  %v1477_v45 = vadd.f32 0.5, %v1476_v44  ;;  %v3370_v44 = vor.u32 %v3786_v21, %v3369_v41  ;;  %v3824_v30 = vld [vmem:[#allocation2 + $0xa4] sm:$0xf] }
 0x355   :  { %1969 = vmatpush.bf16.msra.mxu0 %v3370_v44 }
 0x359   :  { %v3886_v46 = vpop.eup %3885 }
 0x35a   :  { %v1482_v47 = vmul.f32 %v3886_v46, %v1477_v45  ;;  %v3371_v45 = vld [vmem:[#allocation2 + $0x70] sm:$0xf0]  ;;  %v3377_v46 = vld [vmem:[#allocation2 + $0x68] sm:$0xf] }
 0x35c   :  { %v2419_v48 = vrot.slane %v1482_v47, 1  ;;  %v2420_v49 = vrot.slane %v1482_v47, 2  ;;  %v2421_v50 = vrot.slane %v1482_v47, 3  ;;  %2433 = vst [vmem:[%s4345_s2 + $0x4] sm:$0x1] %v1482_v47  ;;  %v2422_v51 = vrot.slane %v1482_v47, 4 }
 0x35d   :  { %v1494_v52 = vpack.c.bf16 %v1482_v47, %v1482_v47  ;;  %v2423_v32 = vrot.slane %v1482_v47, 5  ;;  %v2424_v53 = vrot.slane %v1482_v47, 6  ;;  %v2425_v54 = vrot.slane %v1482_v47, 7  ;;  %v3787_v47 = vld [vmem:[#allocation2 + $0x74] sm:$0xf0] }
 0x35e   :  { %2434 = vst [vmem:[%s4345_s2 + $0xc] sm:$0x1] %v2419_v48  ;;  %v3374_v48 = vor.u32 %v3784_v42, %v3371_v45 }
 0x35f   :  { %2435 = vst [vmem:[%s4345_s2 + $0x14] sm:$0x1] %v2420_v49  ;;  %1695 = vmatmul.bf16.vlgmr.msrb.gmra.mxu0 %v1494_v52  ;;  %1708 = vmatmul.bf16.vlgmr.msrb.gmra.mxu1 %v1494_v52  ;;  %v3378_v49 = vor.u32 %v3787_v47, %v3377_v46 }
 0x360   :  { %2436 = vst [vmem:[%s4345_s2 + $0x1c] sm:$0x1] %v2421_v50  ;;  %1721 = vmatmul.bf16.vlgmr.msrb.gmra.mxu2 %v1494_v52  ;;  %1734 = vmatmul.bf16.vlgmr.msrb.gmra.mxu3 %v1494_v52  ;;  %v3785_v50 = vld [vmem:[#allocation2 + $0x6c] sm:$0xf] }
 0x361   :  { %2437 = vst [vmem:[%s4345_s2 + $0x24] sm:$0x1] %v2422_v51  ;;  %v3379_v51 = vld [vmem:[#allocation2 + $0x78] sm:$0xf0]  ;;  %1982 = vmatpush.bf16.msra.mxu1 %v3374_v48  ;;  %1995 = vmatpush.bf16.msra.mxu2 %v3378_v49 }
 0x362   :  { %2438 = vst [vmem:[%s4345_s2 + $0x2c] sm:$0x1] %v2423_v32  ;;  %v3382_v52 = vor.u32 %v3785_v50, %v3379_v51  ;;  %v3353_v32 = vld [vmem:[#allocation2 + $0x40] sm:$0xf] }
 0x363   :  { %2439 = vst [vmem:[%s4345_s2 + $0x34] sm:$0x1] %v2424_v53  ;;  %v3782_v53 = vld [vmem:[#allocation2 + $0x4c] sm:$0xf0] }
 0x364   :  { %2440 = vst [vmem:[%s4345_s2 + $0x3c] sm:$0x1] %v2425_v54  ;;  %v3780_v54 = vld [vmem:[#allocation2 + $0x44] sm:$0xf]  ;;  %2008 = vmatpush.bf16.msra.mxu3 %v3382_v52  ;;  %v3354_v55 = vor.u32 %v3782_v53, %v3353_v32 }
 0x365   :  { %v3358_v59 = vor.u32 %v3780_v54, %v3355_v56  ;;  %1996 = vmatpush.bf16.msra.mxu2 %v3362_v60 }
 0x366   :  { %1970 = vmatpush.bf16.msra.mxu0 %v3354_v55 }
 0x367   :  { %1983 = vmatpush.bf16.msra.mxu1 %v3358_v59 }
 0x368   :  { %2009 = vmatpush.bf16.msra.mxu3 %v3366_v0 }
 0x369   :  { %1997 = vmatpush.bf16.msra.mxu2 %v3346_v12 }
 0x36a   :  { %1971 = vmatpush.bf16.msra.mxu0 %v3338_v5  ;;  %v3832_v5 = vld [vmem:[#allocation2 + $0xe4] sm:$0xf] }
 0x36b   :  { %1984 = vmatpush.bf16.msra.mxu1 %v3342_v11  ;;  %v3570_v11 = vor.u32 %v3832_v5, %v3567_v7  ;;  %v3493_v5 = vld [vmem:[#allocation2 + $0x48] sm:$0xf] }
 0x36c   :  { %2010 = vmatpush.bf16.msra.mxu3 %v3350_v15  ;;  %v3578_v15 = vor.u32 %v3833_v13, %v3575_v14  ;;  %v3315_v13 = vld [vmem:[%s4343_s0 + $0xc0] sm:$0xff] }
 0x36d   :  { %1998 = vmatpush.bf16.msra.mxu2 %v3330_v28  ;;  %v3533_v28 = vld [vmem:[#allocation2 + $0xa0] sm:$0xf] }
 0x36e   :  { %1972 = vmatpush.bf16.msra.mxu0 %v3322_v23  ;;  %v3554_v23 = vor.u32 %v3828_v18, %v3551_v62  ;;  %v3469_v14 = vld [vmem:[#allocation2 + $0x20] sm:$0xf]  ;;  %v3471_v18 = vld [vmem:[#allocation2 + $0x30] sm:$0xf0]  ;;  %v3811_v62 = vld [vmem:[#allocation2 + $0x34] sm:$0xf0] }
 0x36f   :  { %1985 = vmatpush.bf16.msra.mxu1 %v3326_v27  ;;  %v3562_v27 = vor.u32 %v3829_v25, %v3559_v26  ;;  %v3479_v25 = vld [vmem:[#allocation2 + $0x38] sm:$0xf0] }
 0x370   :  { %2011 = vmatpush.bf16.msra.mxu3 %v3334_v33  ;;  %v3541_v33 = vld [vmem:[#allocation2 + $0xa8] sm:$0xf] }
 0x372   :  { %2243 = vmatpush.bf16.msrb.mxu0 %v3566_v6  ;;  %v3815_v6 = vld [vmem:[#allocation2 + $0x54] sm:$0xf0] }
 0x373   :  { %2256 = vmatpush.bf16.msrb.mxu1 %v3570_v11  ;;  %v3495_v11 = vld [vmem:[#allocation2 + $0x58] sm:$0xf0] }
 0x374   :  { %2282 = vmatpush.bf16.msrb.mxu3 %v3578_v15  ;;  %v3810_v15 = vld [vmem:[#allocation2 + $0x2c] sm:$0xf0] }
 0x377   :  { %2257 = vmatpush.bf16.msrb.mxu1 %v3554_v23 }
 0x378   :  { %2283 = vmatpush.bf16.msrb.mxu3 %v3562_v27 }
 0x3dc   :  { %v1696_v16 = vpop.f32.mrf.mxu0  ;;  %v1709_v17 = vpop.f32.mrf.mxu1 }
 0x3dd   :  { %v1739_v20 = vadd.f32 %v3183_v1, %v1696_v16  ;;  %v1740_v22 = vadd.f32 %v3184_v9, %v1709_v17  ;;  %v3835_v9 = vld [vmem:[#allocation2 + $0xf4] sm:$0xf0]  ;;  %v3549_v16 = vld [vmem:[#allocation2 + $0xc0] sm:$0xf]  ;;  %v3830_v17 = vld [vmem:[#allocation2 + $0xcc] sm:$0xf0] }
 0x3de   :  { %v3574_v12 = vor.u32 %v3835_v9, %v3573_v8  ;;  %v3550_v19 = vor.u32 %v3830_v17, %v3549_v16  ;;  %v3494_v8 = vor.u32 %v3815_v6, %v3493_v5  ;;  %v3813_v9 = vld [vmem:[#allocation2 + $0x4c] sm:$0xf]  ;;  %v3808_v16 = vld [vmem:[#allocation2 + $0x24] sm:$0xf]  ;;  %v3470_v17 = vor.u32 %v3810_v15, %v3469_v14 }
 0x3df   :  { %v1743_v10 = vmul.f32 0.5, %v1739_v20  ;;  %v1747_v31 = vmul.f32 0.5, %v1740_v22  ;;  %v3557_v20 = vld [vmem:[#allocation2 + $0xc8] sm:$0xf]  ;;  %v3831_v22 = vld [vmem:[#allocation2 + $0xd4] sm:$0xf0] }
 0x3e0   :  { %2269 = vmatpush.bf16.msrb.mxu2 %v3574_v12  ;;  %v3558_v24 = vor.u32 %v3831_v22, %v3557_v20  ;;  %2244 = vmatpush.bf16.msrb.mxu0 %v3550_v19  ;;  %v3498_v12 = vor.u32 %v3813_v9, %v3495_v11  ;;  %v3477_v19 = vld [vmem:[#allocation2 + $0x28] sm:$0xf]  ;;  %v3474_v22 = vor.u32 %v3808_v16, %v3471_v18  ;;  %v3447_v15 = vld [vmem:[%s4343_s0 + $0xe0] sm:$0xff] }
 0x3e1   :  { %3887 = vtanh.f32 %v1743_v10  ;;  %v3534_v10 = vor.u32 %v3826_v29, %v3533_v28  ;;  %v3316_v20 = vld [vmem:[%s4343_s0 + $0xc8] sm:$0xff]  ;;  %v3478_v23 = vor.u32 %v3811_v62, %v3477_v19  ;;  %v3453_v29 = vld [vmem:[#allocation2] sm:$0xf] }
 0x3e2   :  { %3889 = vtanh.f32 %v1747_v31  ;;  %v3535_v31 = vld [vmem:[#allocation2 + $0xb0] sm:$0xf0]  ;;  %v3448_v16 = vld [vmem:[%s4343_s0 + $0xe8] sm:$0xff] }
 0x3e3   :  { %v1722_v36 = vpop.f32.mrf.mxu2  ;;  %v1735_v37 = vpop.f32.mrf.mxu3 }
 0x3e4   :  { %v1741_v38 = vadd.f32 %v3185_v34, %v1722_v36  ;;  %v1742_v39 = vadd.f32 %v3186_v35, %v1735_v37  ;;  %v1698_v40 = vpop.f32.mrf.mxu0  ;;  %v1711_v41 = vpop.f32.mrf.mxu1  ;;  %2270 = vmatpush.bf16.msrb.mxu2 %v3558_v24  ;;  %v3827_v34 = vld [vmem:[#allocation2 + $0xb4] sm:$0xf0]  ;;  %v3538_v35 = vor.u32 %v3824_v30, %v3535_v31  ;;  %v3825_v37 = vld [vmem:[#allocation2 + $0xac] sm:$0xf]  ;;  %2245 = vmatpush.bf16.msrb.mxu0 %v3534_v10  ;;  %v3806_v30 = vld [vmem:[#allocation2 + $0xc] sm:$0xf0] }
 0x3e5   :  { %v3542_v36 = vor.u32 %v3827_v34, %v3541_v33  ;;  %v3517_v40 = vld [vmem:[#allocation2 + $0x80] sm:$0xf]  ;;  %v3822_v41 = vld [vmem:[#allocation2 + $0x8c] sm:$0xf0]  ;;  %v3809_v24 = vld [vmem:[#allocation2 + $0x2c] sm:$0xf]  ;;  %v3454_v34 = vor.u32 %v3806_v30, %v3453_v29 }
 0x3e6   :  { %3891 = vtanh.f32 %v1741_v38  ;;  %v1752_v21 = vmul.f32 0.5, %v1742_v39  ;;  %v3543_v38 = vld [vmem:[#allocation2 + $0xb8] sm:$0xf0]  ;;  %2258 = vmatpush.bf16.msrb.mxu1 %v3538_v35  ;;  %v3482_v26 = vor.u32 %v3809_v24, %v3479_v25  ;;  %v3804_v10 = vld [vmem:[#allocation2 + $0x4] sm:$0xf] }
 0x3e7   :  { %v3888_v42 = vpop.eup %3887  ;;  %v3546_v39 = vor.u32 %v3825_v37, %v3543_v38  ;;  %v3455_v35 = vld [vmem:[#allocation2 + $0x10] sm:$0xf0]  ;;  %v3807_v37 = vld [vmem:[#allocation2 + $0x14] sm:$0xf0] }
 0x3e8   :  { %v3890_v44 = vpop.eup %3889  ;;  %v1745_v45 = vmul.f32 0.5, %v3888_v42  ;;  %3893 = vtanh.f32 %v1752_v21  ;;  %2271 = vmatpush.bf16.msrb.mxu2 %v3542_v36  ;;  %v3820_v21 = vld [vmem:[#allocation2 + $0x84] sm:$0xf]  ;;  %v3518_v42 = vor.u32 %v3822_v41, %v3517_v40  ;;  %v3461_v36 = vld [vmem:[#allocation2 + $0x8] sm:$0xf]  ;;  %v3458_v38 = vor.u32 %v3804_v10, %v3455_v35  ;;  %v3450_v24 = vld [vmem:[%s4343_s0 + $0xf8] sm:$0xff] }
 0x3e9   :  { %v1749_v46 = vmul.f32 0.5, %v3890_v44  ;;  %2284 = vmatpush.bf16.msrb.mxu3 %v3546_v39  ;;  %v3519_v44 = vld [vmem:[#allocation2 + $0x90] sm:$0xf0]  ;;  %v3462_v39 = vor.u32 %v3807_v37, %v3461_v36  ;;  %v3805_v40 = vld [vmem:[#allocation2 + $0xc] sm:$0xf] }
 0x3ea   :  { %v1746_v47 = vadd.f32 0.5, %v1745_v45  ;;  %v3525_v45 = vld [vmem:[#allocation2 + $0x88] sm:$0xf]  ;;  %2246 = vmatpush.bf16.msrb.mxu0 %v3518_v42  ;;  %v3463_v41 = vld [vmem:[#allocation2 + $0x18] sm:$0xf0] }
 0x3eb   :  { %v1750_v48 = vadd.f32 0.5, %v1749_v46  ;;  %v1724_v49 = vpop.f32.mrf.mxu2  ;;  %v1737_v50 = vpop.f32.mrf.mxu3  ;;  %v3823_v46 = vld [vmem:[#allocation2 + $0x94] sm:$0xf0] }
 0x3ec   :  { %v3892_v51 = vpop.eup %3891  ;;  %v3821_v49 = vld [vmem:[#allocation2 + $0x8c] sm:$0xf]  ;;  %v3527_v50 = vld [vmem:[#allocation2 + $0x98] sm:$0xf0] }
 0x3ed   :  { %v1756_v52 = vmul.f32 %v1750_v48, %v4203_v43  ;;  %v1757_v32 = vmul.f32 %v3892_v51, %v1746_v47  ;;  %v3522_v47 = vor.u32 %v3820_v21, %v3519_v44  ;;  %v3526_v48 = vor.u32 %v3823_v46, %v3525_v45  ;;  %v3317_v45 = vld [vmem:[%s4343_s0 + $0xd0] sm:$0xff]  ;;  %v3318_v46 = vld [vmem:[%s4343_s0 + $0xd8] sm:$0xff] }
 0x3ee   :  { %v3894_v53 = vpop.eup %3893  ;;  %v3530_v51 = vor.u32 %v3821_v49, %v3527_v50  ;;  %v3466_v44 = vor.u32 %v3805_v40, %v3463_v41 }
 0x3ef   :  { %v4243_v54 = vadd.f32 %v1757_v32, %v1756_v52  ;;  %v1754_v55 = vmul.f32 0.5, %v3894_v53  ;;  %2259 = vmatpush.bf16.msrb.mxu1 %v3522_v47  ;;  %2272 = vmatpush.bf16.msrb.mxu2 %v3526_v48  ;;  %v3501_v52 = vld [vmem:[#allocation2 + $0x60] sm:$0xf]  ;;  %v3818_v32 = vld [vmem:[#allocation2 + $0x6c] sm:$0xf0] }
 0x3f0   :  { %v3816_v53 = vld [vmem:[#allocation2 + $0x64] sm:$0xf]  ;;  %2285 = vmatpush.bf16.msrb.mxu3 %v3530_v51 }
 0x3f1   :  { %3895 = vtanh.f32 %v4243_v54  ;;  %v1755_v56 = vadd.f32 0.5, %v1754_v55  ;;  %v3502_v55 = vor.u32 %v3818_v32, %v3501_v52 }
 0x3f3   :  { %2247 = vmatpush.bf16.msrb.mxu0 %v3502_v55 }
 0x3f7   :  { %v3896_v57 = vpop.eup %3895 }
 0x3f8   :  { %v1760_v58 = vmul.f32 %v3896_v57, %v1755_v56  ;;  %v3503_v56 = vld [vmem:[#allocation2 + $0x70] sm:$0xf0]  ;;  %v3509_v57 = vld [vmem:[#allocation2 + $0x68] sm:$0xf] }
 0x3fa   :  { %v2443_v59 = vrot.slane %v1760_v58, 1  ;;  %v2444_v60 = vrot.slane %v1760_v58, 2  ;;  %v2445_v61 = vrot.slane %v1760_v58, 3  ;;  %2457 = vst [vmem:[%s4345_s2 + $0x5] sm:$0x1] %v1760_v58  ;;  %v2446_v63 = vrot.slane %v1760_v58, 4 }
 0x3fb   :  { %v1772_v0 = vpack.c.bf16 %v1760_v58, %v1760_v58  ;;  %v2447_v43 = vrot.slane %v1760_v58, 5  ;;  %v2448_v1 = vrot.slane %v1760_v58, 6  ;;  %v2449_v2 = vrot.slane %v1760_v58, 7  ;;  %v3819_v58 = vld [vmem:[#allocation2 + $0x74] sm:$0xf0] }
 0x3fc   :  { %2458 = vst [vmem:[%s4345_s2 + $0xd] sm:$0x1] %v2443_v59  ;;  %v3506_v59 = vor.u32 %v3816_v53, %v3503_v56 }
 0x3fd   :  { %2459 = vst [vmem:[%s4345_s2 + $0x15] sm:$0x1] %v2444_v60  ;;  %1973 = vmatmul.bf16.vlgmr.msra.gmra.mxu0 %v1772_v0  ;;  %1986 = vmatmul.bf16.vlgmr.msra.gmra.mxu1 %v1772_v0  ;;  %v3510_v60 = vor.u32 %v3819_v58, %v3509_v57 }
 0x3fe   :  { %2460 = vst [vmem:[%s4345_s2 + $0x1d] sm:$0x1] %v2445_v61  ;;  %1999 = vmatmul.bf16.vlgmr.msra.gmra.mxu2 %v1772_v0  ;;  %2012 = vmatmul.bf16.vlgmr.msra.gmra.mxu3 %v1772_v0  ;;  %v3817_v61 = vld [vmem:[#allocation2 + $0x6c] sm:$0xf] }
 0x3ff   :  { %2461 = vst [vmem:[%s4345_s2 + $0x25] sm:$0x1] %v2446_v63  ;;  %v3511_v63 = vld [vmem:[#allocation2 + $0x78] sm:$0xf0]  ;;  %2260 = vmatpush.bf16.msrb.mxu1 %v3506_v59  ;;  %2273 = vmatpush.bf16.msrb.mxu2 %v3510_v60 }
 0x400   :  { %2462 = vst [vmem:[%s4345_s2 + $0x2d] sm:$0x1] %v2447_v43  ;;  %v3514_v0 = vor.u32 %v3817_v61, %v3511_v63  ;;  %v3485_v43 = vld [vmem:[#allocation2 + $0x40] sm:$0xf] }
 0x401   :  { %2463 = vst [vmem:[%s4345_s2 + $0x35] sm:$0x1] %v2448_v1  ;;  %v3814_v1 = vld [vmem:[#allocation2 + $0x4c] sm:$0xf0] }
 0x402   :  { %2464 = vst [vmem:[%s4345_s2 + $0x3d] sm:$0x1] %v2449_v2  ;;  %v3812_v2 = vld [vmem:[#allocation2 + $0x44] sm:$0xf]  ;;  %2286 = vmatpush.bf16.msrb.mxu3 %v3514_v0  ;;  %v3486_v3 = vor.u32 %v3814_v1, %v3485_v43 }
 0x403   :  { %v3490_v7 = vor.u32 %v3812_v2, %v3487_v4  ;;  %2274 = vmatpush.bf16.msrb.mxu2 %v3494_v8 }
 0x404   :  { %2248 = vmatpush.bf16.msrb.mxu0 %v3486_v3 }
 0x405   :  { %2261 = vmatpush.bf16.msrb.mxu1 %v3490_v7 }
 0x406   :  { %2287 = vmatpush.bf16.msrb.mxu3 %v3498_v12 }
 0x407   :  { %2275 = vmatpush.bf16.msrb.mxu2 %v3478_v23  ;;  %v3449_v23 = vld [vmem:[%s4343_s0 + $0xf0] sm:$0xff] }
 0x408   :  { %2249 = vmatpush.bf16.msrb.mxu0 %v3470_v17 }
 0x409   :  { %2262 = vmatpush.bf16.msrb.mxu1 %v3474_v22 }
 0x40a   :  { %2288 = vmatpush.bf16.msrb.mxu3 %v3482_v26 }
 0x40b   :  { %2276 = vmatpush.bf16.msrb.mxu2 %v3462_v39 }
 0x40c   :  { %2250 = vmatpush.bf16.msrb.mxu0 %v3454_v34 }
 0x40d   :  { %2263 = vmatpush.bf16.msrb.mxu1 %v3458_v38 }
 0x40e   :  { %2289 = vmatpush.bf16.msrb.mxu3 %v3466_v44 }
 0x47a   :  { %v1974_v27 = vpop.f32.mrf.mxu0  ;;  %v1987_v28 = vpop.f32.mrf.mxu1 }
 0x47b   :  { %v2017_v31 = vadd.f32 %v3315_v13, %v1974_v27  ;;  %v2018_v33 = vadd.f32 %v3316_v20, %v1987_v28 }
 0x47d   :  { %v2021_v21 = vmul.f32 0.5, %v2017_v31  ;;  %v2025_v42 = vmul.f32 0.5, %v2018_v33 }
 0x47f   :  { %3897 = vtanh.f32 %v2021_v21 }
 0x480   :  { %3899 = vtanh.f32 %v2025_v42 }
 0x481   :  { %v2000_v47 = vpop.f32.mrf.mxu2  ;;  %v2013_v48 = vpop.f32.mrf.mxu3 }
 0x482   :  { %v2019_v49 = vadd.f32 %v3317_v45, %v2000_v47  ;;  %v2020_v50 = vadd.f32 %v3318_v46, %v2013_v48  ;;  %v1976_v51 = vpop.f32.mrf.mxu0  ;;  %v1989_v52 = vpop.f32.mrf.mxu1 }
 0x484   :  { %3901 = vtanh.f32 %v2019_v49  ;;  %v2030_v32 = vmul.f32 0.5, %v2020_v50 }
 0x485   :  { %v3898_v53 = vpop.eup %3897 }
 0x486   :  { %v3900_v55 = vpop.eup %3899  ;;  %v2023_v56 = vmul.f32 0.5, %v3898_v53  ;;  %3903 = vtanh.f32 %v2030_v32 }
 0x487   :  { %v2027_v57 = vmul.f32 0.5, %v3900_v55 }
 0x488   :  { %v2024_v58 = vadd.f32 0.5, %v2023_v56 }
 0x489   :  { %v2028_v59 = vadd.f32 0.5, %v2027_v57  ;;  %v2002_v60 = vpop.f32.mrf.mxu2  ;;  %v2015_v61 = vpop.f32.mrf.mxu3 }
 0x48a   :  { %v3902_v63 = vpop.eup %3901 }
 0x48b   :  { %v2034_v0 = vmul.f32 %v2028_v59, %v4243_v54  ;;  %v2035_v43 = vmul.f32 %v3902_v63, %v2024_v58 }
 0x48c   :  { %v3904_v1 = vpop.eup %3903 }
 0x48d   :  { %v2036_v2 = vadd.f32 %v2035_v43, %v2034_v0  ;;  %v2032_v3 = vmul.f32 0.5, %v3904_v1 }
 0x48f   :  { %3905 = vtanh.f32 %v2036_v2  ;;  %v2033_v4 = vadd.f32 0.5, %v2032_v3 }
 0x495   :  { %v3906_v5 = vpop.eup %3905 }
 0x496   :  { %v2038_v6 = vmul.f32 %v3906_v5, %v2033_v4 }
 0x498   :  { %v2467_v7 = vrot.slane %v2038_v6, 1  ;;  %v2468_v8 = vrot.slane %v2038_v6, 2  ;;  %v2469_v9 = vrot.slane %v2038_v6, 3  ;;  %2481 = vst [vmem:[%s4345_s2 + $0x6] sm:$0x1] %v2038_v6  ;;  %v2470_v11 = vrot.slane %v2038_v6, 4 }
 0x499   :  { %v2050_v12 = vpack.c.bf16 %v2038_v6, %v2038_v6  ;;  %v2471_v13 = vrot.slane %v2038_v6, 5  ;;  %v2472_v54 = vrot.slane %v2038_v6, 6  ;;  %v2473_v14 = vrot.slane %v2038_v6, 7 }
 0x49a   :  { %2482 = vst [vmem:[%s4345_s2 + $0xe] sm:$0x1] %v2467_v7 }
 0x49b   :  { %2483 = vst [vmem:[%s4345_s2 + $0x16] sm:$0x1] %v2468_v8  ;;  %2251 = vmatmul.bf16.vlgmr.msrb.gmra.mxu0 %v2050_v12  ;;  %2264 = vmatmul.bf16.vlgmr.msrb.gmra.mxu1 %v2050_v12 }
 0x49c   :  { %2484 = vst [vmem:[%s4345_s2 + $0x1e] sm:$0x1] %v2469_v9  ;;  %2277 = vmatmul.bf16.vlgmr.msrb.gmra.mxu2 %v2050_v12  ;;  %2290 = vmatmul.bf16.vlgmr.msrb.gmra.mxu3 %v2050_v12 }
 0x49d   :  { %2485 = vst [vmem:[%s4345_s2 + $0x26] sm:$0x1] %v2470_v11 }
 0x49e   :  { %2486 = vst [vmem:[%s4345_s2 + $0x2e] sm:$0x1] %v2471_v13 }
 0x49f   :  { %2487 = vst [vmem:[%s4345_s2 + $0x36] sm:$0x1] %v2472_v54 }
 0x4a0   :  { %2488 = vst [vmem:[%s4345_s2 + $0x3e] sm:$0x1] %v2473_v14 }
 0x518   :  { %v2252_v17 = vpop.f32.mrf.mxu0  ;;  %v2265_v18 = vpop.f32.mrf.mxu1 }
 0x519   :  { %v2295_v19 = vadd.f32 %v3447_v15, %v2252_v17  ;;  %v2296_v62 = vadd.f32 %v3448_v16, %v2265_v18 }
 0x51b   :  { %v2299_v20 = vmul.f32 0.5, %v2295_v19  ;;  %v2303_v22 = vmul.f32 0.5, %v2296_v62 }
 0x51d   :  { %3907 = vtanh.f32 %v2299_v20 }
 0x51e   :  { %3909 = vtanh.f32 %v2303_v22 }
 0x51f   :  { %v2278_v25 = vpop.f32.mrf.mxu2  ;;  %v2291_v26 = vpop.f32.mrf.mxu3 }
 0x520   :  { %v2297_v27 = vadd.f32 %v3449_v23, %v2278_v25  ;;  %v2298_v28 = vadd.f32 %v3450_v24, %v2291_v26  ;;  %v2254_v29 = vpop.f32.mrf.mxu0  ;;  %v2267_v30 = vpop.f32.mrf.mxu1 }
 0x522   :  { %3911 = vtanh.f32 %v2297_v27  ;;  %v2308_v10 = vmul.f32 0.5, %v2298_v28 }
 0x523   :  { %v3908_v31 = vpop.eup %3907 }
 0x524   :  { %v3910_v33 = vpop.eup %3909  ;;  %v2301_v34 = vmul.f32 0.5, %v3908_v31  ;;  %3913 = vtanh.f32 %v2308_v10 }
 0x525   :  { %v2305_v35 = vmul.f32 0.5, %v3910_v33 }
 0x526   :  { %v2302_v36 = vadd.f32 0.5, %v2301_v34 }
 0x527   :  { %v2306_v37 = vadd.f32 0.5, %v2305_v35  ;;  %v2280_v38 = vpop.f32.mrf.mxu2  ;;  %v2293_v39 = vpop.f32.mrf.mxu3 }
 0x528   :  { %v3912_v40 = vpop.eup %3911 }
 0x529   :  { %v2312_v41 = vmul.f32 %v2306_v37, %v2036_v2  ;;  %v2313_v21 = vmul.f32 %v3912_v40, %v2302_v36 }
 0x52a   :  { %v3914_v42 = vpop.eup %3913 }
 0x52b   :  { %v2314_v44 = vadd.f32 %v2313_v21, %v2312_v41  ;;  %v2310_v45 = vmul.f32 0.5, %v3914_v42 }
 0x52d   :  { %3915 = vtanh.f32 %v2314_v44  ;;  %v2311_v46 = vadd.f32 0.5, %v2310_v45 }
 0x533   :  { %v3916_v47 = vpop.eup %3915 }
 0x534   :  { %v2316_v48 = vmul.f32 %v3916_v47, %v2311_v46 }
 0x536   :  { %v2491_v49 = vrot.slane %v2316_v48, 1  ;;  %v2492_v50 = vrot.slane %v2316_v48, 2  ;;  %v2493_v51 = vrot.slane %v2316_v48, 3  ;;  %2505 = vst [vmem:[%s4345_s2 + $0x7] sm:$0x1] %v2316_v48  ;;  %v2494_v52 = vrot.slane %v2316_v48, 4 }
 0x537   :  { %v2495_v32 = vrot.slane %v2316_v48, 5  ;;  %v2496_v53 = vrot.slane %v2316_v48, 6  ;;  %v2497_v55 = vrot.slane %v2316_v48, 7 }
 0x538   :  { %2506 = vst [vmem:[%s4345_s2 + $0xf] sm:$0x1] %v2491_v49 }
 0x539   :  { %2507 = vst [vmem:[%s4345_s2 + $0x17] sm:$0x1] %v2492_v50 }
 0x53a   :  { %2508 = vst [vmem:[%s4345_s2 + $0x1f] sm:$0x1] %v2493_v51 }
 0x53b   :  { %2509 = vst [vmem:[%s4345_s2 + $0x27] sm:$0x1] %v2494_v52 }
 0x53c   :  { %2510 = vst [vmem:[%s4345_s2 + $0x2f] sm:$0x1] %v2495_v32 }
 0x53d   :  { %2511 = vst [vmem:[%s4345_s2 + $0x37] sm:$0x1] %v2496_v53 }
 0x53e   :  { %2512 = vst [vmem:[%s4345_s2 + $0x3f] sm:$0x1] %v2497_v55 }
 0x53f   :  { %2517 = vsyncmov [#allocation3] }
 0x542   :  { %s2518_s5 = vpop.sfrf %2517 }
 0x543   :  { %p3579_p0 = scmp.ne.s32.totalorder %s2518_s5, 0 }
 0x545   :  { %2522 = shalt.err (%p3579_p0)  }

</bundles_post_ra>
